<compile_context>
chip_gen: v6e
topology: v6e:2x2x1
jax: 0.10.0
libtpu: 0.0.40
codegen_flags: <defaults>
</compile_context>

<pallas_src>
import functools

import jax
import jax.numpy as jnp
from jax import lax
from jax.experimental import pallas as pl
from jax.experimental.pallas import tpu as pltpu


_SINGLE_BUFFER_WEIGHTS = True  # flipped off by the fallback path in __main__


def _weight_spec(shape):
    """BlockSpec for a grid-invariant weight block (DMA'd once per call)."""
    index_map = lambda b: (0,) * len(shape)
    if _SINGLE_BUFFER_WEIGHTS:
        try:
            # Constant blocks never change across the grid: single-buffer them
            # to halve their VMEM footprint (matters under v7x's 64 MiB).
            return pl.BlockSpec(shape, index_map, pipeline_mode=pl.Buffered(1))
        except Exception:
            pass
    return pl.BlockSpec(shape, index_map)


def _vmem_limit_bytes():
    # ~7/8 of physical VMEM, capped at 112 MiB (v5e/v6e: 128 MiB -> 112 MiB,
    # v7x: 64 MiB -> 56 MiB).  Falls back to a v7x-safe 56 MiB.
    try:
        cap = pltpu.get_tpu_info().vmem_capacity_bytes
    except Exception:
        cap = 64 * 1024 * 1024
    return int(min(cap * 7 // 8, 112 * 1024 * 1024))


# ----------------------------- in-kernel helpers -----------------------------

def _layernorm(x, w, b, eps=1e-6):
    # Matches PreNorm's nn.LayerNorm(dim, eps=1e-06): biased variance, last dim.
    mu = jnp.mean(x, axis=-1, keepdims=True)
    var = jnp.mean((x - mu) ** 2, axis=-1, keepdims=True)
    return (x - mu) * lax.rsqrt(var + eps) * w + b


# ------------------------------ fused layer kernel ----------------------------

def crate_layer_kernel(x_ref, ln1w_ref, ln1b_ref, wqkv_ref, wout_ref,
                       ln2w_ref, ln2b_ref, d_ref, dT_ref, d1T_ref,
                       o_ref, w_scr, attn_scr,
                       *, heads, dim_head, scale, eta, lmbda, q_tile):
    """One full CRATE layer for a single batch element, fully VMEM-resident:
         x = PreNorm(Attention)(x) + x
         x = PreNorm(OvercompleteISTABlock)(x) + x
    """
    x = x_ref[0].astype(jnp.float32)                              # (N, D)
    n, _ = x.shape

    # -------- PreNorm + multi-head (Q = K = V) attention + residual --------
    xn = _layernorm(x, ln1w_ref[0], ln1b_ref[0])                  # (N, D) f32
    # Fused QKV projection: one lane-dense (N, D) @ (D, H*Dh) matmul.
    w_scr[...] = jnp.dot(xn.astype(jnp.bfloat16), wqkv_ref[...],
                         preferred_element_type=jnp.float32)      # (N, H*Dh)

    # Query-tiled attention.  Per (head, q-tile) the score buffer is (tq, N)
    # f32 instead of (H, N, N); head views are static lane-slices of w_scr.
    # TODO(synk): move q-tiles to a second ("parallel") grid axis with an
    # online softmax so v7x megacore can also shard when B == 1.
    tq = min(q_tile, n)
    if n % tq:
        tq = n  # TODO(synk): masked tail handling for a ragged final q tile.
    for h in range(heads):
        wh = w_scr[:, h * dim_head:(h + 1) * dim_head]            # (N, Dh) f32
        kh = wh.astype(jnp.bfloat16)                              # keys == values
        for t in range(n // tq):
            qt = (wh[t * tq:(t + 1) * tq, :] * scale).astype(jnp.bfloat16)
            dots = lax.dot_general(qt, kh, (((1,), (1,)), ((), ())),
                                   preferred_element_type=jnp.float32)  # (tq, N)
            dots = dots - jnp.max(dots, axis=-1, keepdims=True)   # stable softmax
            e = jnp.exp(dots)
            # approx EUP reciprocal; set approx=False for strict parity tests.
            p = e * pl.reciprocal(jnp.sum(e, axis=-1, keepdims=True),
                                  approx=True)
            attn_scr[t * tq:(t + 1) * tq, h * dim_head:(h + 1) * dim_head] = (
                jnp.dot(p.astype(jnp.bfloat16), kh,
                        preferred_element_type=jnp.float32))      # (tq, Dh)
    # Fused output projection: (N, H*Dh) @ (H*Dh, D); contraction over the
    # full H*Dh, no (H, N, D) intermediate, no cross-head reduction.
    x = jnp.dot(attn_scr[...].astype(jnp.bfloat16), wout_ref[...],
                preferred_element_type=jnp.float32) + x           # (N, D)

    # -------- PreNorm + Overcomplete ISTA block + residual --------
    xn2 = _layernorm(x, ln2w_ref[0], ln2b_ref[0])                 # (N, D) f32
    xb = xn2.astype(jnp.bfloat16)
    Dm = d_ref[...]                                               # (D, 4D) bf16
    DmT = dT_ref[...]                                             # (4D, D) bf16 (pre-transposed)
    # negative_lasso_grad = einsum('pd,nlp->nld', D, x) == xn2 @ D
    neg = jnp.dot(xb, Dm, preferred_element_type=jnp.float32)     # (N, 4D)
    z1 = jnp.maximum(eta * neg - eta * lmbda, 0.0)
    # Dz1 = einsum('dp,nlp->nld', D, z1) == z1 @ D.T
    Dz1 = jnp.dot(z1.astype(jnp.bfloat16), DmT,
                  preferred_element_type=jnp.float32)             # (N, D)
    # lasso_grad = einsum('pd,nlp->nld', D, Dz1 - x) == (Dz1 - xn2) @ D
    lasso = jnp.dot((Dz1 - xn2).astype(jnp.bfloat16), Dm,
                    preferred_element_type=jnp.float32)           # (N, 4D)
    z2 = jnp.maximum(z1 - eta * lasso - eta * lmbda, 0.0)
    # xhat = einsum('dp,nlp->nld', D1, z2) == z2 @ D1.T
    xhat = jnp.dot(z2.astype(jnp.bfloat16), d1T_ref[...],
                   preferred_element_type=jnp.float32)            # (N, D)
    o_ref[0] = (xhat + x).astype(o_ref.dtype)


def crate_layer(x, p, *, heads, dim_head, eta=0.1, lmbda=0.1, q_tile=256):
    B, N, D = x.shape
    inner = heads * dim_head
    Dover = p["D"].shape[-1]
    scale = dim_head ** (-0.5)
    kernel = functools.partial(crate_layer_kernel, heads=heads,
                               dim_head=dim_head, scale=scale,
                               eta=eta, lmbda=lmbda, q_tile=q_tile)

    # Advisory cost so XLA can overlap next-layer weight prefetch with compute.
    flops = B * (2 * N * D * inner            # fused QKV projection
                 + 4 * N * N * inner          # scores + attn @ v (all heads)
                 + 2 * N * inner * D          # fused output projection
                 + 8 * N * D * Dover)         # 4 ISTA matmuls
    bytes_accessed = (2 * B * N * D * x.dtype.itemsize            # x in + out
                      + 2 * (2 * D * inner + 3 * D * Dover)       # bf16 weights
                      + 4 * D * 4)                                # LN params
    cost = pl.CostEstimate(flops=flops,
                           transcendentals=B * heads * N * N,
                           bytes_accessed=bytes_accessed)

    return pl.pallas_call(
        kernel,
        out_shape=jax.ShapeDtypeStruct((B, N, D), x.dtype),
        grid=(B,),
        in_specs=[
            pl.BlockSpec((1, N, D), lambda b: (b, 0, 0)),   # x (aliased to out)
            _weight_spec((1, D)),                           # ln1 w
            _weight_spec((1, D)),                           # ln1 b
            _weight_spec((D, inner)),                       # W_qkv  (D, H*Dh)
            _weight_spec((inner, D)),                       # W_out  (H*Dh, D)
            _weight_spec((1, D)),                           # ln2 w
            _weight_spec((1, D)),                           # ln2 b
            _weight_spec((D, Dover)),                       # D      (D, 4D)
            _weight_spec((Dover, D)),                       # D^T    (4D, D)
            _weight_spec((Dover, D)),                       # D1^T   (4D, D)
        ],
        out_specs=pl.BlockSpec((1, N, D), lambda b: (b, 0, 0)),
        scratch_shapes=[
            pltpu.VMEM((N, inner), jnp.float32),            # fused QKV output
            pltpu.VMEM((N, inner), jnp.float32),            # per-head attn out
        ],
        input_output_aliases={0: 0},                        # in-place activations
        compiler_params=pltpu.CompilerParams(
            dimension_semantics=("parallel",),
            vmem_limit_bytes=_vmem_limit_bytes()),
        cost_estimate=cost,
    )(x,
      p["ln1_w"].reshape(1, D), p["ln1_b"].reshape(1, D),
      p["wqkv"], p["wout"],
      p["ln2_w"].reshape(1, D), p["ln2_b"].reshape(1, D),
      p["D"], p["D_T"], p["D1_T"])


# ------------------------------- full model ----------------------------------

def init_transformer_params(key, *, dim, depth, heads, dim_head,
                            overcomplete_ratio=4):
    inner = heads * dim_head
    params = []
    for _ in range(depth):
        key, k1, k2, k3, k4 = jax.random.split(key, 5)
        bound_qkv = (1.0 / dim) ** 0.5                       # ~ nn.Linear default
        bound_out = (1.0 / inner) ** 0.5
        bound_D = (6.0 / (overcomplete_ratio * dim)) ** 0.5  # kaiming_uniform, fan_in=4*dim
        wqkv = jax.random.uniform(k1, (dim, inner), jnp.float32,
                                  -bound_qkv, bound_qkv)
        wout = jax.random.uniform(k2, (inner, dim), jnp.float32,
                                  -bound_out, bound_out)
        Dmat = jax.random.uniform(k3, (dim, overcomplete_ratio * dim),
                                  jnp.float32, -bound_D, bound_D)
        D1mat = jax.random.uniform(k4, (dim, overcomplete_ratio * dim),
                                   jnp.float32, -bound_D, bound_D)
        params.append(dict(
            ln1_w=jnp.ones((dim,), jnp.float32),
            ln1_b=jnp.zeros((dim,), jnp.float32),
            # x @ W-ready, lane-dense layouts, stored bf16 in HBM so the kernel
            # needs no in-kernel transposes and feeds the MXU directly.
            wqkv=wqkv.astype(jnp.bfloat16),                  # (D, H*Dh)
            wout=wout.astype(jnp.bfloat16),                  # (H*Dh, D)
            ln2_w=jnp.ones((dim,), jnp.float32),
            ln2_b=jnp.zeros((dim,), jnp.float32),
            D=Dmat.astype(jnp.bfloat16),                     # (D, 4D)
            D_T=Dmat.T.astype(jnp.bfloat16),                 # (4D, D)  pre-transposed
            D1_T=D1mat.T.astype(jnp.bfloat16),               # (4D, D)  pre-transposed
        ))
    return params


def transformer_forward(x, params, *, heads, dim_head):
    for layer in params:
        x = crate_layer(x, layer, heads=heads, dim_head=dim_head)
    return x


if __name__ == "__main__":
    # Small demo shapes.  Production shapes should keep N, D, H*Dh, 4D as
    # multiples of 128 (v5e) / 256 (v6e, v7x) for full MXU-tile utilization.
    B, N, dim = 2, 8, 32
    depth, heads, dim_head = 2, 4, 8

    key = jax.random.PRNGKey(0)
    key, kx, kp = jax.random.split(key, 3)
    x = jax.random.normal(kx, (B, N, dim), jnp.float32)
    params = init_transformer_params(kp, dim=dim, depth=depth,
                                     heads=heads, dim_head=dim_head)

    fwd = jax.jit(functools.partial(transformer_forward,
                                    heads=heads, dim_head=dim_head))
    try:
        out = jax.block_until_ready(fwd(x, params))
    except Exception:
        # Insurance: if this build rejects single-buffered (Buffered(1))
        # pallas_call blocks, retry with default double-buffered weight specs.
        _SINGLE_BUFFER_WEIGHTS = False
        fwd = jax.jit(functools.partial(transformer_forward,
                                        heads=heads, dim_head=dim_head))
        out = jax.block_until_ready(fwd(x, params))

    assert out.shape == (B, N, dim)
    assert bool(jnp.all(jnp.isfinite(out)))
    print("KERNEL_OK")
</pallas_src>

<mosaic_0001>
module attributes {stable_mosaic.version = 11 : i64} {
  func.func @crate_layer_kernel(%arg0: i32, %arg1: memref<1x8x32xf32, #tpu.memory_space<vmem>>, %arg2: memref<1x32xf32, #tpu.memory_space<vmem>>, %arg3: memref<1x32xf32, #tpu.memory_space<vmem>>, %arg4: memref<32x32xbf16, #tpu.memory_space<vmem>>, %arg5: memref<32x32xbf16, #tpu.memory_space<vmem>>, %arg6: memref<1x32xf32, #tpu.memory_space<vmem>>, %arg7: memref<1x32xf32, #tpu.memory_space<vmem>>, %arg8: memref<32x128xbf16, #tpu.memory_space<vmem>>, %arg9: memref<128x32xbf16, #tpu.memory_space<vmem>>, %arg10: memref<128x32xbf16, #tpu.memory_space<vmem>>, %arg11: memref<1x8x32xf32, #tpu.memory_space<vmem>>, %arg12: memref<8x32xf32, #tpu.memory_space<vmem>>, %arg13: memref<8x32xf32, #tpu.memory_space<vmem>>) attributes {dimension_semantics = [#tpu.dimension_semantics<parallel>], iteration_bounds = array<i64: 2>, scalar_prefetch = 0 : i64, scratch_operands = 2 : i64, tpu.core_type = #tpu.core_type<tc>, window_params = [{transform_indices = @transform_0, window_bounds = array<i64: 1, 8, 32>}, {pipeline_mode = #tpu.pipeline_mode<synchronous>, transform_indices = @transform_1, window_bounds = array<i64: 1, 32>}, {pipeline_mode = #tpu.pipeline_mode<synchronous>, transform_indices = @transform_2, window_bounds = array<i64: 1, 32>}, {pipeline_mode = #tpu.pipeline_mode<synchronous>, transform_indices = @transform_3, window_bounds = array<i64: 32, 32>}, {pipeline_mode = #tpu.pipeline_mode<synchronous>, transform_indices = @transform_4, window_bounds = array<i64: 32, 32>}, {pipeline_mode = #tpu.pipeline_mode<synchronous>, transform_indices = @transform_5, window_bounds = array<i64: 1, 32>}, {pipeline_mode = #tpu.pipeline_mode<synchronous>, transform_indices = @transform_6, window_bounds = array<i64: 1, 32>}, {pipeline_mode = #tpu.pipeline_mode<synchronous>, transform_indices = @transform_7, window_bounds = array<i64: 32, 128>}, {pipeline_mode = #tpu.pipeline_mode<synchronous>, transform_indices = @transform_8, window_bounds = array<i64: 128, 32>}, {pipeline_mode = #tpu.pipeline_mode<synchronous>, transform_indices = @transform_9, window_bounds = array<i64: 128, 32>}, {transform_indices = @transform_10, window_bounds = array<i64: 1, 8, 32>}]} {
    %c0 = arith.constant 0 : index
    %c0_0 = arith.constant 0 : index
    %c0_1 = arith.constant 0 : index
    %0 = vector.load %arg1[%c0, %c0_0, %c0_1] : memref<1x8x32xf32, #tpu.memory_space<vmem>>, vector<1x8x32xf32>
    %1 = vector.shape_cast %0 : vector<1x8x32xf32> to vector<8x32xf32>
    %c0_2 = arith.constant 0 : index
    %c0_3 = arith.constant 0 : index
    %2 = vector.load %arg2[%c0_2, %c0_3] : memref<1x32xf32, #tpu.memory_space<vmem>>, vector<1x32xf32>
    %3 = vector.shape_cast %2 : vector<1x32xf32> to vector<32xf32>
    %c0_4 = arith.constant 0 : index
    %c0_5 = arith.constant 0 : index
    %4 = vector.load %arg3[%c0_4, %c0_5] : memref<1x32xf32, #tpu.memory_space<vmem>>, vector<1x32xf32>
    %5 = vector.shape_cast %4 : vector<1x32xf32> to vector<32xf32>
    %cst = arith.constant dense<0.000000e+00> : vector<8xf32>
    %6 = vector.multi_reduction <add>, %1, %cst [1] : vector<8x32xf32> to vector<8xf32>
    %7 = vector.shape_cast %6 : vector<8xf32> to vector<8x1xf32>
    %cst_6 = arith.constant 3.200000e+01 : f32
    %8 = vector.broadcast %cst_6 : f32 to vector<8x1xf32>
    %9 = arith.divf %7, %8 : vector<8x1xf32>
    %10 = vector.broadcast %9 : vector<8x1xf32> to vector<8x32xf32>
    %11 = arith.subf %1, %10 : vector<8x32xf32>
    %12 = arith.mulf %11, %11 : vector<8x32xf32>
    %cst_7 = arith.constant dense<0.000000e+00> : vector<8xf32>
    %13 = vector.multi_reduction <add>, %12, %cst_7 [1] : vector<8x32xf32> to vector<8xf32>
    %14 = vector.shape_cast %13 : vector<8xf32> to vector<8x1xf32>
    %cst_8 = arith.constant 3.200000e+01 : f32
    %15 = vector.broadcast %cst_8 : f32 to vector<8x1xf32>
    %16 = arith.divf %14, %15 : vector<8x1xf32>
    %17 = vector.broadcast %9 : vector<8x1xf32> to vector<8x32xf32>
    %18 = arith.subf %1, %17 : vector<8x32xf32>
    %cst_9 = arith.constant 9.99999997E-7 : f32
    %19 = vector.broadcast %cst_9 : f32 to vector<8x1xf32>
    %20 = arith.addf %16, %19 : vector<8x1xf32>
    %21 = math.rsqrt %20 : vector<8x1xf32>
    %22 = vector.broadcast %21 : vector<8x1xf32> to vector<8x32xf32>
    %23 = arith.mulf %18, %22 : vector<8x32xf32>
    %24 = vector.shape_cast %3 : vector<32xf32> to vector<1x32xf32>
    %25 = vector.broadcast %24 : vector<1x32xf32> to vector<8x32xf32>
    %26 = arith.mulf %23, %25 : vector<8x32xf32>
    %27 = vector.shape_cast %5 : vector<32xf32> to vector<1x32xf32>
    %28 = vector.broadcast %27 : vector<1x32xf32> to vector<8x32xf32>
    %29 = arith.addf %26, %28 : vector<8x32xf32>
    %30 = arith.truncf %29 : vector<8x32xf32> to vector<8x32xbf16>
    %c0_10 = arith.constant 0 : index
    %c0_11 = arith.constant 0 : index
    %31 = vector.load %arg4[%c0_10, %c0_11] : memref<32x32xbf16, #tpu.memory_space<vmem>>, vector<32x32xbf16>
    %cst_12 = arith.constant dense<0.000000e+00> : vector<8x32xf32>
    %32 = tpu.matmul %30, %31, %cst_12 {dimension_numbers = #tpu.dot_dimension_numbers<[1], [0], [0], [1], [0, 0, 1, 1], [], []>} : vector<8x32xbf16>, vector<32x32xbf16>, vector<8x32xf32> -> vector<8x32xf32>
    %c0_13 = arith.constant 0 : index
    %c0_14 = arith.constant 0 : index
    %33 = vector.load %arg12[%c0_13, %c0_14] : memref<8x32xf32, #tpu.memory_space<vmem>>, vector<8x32xf32>
    tpu.vector_store %arg12[%c0_13, %c0_14], %32 {strides = array<i32>} : memref<8x32xf32, #tpu.memory_space<vmem>>, vector<8x32xf32>,
    %c0_15 = arith.constant 0 : index
    %c0_16 = arith.constant 0 : index
    %34 = vector.load %arg12[%c0_15, %c0_16] : memref<8x32xf32, #tpu.memory_space<vmem>>, vector<8x8xf32>
    %35 = arith.truncf %34 : vector<8x8xf32> to vector<8x8xbf16>
    %cst_17 = arith.constant 0.353553385 : f32
    %36 = vector.broadcast %cst_17 : f32 to vector<8x8xf32>
    %37 = arith.mulf %34, %36 : vector<8x8xf32>
    %38 = arith.truncf %37 : vector<8x8xf32> to vector<8x8xbf16>
    %cst_18 = arith.constant dense<0.000000e+00> : vector<8x8xf32>
    %39 = tpu.matmul %38, %35, %cst_18 {dimension_numbers = #tpu.dot_dimension_numbers<[1], [1], [0], [0], [0, 0, 1, 0], [], []>} : vector<8x8xbf16>, vector<8x8xbf16>, vector<8x8xf32> -> vector<8x8xf32>
    %cst_19 = arith.constant dense<0xFF800000> : vector<8xf32>
    %40 = vector.multi_reduction <maximumf>, %39, %cst_19 [1] : vector<8x8xf32> to vector<8xf32>
    %41 = vector.shape_cast %40 : vector<8xf32> to vector<8x1xf32>
    %42 = vector.broadcast %41 : vector<8x1xf32> to vector<8x8xf32>
    %43 = arith.subf %39, %42 : vector<8x8xf32>
    %44 = math.exp %43 : vector<8x8xf32>
    %cst_20 = arith.constant dense<0.000000e+00> : vector<8xf32>
    %45 = vector.multi_reduction <add>, %44, %cst_20 [1] : vector<8x8xf32> to vector<8xf32>
    %46 = vector.shape_cast %45 : vector<8xf32> to vector<8x1xf32>
    %47 = tpu.reciprocal %46 {approx = true} : vector<8x1xf32> -> vector<8x1xf32>
    %48 = vector.broadcast %47 : vector<8x1xf32> to vector<8x8xf32>
    %49 = arith.mulf %44, %48 : vector<8x8xf32>
    %50 = arith.truncf %49 : vector<8x8xf32> to vector<8x8xbf16>
    %cst_21 = arith.constant dense<0.000000e+00> : vector<8x8xf32>
    %51 = tpu.matmul %50, %35, %cst_21 {dimension_numbers = #tpu.dot_dimension_numbers<[1], [0], [0], [1], [0, 0, 1, 1], [], []>} : vector<8x8xbf16>, vector<8x8xbf16>, vector<8x8xf32> -> vector<8x8xf32>
    %c0_22 = arith.constant 0 : index
    %c0_23 = arith.constant 0 : index
    %52 = vector.load %arg13[%c0_22, %c0_23] : memref<8x32xf32, #tpu.memory_space<vmem>>, vector<8x8xf32>
    tpu.vector_store %arg13[%c0_22, %c0_23], %51 {strides = array<i32>} : memref<8x32xf32, #tpu.memory_space<vmem>>, vector<8x8xf32>,
    %c0_24 = arith.constant 0 : index
    %c8 = arith.constant 8 : index
    %53 = vector.load %arg12[%c0_24, %c8] : memref<8x32xf32, #tpu.memory_space<vmem>>, vector<8x8xf32>
    %54 = arith.truncf %53 : vector<8x8xf32> to vector<8x8xbf16>
    %cst_25 = arith.constant 0.353553385 : f32
    %55 = vector.broadcast %cst_25 : f32 to vector<8x8xf32>
    %56 = arith.mulf %53, %55 : vector<8x8xf32>
    %57 = arith.truncf %56 : vector<8x8xf32> to vector<8x8xbf16>
    %cst_26 = arith.constant dense<0.000000e+00> : vector<8x8xf32>
    %58 = tpu.matmul %57, %54, %cst_26 {dimension_numbers = #tpu.dot_dimension_numbers<[1], [1], [0], [0], [0, 0, 1, 0], [], []>} : vector<8x8xbf16>, vector<8x8xbf16>, vector<8x8xf32> -> vector<8x8xf32>
    %cst_27 = arith.constant dense<0xFF800000> : vector<8xf32>
    %59 = vector.multi_reduction <maximumf>, %58, %cst_27 [1] : vector<8x8xf32> to vector<8xf32>
    %60 = vector.shape_cast %59 : vector<8xf32> to vector<8x1xf32>
    %61 = vector.broadcast %60 : vector<8x1xf32> to vector<8x8xf32>
    %62 = arith.subf %58, %61 : vector<8x8xf32>
    %63 = math.exp %62 : vector<8x8xf32>
    %cst_28 = arith.constant dense<0.000000e+00> : vector<8xf32>
    %64 = vector.multi_reduction <add>, %63, %cst_28 [1] : vector<8x8xf32> to vector<8xf32>
    %65 = vector.shape_cast %64 : vector<8xf32> to vector<8x1xf32>
    %66 = tpu.reciprocal %65 {approx = true} : vector<8x1xf32> -> vector<8x1xf32>
    %67 = vector.broadcast %66 : vector<8x1xf32> to vector<8x8xf32>
    %68 = arith.mulf %63, %67 : vector<8x8xf32>
    %69 = arith.truncf %68 : vector<8x8xf32> to vector<8x8xbf16>
    %cst_29 = arith.constant dense<0.000000e+00> : vector<8x8xf32>
    %70 = tpu.matmul %69, %54, %cst_29 {dimension_numbers = #tpu.dot_dimension_numbers<[1], [0], [0], [1], [0, 0, 1, 1], [], []>} : vector<8x8xbf16>, vector<8x8xbf16>, vector<8x8xf32> -> vector<8x8xf32>
    %c0_30 = arith.constant 0 : index
    %c8_31 = arith.constant 8 : index
    %71 = vector.load %arg13[%c0_30, %c8_31] : memref<8x32xf32, #tpu.memory_space<vmem>>, vector<8x8xf32>
    tpu.vector_store %arg13[%c0_30, %c8_31], %70 {strides = array<i32>} : memref<8x32xf32, #tpu.memory_space<vmem>>, vector<8x8xf32>,
    %c0_32 = arith.constant 0 : index
    %c16 = arith.constant 16 : index
    %72 = vector.load %arg12[%c0_32, %c16] : memref<8x32xf32, #tpu.memory_space<vmem>>, vector<8x8xf32>
    %73 = arith.truncf %72 : vector<8x8xf32> to vector<8x8xbf16>
    %cst_33 = arith.constant 0.353553385 : f32
    %74 = vector.broadcast %cst_33 : f32 to vector<8x8xf32>
    %75 = arith.mulf %72, %74 : vector<8x8xf32>
    %76 = arith.truncf %75 : vector<8x8xf32> to vector<8x8xbf16>
    %cst_34 = arith.constant dense<0.000000e+00> : vector<8x8xf32>
    %77 = tpu.matmul %76, %73, %cst_34 {dimension_numbers = #tpu.dot_dimension_numbers<[1], [1], [0], [0], [0, 0, 1, 0], [], []>} : vector<8x8xbf16>, vector<8x8xbf16>, vector<8x8xf32> -> vector<8x8xf32>
    %cst_35 = arith.constant dense<0xFF800000> : vector<8xf32>
    %78 = vector.multi_reduction <maximumf>, %77, %cst_35 [1] : vector<8x8xf32> to vector<8xf32>
    %79 = vector.shape_cast %78 : vector<8xf32> to vector<8x1xf32>
    %80 = vector.broadcast %79 : vector<8x1xf32> to vector<8x8xf32>
    %81 = arith.subf %77, %80 : vector<8x8xf32>
    %82 = math.exp %81 : vector<8x8xf32>
    %cst_36 = arith.constant dense<0.000000e+00> : vector<8xf32>
    %83 = vector.multi_reduction <add>, %82, %cst_36 [1] : vector<8x8xf32> to vector<8xf32>
    %84 = vector.shape_cast %83 : vector<8xf32> to vector<8x1xf32>
    %85 = tpu.reciprocal %84 {approx = true} : vector<8x1xf32> -> vector<8x1xf32>
    %86 = vector.broadcast %85 : vector<8x1xf32> to vector<8x8xf32>
    %87 = arith.mulf %82, %86 : vector<8x8xf32>
    %88 = arith.truncf %87 : vector<8x8xf32> to vector<8x8xbf16>
    %cst_37 = arith.constant dense<0.000000e+00> : vector<8x8xf32>
    %89 = tpu.matmul %88, %73, %cst_37 {dimension_numbers = #tpu.dot_dimension_numbers<[1], [0], [0], [1], [0, 0, 1, 1], [], []>} : vector<8x8xbf16>, vector<8x8xbf16>, vector<8x8xf32> -> vector<8x8xf32>
    %c0_38 = arith.constant 0 : index
    %c16_39 = arith.constant 16 : index
    %90 = vector.load %arg13[%c0_38, %c16_39] : memref<8x32xf32, #tpu.memory_space<vmem>>, vector<8x8xf32>
    tpu.vector_store %arg13[%c0_38, %c16_39], %89 {strides = array<i32>} : memref<8x32xf32, #tpu.memory_space<vmem>>, vector<8x8xf32>,
    %c0_40 = arith.constant 0 : index
    %c24 = arith.constant 24 : index
    %91 = vector.load %arg12[%c0_40, %c24] : memref<8x32xf32, #tpu.memory_space<vmem>>, vector<8x8xf32>
    %92 = arith.truncf %91 : vector<8x8xf32> to vector<8x8xbf16>
    %cst_41 = arith.constant 0.353553385 : f32
    %93 = vector.broadcast %cst_41 : f32 to vector<8x8xf32>
    %94 = arith.mulf %91, %93 : vector<8x8xf32>
    %95 = arith.truncf %94 : vector<8x8xf32> to vector<8x8xbf16>
    %cst_42 = arith.constant dense<0.000000e+00> : vector<8x8xf32>
    %96 = tpu.matmul %95, %92, %cst_42 {dimension_numbers = #tpu.dot_dimension_numbers<[1], [1], [0], [0], [0, 0, 1, 0], [], []>} : vector<8x8xbf16>, vector<8x8xbf16>, vector<8x8xf32> -> vector<8x8xf32>
    %cst_43 = arith.constant dense<0xFF800000> : vector<8xf32>
    %97 = vector.multi_reduction <maximumf>, %96, %cst_43 [1] : vector<8x8xf32> to vector<8xf32>
    %98 = vector.shape_cast %97 : vector<8xf32> to vector<8x1xf32>
    %99 = vector.broadcast %98 : vector<8x1xf32> to vector<8x8xf32>
    %100 = arith.subf %96, %99 : vector<8x8xf32>
    %101 = math.exp %100 : vector<8x8xf32>
    %cst_44 = arith.constant dense<0.000000e+00> : vector<8xf32>
    %102 = vector.multi_reduction <add>, %101, %cst_44 [1] : vector<8x8xf32> to vector<8xf32>
    %103 = vector.shape_cast %102 : vector<8xf32> to vector<8x1xf32>
    %104 = tpu.reciprocal %103 {approx = true} : vector<8x1xf32> -> vector<8x1xf32>
    %105 = vector.broadcast %104 : vector<8x1xf32> to vector<8x8xf32>
    %106 = arith.mulf %101, %105 : vector<8x8xf32>
    %107 = arith.truncf %106 : vector<8x8xf32> to vector<8x8xbf16>
    %cst_45 = arith.constant dense<0.000000e+00> : vector<8x8xf32>
    %108 = tpu.matmul %107, %92, %cst_45 {dimension_numbers = #tpu.dot_dimension_numbers<[1], [0], [0], [1], [0, 0, 1, 1], [], []>} : vector<8x8xbf16>, vector<8x8xbf16>, vector<8x8xf32> -> vector<8x8xf32>
    %c0_46 = arith.constant 0 : index
    %c24_47 = arith.constant 24 : index
    %109 = vector.load %arg13[%c0_46, %c24_47] : memref<8x32xf32, #tpu.memory_space<vmem>>, vector<8x8xf32>
    tpu.vector_store %arg13[%c0_46, %c24_47], %108 {strides = array<i32>} : memref<8x32xf32, #tpu.memory_space<vmem>>, vector<8x8xf32>,
    %c0_48 = arith.constant 0 : index
    %c0_49 = arith.constant 0 : index
    %110 = vector.load %arg13[%c0_48, %c0_49] : memref<8x32xf32, #tpu.memory_space<vmem>>, vector<8x32xf32>
    %111 = arith.truncf %110 : vector<8x32xf32> to vector<8x32xbf16>
    %c0_50 = arith.constant 0 : index
    %c0_51 = arith.constant 0 : index
    %112 = vector.load %arg5[%c0_50, %c0_51] : memref<32x32xbf16, #tpu.memory_space<vmem>>, vector<32x32xbf16>
    %cst_52 = arith.constant dense<0.000000e+00> : vector<8x32xf32>
    %113 = tpu.matmul %111, %112, %cst_52 {dimension_numbers = #tpu.dot_dimension_numbers<[1], [0], [0], [1], [0, 0, 1, 1], [], []>} : vector<8x32xbf16>, vector<32x32xbf16>, vector<8x32xf32> -> vector<8x32xf32>
    %114 = arith.addf %113, %1 : vector<8x32xf32>
    %c0_53 = arith.constant 0 : index
    %c0_54 = arith.constant 0 : index
    %115 = vector.load %arg6[%c0_53, %c0_54] : memref<1x32xf32, #tpu.memory_space<vmem>>, vector<1x32xf32>
    %116 = vector.shape_cast %115 : vector<1x32xf32> to vector<32xf32>
    %c0_55 = arith.constant 0 : index
    %c0_56 = arith.constant 0 : index
    %117 = vector.load %arg7[%c0_55, %c0_56] : memref<1x32xf32, #tpu.memory_space<vmem>>, vector<1x32xf32>
    %118 = vector.shape_cast %117 : vector<1x32xf32> to vector<32xf32>
    %cst_57 = arith.constant dense<0.000000e+00> : vector<8xf32>
    %119 = vector.multi_reduction <add>, %114, %cst_57 [1] : vector<8x32xf32> to vector<8xf32>
    %120 = vector.shape_cast %119 : vector<8xf32> to vector<8x1xf32>
    %cst_58 = arith.constant 3.200000e+01 : f32
    %121 = vector.broadcast %cst_58 : f32 to vector<8x1xf32>
    %122 = arith.divf %120, %121 : vector<8x1xf32>
    %123 = vector.broadcast %122 : vector<8x1xf32> to vector<8x32xf32>
    %124 = arith.subf %114, %123 : vector<8x32xf32>
    %125 = arith.mulf %124, %124 : vector<8x32xf32>
    %cst_59 = arith.constant dense<0.000000e+00> : vector<8xf32>
    %126 = vector.multi_reduction <add>, %125, %cst_59 [1] : vector<8x32xf32> to vector<8xf32>
    %127 = vector.shape_cast %126 : vector<8xf32> to vector<8x1xf32>
    %cst_60 = arith.constant 3.200000e+01 : f32
    %128 = vector.broadcast %cst_60 : f32 to vector<8x1xf32>
    %129 = arith.divf %127, %128 : vector<8x1xf32>
    %130 = vector.broadcast %122 : vector<8x1xf32> to vector<8x32xf32>
    %131 = arith.subf %114, %130 : vector<8x32xf32>
    %cst_61 = arith.constant 9.99999997E-7 : f32
    %132 = vector.broadcast %cst_61 : f32 to vector<8x1xf32>
    %133 = arith.addf %129, %132 : vector<8x1xf32>
    %134 = math.rsqrt %133 : vector<8x1xf32>
    %135 = vector.broadcast %134 : vector<8x1xf32> to vector<8x32xf32>
    %136 = arith.mulf %131, %135 : vector<8x32xf32>
    %137 = vector.shape_cast %116 : vector<32xf32> to vector<1x32xf32>
    %138 = vector.broadcast %137 : vector<1x32xf32> to vector<8x32xf32>
    %139 = arith.mulf %136, %138 : vector<8x32xf32>
    %140 = vector.shape_cast %118 : vector<32xf32> to vector<1x32xf32>
    %141 = vector.broadcast %140 : vector<1x32xf32> to vector<8x32xf32>
    %142 = arith.addf %139, %141 : vector<8x32xf32>
    %143 = arith.truncf %142 : vector<8x32xf32> to vector<8x32xbf16>
    %c0_62 = arith.constant 0 : index
    %c0_63 = arith.constant 0 : index
    %144 = vector.load %arg8[%c0_62, %c0_63] : memref<32x128xbf16, #tpu.memory_space<vmem>>, vector<32x128xbf16>
    %c0_64 = arith.constant 0 : index
    %c0_65 = arith.constant 0 : index
    %145 = vector.load %arg9[%c0_64, %c0_65] : memref<128x32xbf16, #tpu.memory_space<vmem>>, vector<128x32xbf16>
    %cst_66 = arith.constant dense<0.000000e+00> : vector<8x128xf32>
    %146 = tpu.matmul %143, %144, %cst_66 {dimension_numbers = #tpu.dot_dimension_numbers<[1], [0], [0], [1], [0, 0, 1, 1], [], []>} : vector<8x32xbf16>, vector<32x128xbf16>, vector<8x128xf32> -> vector<8x128xf32>
    %cst_67 = arith.constant 1.000000e-01 : f32
    %147 = vector.broadcast %cst_67 : f32 to vector<8x128xf32>
    %148 = arith.mulf %147, %146 : vector<8x128xf32>
    %cst_68 = arith.constant 0.00999999977 : f32
    %149 = vector.broadcast %cst_68 : f32 to vector<8x128xf32>
    %150 = arith.subf %148, %149 : vector<8x128xf32>
    %cst_69 = arith.constant 0.000000e+00 : f32
    %151 = vector.broadcast %cst_69 : f32 to vector<8x128xf32>
    %152 = arith.maximumf %150, %151 : vector<8x128xf32>
    %153 = arith.truncf %152 : vector<8x128xf32> to vector<8x128xbf16>
    %cst_70 = arith.constant dense<0.000000e+00> : vector<8x32xf32>
    %154 = tpu.matmul %153, %145, %cst_70 {dimension_numbers = #tpu.dot_dimension_numbers<[1], [0], [0], [1], [0, 0, 1, 1], [], []>} : vector<8x128xbf16>, vector<128x32xbf16>, vector<8x32xf32> -> vector<8x32xf32>
    %155 = arith.subf %154, %142 : vector<8x32xf32>
    %156 = arith.truncf %155 : vector<8x32xf32> to vector<8x32xbf16>
    %cst_71 = arith.constant dense<0.000000e+00> : vector<8x128xf32>
    %157 = tpu.matmul %156, %144, %cst_71 {dimension_numbers = #tpu.dot_dimension_numbers<[1], [0], [0], [1], [0, 0, 1, 1], [], []>} : vector<8x32xbf16>, vector<32x128xbf16>, vector<8x128xf32> -> vector<8x128xf32>
    %cst_72 = arith.constant 1.000000e-01 : f32
    %158 = vector.broadcast %cst_72 : f32 to vector<8x128xf32>
    %159 = arith.mulf %158, %157 : vector<8x128xf32>
    %160 = arith.subf %152, %159 : vector<8x128xf32>
    %cst_73 = arith.constant 0.00999999977 : f32
    %161 = vector.broadcast %cst_73 : f32 to vector<8x128xf32>
    %162 = arith.subf %160, %161 : vector<8x128xf32>
    %cst_74 = arith.constant 0.000000e+00 : f32
    %163 = vector.broadcast %cst_74 : f32 to vector<8x128xf32>
    %164 = arith.maximumf %162, %163 : vector<8x128xf32>
    %165 = arith.truncf %164 : vector<8x128xf32> to vector<8x128xbf16>
    %c0_75 = arith.constant 0 : index
    %c0_76 = arith.constant 0 : index
    %166 = vector.load %arg10[%c0_75, %c0_76] : memref<128x32xbf16, #tpu.memory_space<vmem>>, vector<128x32xbf16>
    %cst_77 = arith.constant dense<0.000000e+00> : vector<8x32xf32>
    %167 = tpu.matmul %165, %166, %cst_77 {dimension_numbers = #tpu.dot_dimension_numbers<[1], [0], [0], [1], [0, 0, 1, 1], [], []>} : vector<8x128xbf16>, vector<128x32xbf16>, vector<8x32xf32> -> vector<8x32xf32>
    %168 = arith.addf %167, %114 : vector<8x32xf32>
    %c0_78 = arith.constant 0 : index
    %c0_79 = arith.constant 0 : index
    %c0_80 = arith.constant 0 : index
    %169 = vector.load %arg11[%c0_78, %c0_79, %c0_80] : memref<1x8x32xf32, #tpu.memory_space<vmem>>, vector<1x8x32xf32>
    %170 = vector.shape_cast %169 : vector<1x8x32xf32> to vector<8x32xf32>
    %171 = vector.shape_cast %168 : vector<8x32xf32> to vector<1x8x32xf32>
    tpu.vector_store %arg11[%c0_78, %c0_79, %c0_80], %171 {strides = array<i32>} : memref<1x8x32xf32, #tpu.memory_space<vmem>>, vector<1x8x32xf32>,
    return
  }
  func.func @transform_0(%arg0: i32) -> (i32, i32, i32) {
    %c0_i32 = arith.constant 0 : i32
    %c0_i32_0 = arith.constant 0 : i32
    %c0_i32_1 = arith.constant 0 : i32
    return %arg0, %c0_i32, %c0_i32_0 : i32, i32, i32
  }
  func.func @transform_1(%arg0: i32) -> (i32, i32) {
    %c0_i32 = arith.constant 0 : i32
    %c0_i32_0 = arith.constant 0 : i32
    %c0_i32_1 = arith.constant 0 : i32
    return %c0_i32, %c0_i32_0 : i32, i32
  }
  func.func @transform_2(%arg0: i32) -> (i32, i32) {
    %c0_i32 = arith.constant 0 : i32
    %c0_i32_0 = arith.constant 0 : i32
    %c0_i32_1 = arith.constant 0 : i32
    return %c0_i32, %c0_i32_0 : i32, i32
  }
  func.func @transform_3(%arg0: i32) -> (i32, i32) {
    %c0_i32 = arith.constant 0 : i32
    %c0_i32_0 = arith.constant 0 : i32
    %c0_i32_1 = arith.constant 0 : i32
    return %c0_i32, %c0_i32_0 : i32, i32
  }
  func.func @transform_4(%arg0: i32) -> (i32, i32) {
    %c0_i32 = arith.constant 0 : i32
    %c0_i32_0 = arith.constant 0 : i32
    %c0_i32_1 = arith.constant 0 : i32
    return %c0_i32, %c0_i32_0 : i32, i32
  }
  func.func @transform_5(%arg0: i32) -> (i32, i32) {
    %c0_i32 = arith.constant 0 : i32
    %c0_i32_0 = arith.constant 0 : i32
    %c0_i32_1 = arith.constant 0 : i32
    return %c0_i32, %c0_i32_0 : i32, i32
  }
  func.func @transform_6(%arg0: i32) -> (i32, i32) {
    %c0_i32 = arith.constant 0 : i32
    %c0_i32_0 = arith.constant 0 : i32
    %c0_i32_1 = arith.constant 0 : i32
    return %c0_i32, %c0_i32_0 : i32, i32
  }
  func.func @transform_7(%arg0: i32) -> (i32, i32) {
    %c0_i32 = arith.constant 0 : i32
    %c0_i32_0 = arith.constant 0 : i32
    %c0_i32_1 = arith.constant 0 : i32
    return %c0_i32, %c0_i32_0 : i32, i32
  }
  func.func @transform_8(%arg0: i32) -> (i32, i32) {
    %c0_i32 = arith.constant 0 : i32
    %c0_i32_0 = arith.constant 0 : i32
    %c0_i32_1 = arith.constant 0 : i32
    return %c0_i32, %c0_i32_0 : i32, i32
  }
  func.func @transform_9(%arg0: i32) -> (i32, i32) {
    %c0_i32 = arith.constant 0 : i32
    %c0_i32_0 = arith.constant 0 : i32
    %c0_i32_1 = arith.constant 0 : i32
    return %c0_i32, %c0_i32_0 : i32, i32
  }
  func.func @transform_10(%arg0: i32) -> (i32, i32, i32) {
    %c0_i32 = arith.constant 0 : i32
    %c0_i32_0 = arith.constant 0 : i32
    %c0_i32_1 = arith.constant 0 : i32
    return %arg0, %c0_i32, %c0_i32_0 : i32, i32, i32
  }
}

module attributes {stable_mosaic.version = 11 : i64} {
  func.func @crate_layer_kernel(%arg0: i32, %arg1: memref<1x8x32xf32, #tpu.memory_space<vmem>>, %arg2: memref<1x32xf32, #tpu.memory_space<vmem>>, %arg3: memref<1x32xf32, #tpu.memory_space<vmem>>, %arg4: memref<32x32xbf16, #tpu.memory_space<vmem>>, %arg5: memref<32x32xbf16, #tpu.memory_space<vmem>>, %arg6: memref<1x32xf32, #tpu.memory_space<vmem>>, %arg7: memref<1x32xf32, #tpu.memory_space<vmem>>, %arg8: memref<32x128xbf16, #tpu.memory_space<vmem>>, %arg9: memref<128x32xbf16, #tpu.memory_space<vmem>>, %arg10: memref<128x32xbf16, #tpu.memory_space<vmem>>, %arg11: memref<1x8x32xf32, #tpu.memory_space<vmem>>, %arg12: memref<8x32xf32, #tpu.memory_space<vmem>>, %arg13: memref<8x32xf32, #tpu.memory_space<vmem>>) attributes {dimension_semantics = [#tpu.dimension_semantics<parallel>], iteration_bounds = array<i64: 2>, scalar_prefetch = 0 : i64, scratch_operands = 2 : i64, tpu.core_type = #tpu.core_type<tc>, window_params = [{transform_indices = @transform_0, window_bounds = array<i64: 1, 8, 32>}, {pipeline_mode = #tpu.pipeline_mode<synchronous>, transform_indices = @transform_1, window_bounds = array<i64: 1, 32>}, {pipeline_mode = #tpu.pipeline_mode<synchronous>, transform_indices = @transform_2, window_bounds = array<i64: 1, 32>}, {pipeline_mode = #tpu.pipeline_mode<synchronous>, transform_indices = @transform_3, window_bounds = array<i64: 32, 32>}, {pipeline_mode = #tpu.pipeline_mode<synchronous>, transform_indices = @transform_4, window_bounds = array<i64: 32, 32>}, {pipeline_mode = #tpu.pipeline_mode<synchronous>, transform_indices = @transform_5, window_bounds = array<i64: 1, 32>}, {pipeline_mode = #tpu.pipeline_mode<synchronous>, transform_indices = @transform_6, window_bounds = array<i64: 1, 32>}, {pipeline_mode = #tpu.pipeline_mode<synchronous>, transform_indices = @transform_7, window_bounds = array<i64: 32, 128>}, {pipeline_mode = #tpu.pipeline_mode<synchronous>, transform_indices = @transform_8, window_bounds = array<i64: 128, 32>}, {pipeline_mode = #tpu.pipeline_mode<synchronous>, transform_indices = @transform_9, window_bounds = array<i64: 128, 32>}, {transform_indices = @transform_10, window_bounds = array<i64: 1, 8, 32>}]} {
    %c0 = arith.constant 0 : index
    %c0_0 = arith.constant 0 : index
    %c0_1 = arith.constant 0 : index
    %0 = vector.load %arg1[%c0, %c0_0, %c0_1] : memref<1x8x32xf32, #tpu.memory_space<vmem>>, vector<1x8x32xf32>
    %1 = vector.shape_cast %0 : vector<1x8x32xf32> to vector<8x32xf32>
    %c0_2 = arith.constant 0 : index
    %c0_3 = arith.constant 0 : index
    %2 = vector.load %arg2[%c0_2, %c0_3] : memref<1x32xf32, #tpu.memory_space<vmem>>, vector<1x32xf32>
    %3 = vector.shape_cast %2 : vector<1x32xf32> to vector<32xf32>
    %c0_4 = arith.constant 0 : index
    %c0_5 = arith.constant 0 : index
    %4 = vector.load %arg3[%c0_4, %c0_5] : memref<1x32xf32, #tpu.memory_space<vmem>>, vector<1x32xf32>
    %5 = vector.shape_cast %4 : vector<1x32xf32> to vector<32xf32>
    %cst = arith.constant dense<0.000000e+00> : vector<8xf32>
    %6 = vector.multi_reduction <add>, %1, %cst [1] : vector<8x32xf32> to vector<8xf32>
    %7 = vector.shape_cast %6 : vector<8xf32> to vector<8x1xf32>
    %cst_6 = arith.constant 3.200000e+01 : f32
    %8 = vector.broadcast %cst_6 : f32 to vector<8x1xf32>
    %9 = arith.divf %7, %8 : vector<8x1xf32>
    %10 = vector.broadcast %9 : vector<8x1xf32> to vector<8x32xf32>
    %11 = arith.subf %1, %10 : vector<8x32xf32>
    %12 = arith.mulf %11, %11 : vector<8x32xf32>
    %cst_7 = arith.constant dense<0.000000e+00> : vector<8xf32>
    %13 = vector.multi_reduction <add>, %12, %cst_7 [1] : vector<8x32xf32> to vector<8xf32>
    %14 = vector.shape_cast %13 : vector<8xf32> to vector<8x1xf32>
    %cst_8 = arith.constant 3.200000e+01 : f32
    %15 = vector.broadcast %cst_8 : f32 to vector<8x1xf32>
    %16 = arith.divf %14, %15 : vector<8x1xf32>
    %17 = vector.broadcast %9 : vector<8x1xf32> to vector<8x32xf32>
    %18 = arith.subf %1, %17 : vector<8x32xf32>
    %cst_9 = arith.constant 9.99999997E-7 : f32
    %19 = vector.broadcast %cst_9 : f32 to vector<8x1xf32>
    %20 = arith.addf %16, %19 : vector<8x1xf32>
    %21 = math.rsqrt %20 : vector<8x1xf32>
    %22 = vector.broadcast %21 : vector<8x1xf32> to vector<8x32xf32>
    %23 = arith.mulf %18, %22 : vector<8x32xf32>
    %24 = vector.shape_cast %3 : vector<32xf32> to vector<1x32xf32>
    %25 = vector.broadcast %24 : vector<1x32xf32> to vector<8x32xf32>
    %26 = arith.mulf %23, %25 : vector<8x32xf32>
    %27 = vector.shape_cast %5 : vector<32xf32> to vector<1x32xf32>
    %28 = vector.broadcast %27 : vector<1x32xf32> to vector<8x32xf32>
    %29 = arith.addf %26, %28 : vector<8x32xf32>
    %30 = arith.truncf %29 : vector<8x32xf32> to vector<8x32xbf16>
    %c0_10 = arith.constant 0 : index
    %c0_11 = arith.constant 0 : index
    %31 = vector.load %arg4[%c0_10, %c0_11] : memref<32x32xbf16, #tpu.memory_space<vmem>>, vector<32x32xbf16>
    %cst_12 = arith.constant dense<0.000000e+00> : vector<8x32xf32>
    %32 = tpu.matmul %30, %31, %cst_12 {dimension_numbers = #tpu.dot_dimension_numbers<[1], [0], [0], [1], [0, 0, 1, 1], [], []>} : vector<8x32xbf16>, vector<32x32xbf16>, vector<8x32xf32> -> vector<8x32xf32>
    %c0_13 = arith.constant 0 : index
    %c0_14 = arith.constant 0 : index
    %33 = vector.load %arg12[%c0_13, %c0_14] : memref<8x32xf32, #tpu.memory_space<vmem>>, vector<8x32xf32>
    tpu.vector_store %arg12[%c0_13, %c0_14], %32 {strides = array<i32>} : memref<8x32xf32, #tpu.memory_space<vmem>>, vector<8x32xf32>,
    %c0_15 = arith.constant 0 : index
    %c0_16 = arith.constant 0 : index
    %34 = vector.load %arg12[%c0_15, %c0_16] : memref<8x32xf32, #tpu.memory_space<vmem>>, vector<8x8xf32>
    %35 = arith.truncf %34 : vector<8x8xf32> to vector<8x8xbf16>
    %cst_17 = arith.constant 0.353553385 : f32
    %36 = vector.broadcast %cst_17 : f32 to vector<8x8xf32>
    %37 = arith.mulf %34, %36 : vector<8x8xf32>
    %38 = arith.truncf %37 : vector<8x8xf32> to vector<8x8xbf16>
    %cst_18 = arith.constant dense<0.000000e+00> : vector<8x8xf32>
    %39 = tpu.matmul %38, %35, %cst_18 {dimension_numbers = #tpu.dot_dimension_numbers<[1], [1], [0], [0], [0, 0, 1, 0], [], []>} : vector<8x8xbf16>, vector<8x8xbf16>, vector<8x8xf32> -> vector<8x8xf32>
    %cst_19 = arith.constant dense<0xFF800000> : vector<8xf32>
    %40 = vector.multi_reduction <maximumf>, %39, %cst_19 [1] : vector<8x8xf32> to vector<8xf32>
    %41 = vector.shape_cast %40 : vector<8xf32> to vector<8x1xf32>
    %42 = vector.broadcast %41 : vector<8x1xf32> to vector<8x8xf32>
    %43 = arith.subf %39, %42 : vector<8x8xf32>
    %44 = math.exp %43 : vector<8x8xf32>
    %cst_20 = arith.constant dense<0.000000e+00> : vector<8xf32>
    %45 = vector.multi_reduction <add>, %44, %cst_20 [1] : vector<8x8xf32> to vector<8xf32>
    %46 = vector.shape_cast %45 : vector<8xf32> to vector<8x1xf32>
    %47 = tpu.reciprocal %46 {approx = true} : vector<8x1xf32> -> vector<8x1xf32>
    %48 = vector.broadcast %47 : vector<8x1xf32> to vector<8x8xf32>
    %49 = arith.mulf %44, %48 : vector<8x8xf32>
    %50 = arith.truncf %49 : vector<8x8xf32> to vector<8x8xbf16>
    %cst_21 = arith.constant dense<0.000000e+00> : vector<8x8xf32>
    %51 = tpu.matmul %50, %35, %cst_21 {dimension_numbers = #tpu.dot_dimension_numbers<[1], [0], [0], [1], [0, 0, 1, 1], [], []>} : vector<8x8xbf16>, vector<8x8xbf16>, vector<8x8xf32> -> vector<8x8xf32>
    %c0_22 = arith.constant 0 : index
    %c0_23 = arith.constant 0 : index
    %52 = vector.load %arg13[%c0_22, %c0_23] : memref<8x32xf32, #tpu.memory_space<vmem>>, vector<8x8xf32>
    tpu.vector_store %arg13[%c0_22, %c0_23], %51 {strides = array<i32>} : memref<8x32xf32, #tpu.memory_space<vmem>>, vector<8x8xf32>,
    %c0_24 = arith.constant 0 : index
    %c8 = arith.constant 8 : index
    %53 = vector.load %arg12[%c0_24, %c8] : memref<8x32xf32, #tpu.memory_space<vmem>>, vector<8x8xf32>
    %54 = arith.truncf %53 : vector<8x8xf32> to vector<8x8xbf16>
    %cst_25 = arith.constant 0.353553385 : f32
    %55 = vector.broadcast %cst_25 : f32 to vector<8x8xf32>
    %56 = arith.mulf %53, %55 : vector<8x8xf32>
    %57 = arith.truncf %56 : vector<8x8xf32> to vector<8x8xbf16>
    %cst_26 = arith.constant dense<0.000000e+00> : vector<8x8xf32>
    %58 = tpu.matmul %57, %54, %cst_26 {dimension_numbers = #tpu.dot_dimension_numbers<[1], [1], [0], [0], [0, 0, 1, 0], [], []>} : vector<8x8xbf16>, vector<8x8xbf16>, vector<8x8xf32> -> vector<8x8xf32>
    %cst_27 = arith.constant dense<0xFF800000> : vector<8xf32>
    %59 = vector.multi_reduction <maximumf>, %58, %cst_27 [1] : vector<8x8xf32> to vector<8xf32>
    %60 = vector.shape_cast %59 : vector<8xf32> to vector<8x1xf32>
    %61 = vector.broadcast %60 : vector<8x1xf32> to vector<8x8xf32>
    %62 = arith.subf %58, %61 : vector<8x8xf32>
    %63 = math.exp %62 : vector<8x8xf32>
    %cst_28 = arith.constant dense<0.000000e+00> : vector<8xf32>
    %64 = vector.multi_reduction <add>, %63, %cst_28 [1] : vector<8x8xf32> to vector<8xf32>
    %65 = vector.shape_cast %64 : vector<8xf32> to vector<8x1xf32>
    %66 = tpu.reciprocal %65 {approx = true} : vector<8x1xf32> -> vector<8x1xf32>
    %67 = vector.broadcast %66 : vector<8x1xf32> to vector<8x8xf32>
    %68 = arith.mulf %63, %67 : vector<8x8xf32>
    %69 = arith.truncf %68 : vector<8x8xf32> to vector<8x8xbf16>
    %cst_29 = arith.constant dense<0.000000e+00> : vector<8x8xf32>
    %70 = tpu.matmul %69, %54, %cst_29 {dimension_numbers = #tpu.dot_dimension_numbers<[1], [0], [0], [1], [0, 0, 1, 1], [], []>} : vector<8x8xbf16>, vector<8x8xbf16>, vector<8x8xf32> -> vector<8x8xf32>
    %c0_30 = arith.constant 0 : index
    %c8_31 = arith.constant 8 : index
    %71 = vector.load %arg13[%c0_30, %c8_31] : memref<8x32xf32, #tpu.memory_space<vmem>>, vector<8x8xf32>
    tpu.vector_store %arg13[%c0_30, %c8_31], %70 {strides = array<i32>} : memref<8x32xf32, #tpu.memory_space<vmem>>, vector<8x8xf32>,
    %c0_32 = arith.constant 0 : index
    %c16 = arith.constant 16 : index
    %72 = vector.load %arg12[%c0_32, %c16] : memref<8x32xf32, #tpu.memory_space<vmem>>, vector<8x8xf32>
    %73 = arith.truncf %72 : vector<8x8xf32> to vector<8x8xbf16>
    %cst_33 = arith.constant 0.353553385 : f32
    %74 = vector.broadcast %cst_33 : f32 to vector<8x8xf32>
    %75 = arith.mulf %72, %74 : vector<8x8xf32>
    %76 = arith.truncf %75 : vector<8x8xf32> to vector<8x8xbf16>
    %cst_34 = arith.constant dense<0.000000e+00> : vector<8x8xf32>
    %77 = tpu.matmul %76, %73, %cst_34 {dimension_numbers = #tpu.dot_dimension_numbers<[1], [1], [0], [0], [0, 0, 1, 0], [], []>} : vector<8x8xbf16>, vector<8x8xbf16>, vector<8x8xf32> -> vector<8x8xf32>
    %cst_35 = arith.constant dense<0xFF800000> : vector<8xf32>
    %78 = vector.multi_reduction <maximumf>, %77, %cst_35 [1] : vector<8x8xf32> to vector<8xf32>
    %79 = vector.shape_cast %78 : vector<8xf32> to vector<8x1xf32>
    %80 = vector.broadcast %79 : vector<8x1xf32> to vector<8x8xf32>
    %81 = arith.subf %77, %80 : vector<8x8xf32>
    %82 = math.exp %81 : vector<8x8xf32>
    %cst_36 = arith.constant dense<0.000000e+00> : vector<8xf32>
    %83 = vector.multi_reduction <add>, %82, %cst_36 [1] : vector<8x8xf32> to vector<8xf32>
    %84 = vector.shape_cast %83 : vector<8xf32> to vector<8x1xf32>
    %85 = tpu.reciprocal %84 {approx = true} : vector<8x1xf32> -> vector<8x1xf32>
    %86 = vector.broadcast %85 : vector<8x1xf32> to vector<8x8xf32>
    %87 = arith.mulf %82, %86 : vector<8x8xf32>
    %88 = arith.truncf %87 : vector<8x8xf32> to vector<8x8xbf16>
    %cst_37 = arith.constant dense<0.000000e+00> : vector<8x8xf32>
    %89 = tpu.matmul %88, %73, %cst_37 {dimension_numbers = #tpu.dot_dimension_numbers<[1], [0], [0], [1], [0, 0, 1, 1], [], []>} : vector<8x8xbf16>, vector<8x8xbf16>, vector<8x8xf32> -> vector<8x8xf32>
    %c0_38 = arith.constant 0 : index
    %c16_39 = arith.constant 16 : index
    %90 = vector.load %arg13[%c0_38, %c16_39] : memref<8x32xf32, #tpu.memory_space<vmem>>, vector<8x8xf32>
    tpu.vector_store %arg13[%c0_38, %c16_39], %89 {strides = array<i32>} : memref<8x32xf32, #tpu.memory_space<vmem>>, vector<8x8xf32>,
    %c0_40 = arith.constant 0 : index
    %c24 = arith.constant 24 : index
    %91 = vector.load %arg12[%c0_40, %c24] : memref<8x32xf32, #tpu.memory_space<vmem>>, vector<8x8xf32>
    %92 = arith.truncf %91 : vector<8x8xf32> to vector<8x8xbf16>
    %cst_41 = arith.constant 0.353553385 : f32
    %93 = vector.broadcast %cst_41 : f32 to vector<8x8xf32>
    %94 = arith.mulf %91, %93 : vector<8x8xf32>
    %95 = arith.truncf %94 : vector<8x8xf32> to vector<8x8xbf16>
    %cst_42 = arith.constant dense<0.000000e+00> : vector<8x8xf32>
    %96 = tpu.matmul %95, %92, %cst_42 {dimension_numbers = #tpu.dot_dimension_numbers<[1], [1], [0], [0], [0, 0, 1, 0], [], []>} : vector<8x8xbf16>, vector<8x8xbf16>, vector<8x8xf32> -> vector<8x8xf32>
    %cst_43 = arith.constant dense<0xFF800000> : vector<8xf32>
    %97 = vector.multi_reduction <maximumf>, %96, %cst_43 [1] : vector<8x8xf32> to vector<8xf32>
    %98 = vector.shape_cast %97 : vector<8xf32> to vector<8x1xf32>
    %99 = vector.broadcast %98 : vector<8x1xf32> to vector<8x8xf32>
    %100 = arith.subf %96, %99 : vector<8x8xf32>
    %101 = math.exp %100 : vector<8x8xf32>
    %cst_44 = arith.constant dense<0.000000e+00> : vector<8xf32>
    %102 = vector.multi_reduction <add>, %101, %cst_44 [1] : vector<8x8xf32> to vector<8xf32>
    %103 = vector.shape_cast %102 : vector<8xf32> to vector<8x1xf32>
    %104 = tpu.reciprocal %103 {approx = true} : vector<8x1xf32> -> vector<8x1xf32>
    %105 = vector.broadcast %104 : vector<8x1xf32> to vector<8x8xf32>
    %106 = arith.mulf %101, %105 : vector<8x8xf32>
    %107 = arith.truncf %106 : vector<8x8xf32> to vector<8x8xbf16>
    %cst_45 = arith.constant dense<0.000000e+00> : vector<8x8xf32>
    %108 = tpu.matmul %107, %92, %cst_45 {dimension_numbers = #tpu.dot_dimension_numbers<[1], [0], [0], [1], [0, 0, 1, 1], [], []>} : vector<8x8xbf16>, vector<8x8xbf16>, vector<8x8xf32> -> vector<8x8xf32>
    %c0_46 = arith.constant 0 : index
    %c24_47 = arith.constant 24 : index
    %109 = vector.load %arg13[%c0_46, %c24_47] : memref<8x32xf32, #tpu.memory_space<vmem>>, vector<8x8xf32>
    tpu.vector_store %arg13[%c0_46, %c24_47], %108 {strides = array<i32>} : memref<8x32xf32, #tpu.memory_space<vmem>>, vector<8x8xf32>,
    %c0_48 = arith.constant 0 : index
    %c0_49 = arith.constant 0 : index
    %110 = vector.load %arg13[%c0_48, %c0_49] : memref<8x32xf32, #tpu.memory_space<vmem>>, vector<8x32xf32>
    %111 = arith.truncf %110 : vector<8x32xf32> to vector<8x32xbf16>
    %c0_50 = arith.constant 0 : index
    %c0_51 = arith.constant 0 : index
    %112 = vector.load %arg5[%c0_50, %c0_51] : memref<32x32xbf16, #tpu.memory_space<vmem>>, vector<32x32xbf16>
    %cst_52 = arith.constant dense<0.000000e+00> : vector<8x32xf32>
    %113 = tpu.matmul %111, %112, %cst_52 {dimension_numbers = #tpu.dot_dimension_numbers<[1], [0], [0], [1], [0, 0, 1, 1], [], []>} : vector<8x32xbf16>, vector<32x32xbf16>, vector<8x32xf32> -> vector<8x32xf32>
    %114 = arith.addf %113, %1 : vector<8x32xf32>
    %c0_53 = arith.constant 0 : index
    %c0_54 = arith.constant 0 : index
    %115 = vector.load %arg6[%c0_53, %c0_54] : memref<1x32xf32, #tpu.memory_space<vmem>>, vector<1x32xf32>
    %116 = vector.shape_cast %115 : vector<1x32xf32> to vector<32xf32>
    %c0_55 = arith.constant 0 : index
    %c0_56 = arith.constant 0 : index
    %117 = vector.load %arg7[%c0_55, %c0_56] : memref<1x32xf32, #tpu.memory_space<vmem>>, vector<1x32xf32>
    %118 = vector.shape_cast %117 : vector<1x32xf32> to vector<32xf32>
    %cst_57 = arith.constant dense<0.000000e+00> : vector<8xf32>
    %119 = vector.multi_reduction <add>, %114, %cst_57 [1] : vector<8x32xf32> to vector<8xf32>
    %120 = vector.shape_cast %119 : vector<8xf32> to vector<8x1xf32>
    %cst_58 = arith.constant 3.200000e+01 : f32
    %121 = vector.broadcast %cst_58 : f32 to vector<8x1xf32>
    %122 = arith.divf %120, %121 : vector<8x1xf32>
    %123 = vector.broadcast %122 : vector<8x1xf32> to vector<8x32xf32>
    %124 = arith.subf %114, %123 : vector<8x32xf32>
    %125 = arith.mulf %124, %124 : vector<8x32xf32>
    %cst_59 = arith.constant dense<0.000000e+00> : vector<8xf32>
    %126 = vector.multi_reduction <add>, %125, %cst_59 [1] : vector<8x32xf32> to vector<8xf32>
    %127 = vector.shape_cast %126 : vector<8xf32> to vector<8x1xf32>
    %cst_60 = arith.constant 3.200000e+01 : f32
    %128 = vector.broadcast %cst_60 : f32 to vector<8x1xf32>
    %129 = arith.divf %127, %128 : vector<8x1xf32>
    %130 = vector.broadcast %122 : vector<8x1xf32> to vector<8x32xf32>
    %131 = arith.subf %114, %130 : vector<8x32xf32>
    %cst_61 = arith.constant 9.99999997E-7 : f32
    %132 = vector.broadcast %cst_61 : f32 to vector<8x1xf32>
    %133 = arith.addf %129, %132 : vector<8x1xf32>
    %134 = math.rsqrt %133 : vector<8x1xf32>
    %135 = vector.broadcast %134 : vector<8x1xf32> to vector<8x32xf32>
    %136 = arith.mulf %131, %135 : vector<8x32xf32>
    %137 = vector.shape_cast %116 : vector<32xf32> to vector<1x32xf32>
    %138 = vector.broadcast %137 : vector<1x32xf32> to vector<8x32xf32>
    %139 = arith.mulf %136, %138 : vector<8x32xf32>
    %140 = vector.shape_cast %118 : vector<32xf32> to vector<1x32xf32>
    %141 = vector.broadcast %140 : vector<1x32xf32> to vector<8x32xf32>
    %142 = arith.addf %139, %141 : vector<8x32xf32>
    %143 = arith.truncf %142 : vector<8x32xf32> to vector<8x32xbf16>
    %c0_62 = arith.constant 0 : index
    %c0_63 = arith.constant 0 : index
    %144 = vector.load %arg8[%c0_62, %c0_63] : memref<32x128xbf16, #tpu.memory_space<vmem>>, vector<32x128xbf16>
    %c0_64 = arith.constant 0 : index
    %c0_65 = arith.constant 0 : index
    %145 = vector.load %arg9[%c0_64, %c0_65] : memref<128x32xbf16, #tpu.memory_space<vmem>>, vector<128x32xbf16>
    %cst_66 = arith.constant dense<0.000000e+00> : vector<8x128xf32>
    %146 = tpu.matmul %143, %144, %cst_66 {dimension_numbers = #tpu.dot_dimension_numbers<[1], [0], [0], [1], [0, 0, 1, 1], [], []>} : vector<8x32xbf16>, vector<32x128xbf16>, vector<8x128xf32> -> vector<8x128xf32>
    %cst_67 = arith.constant 1.000000e-01 : f32
    %147 = vector.broadcast %cst_67 : f32 to vector<8x128xf32>
    %148 = arith.mulf %147, %146 : vector<8x128xf32>
    %cst_68 = arith.constant 0.00999999977 : f32
    %149 = vector.broadcast %cst_68 : f32 to vector<8x128xf32>
    %150 = arith.subf %148, %149 : vector<8x128xf32>
    %cst_69 = arith.constant 0.000000e+00 : f32
    %151 = vector.broadcast %cst_69 : f32 to vector<8x128xf32>
    %152 = arith.maximumf %150, %151 : vector<8x128xf32>
    %153 = arith.truncf %152 : vector<8x128xf32> to vector<8x128xbf16>
    %cst_70 = arith.constant dense<0.000000e+00> : vector<8x32xf32>
    %154 = tpu.matmul %153, %145, %cst_70 {dimension_numbers = #tpu.dot_dimension_numbers<[1], [0], [0], [1], [0, 0, 1, 1], [], []>} : vector<8x128xbf16>, vector<128x32xbf16>, vector<8x32xf32> -> vector<8x32xf32>
    %155 = arith.subf %154, %142 : vector<8x32xf32>
    %156 = arith.truncf %155 : vector<8x32xf32> to vector<8x32xbf16>
    %cst_71 = arith.constant dense<0.000000e+00> : vector<8x128xf32>
    %157 = tpu.matmul %156, %144, %cst_71 {dimension_numbers = #tpu.dot_dimension_numbers<[1], [0], [0], [1], [0, 0, 1, 1], [], []>} : vector<8x32xbf16>, vector<32x128xbf16>, vector<8x128xf32> -> vector<8x128xf32>
    %cst_72 = arith.constant 1.000000e-01 : f32
    %158 = vector.broadcast %cst_72 : f32 to vector<8x128xf32>
    %159 = arith.mulf %158, %157 : vector<8x128xf32>
    %160 = arith.subf %152, %159 : vector<8x128xf32>
    %cst_73 = arith.constant 0.00999999977 : f32
    %161 = vector.broadcast %cst_73 : f32 to vector<8x128xf32>
    %162 = arith.subf %160, %161 : vector<8x128xf32>
    %cst_74 = arith.constant 0.000000e+00 : f32
    %163 = vector.broadcast %cst_74 : f32 to vector<8x128xf32>
    %164 = arith.maximumf %162, %163 : vector<8x128xf32>
    %165 = arith.truncf %164 : vector<8x128xf32> to vector<8x128xbf16>
    %c0_75 = arith.constant 0 : index
    %c0_76 = arith.constant 0 : index
    %166 = vector.load %arg10[%c0_75, %c0_76] : memref<128x32xbf16, #tpu.memory_space<vmem>>, vector<128x32xbf16>
    %cst_77 = arith.constant dense<0.000000e+00> : vector<8x32xf32>
    %167 = tpu.matmul %165, %166, %cst_77 {dimension_numbers = #tpu.dot_dimension_numbers<[1], [0], [0], [1], [0, 0, 1, 1], [], []>} : vector<8x128xbf16>, vector<128x32xbf16>, vector<8x32xf32> -> vector<8x32xf32>
    %168 = arith.addf %167, %114 : vector<8x32xf32>
    %c0_78 = arith.constant 0 : index
    %c0_79 = arith.constant 0 : index
    %c0_80 = arith.constant 0 : index
    %169 = vector.load %arg11[%c0_78, %c0_79, %c0_80] : memref<1x8x32xf32, #tpu.memory_space<vmem>>, vector<1x8x32xf32>
    %170 = vector.shape_cast %169 : vector<1x8x32xf32> to vector<8x32xf32>
    %171 = vector.shape_cast %168 : vector<8x32xf32> to vector<1x8x32xf32>
    tpu.vector_store %arg11[%c0_78, %c0_79, %c0_80], %171 {strides = array<i32>} : memref<1x8x32xf32, #tpu.memory_space<vmem>>, vector<1x8x32xf32>,
    return
  }
  func.func @transform_0(%arg0: i32) -> (i32, i32, i32) {
    %c0_i32 = arith.constant 0 : i32
    %c0_i32_0 = arith.constant 0 : i32
    %c0_i32_1 = arith.constant 0 : i32
    return %arg0, %c0_i32, %c0_i32_0 : i32, i32, i32
  }
  func.func @transform_1(%arg0: i32) -> (i32, i32) {
    %c0_i32 = arith.constant 0 : i32
    %c0_i32_0 = arith.constant 0 : i32
    %c0_i32_1 = arith.constant 0 : i32
    return %c0_i32, %c0_i32_0 : i32, i32
  }
  func.func @transform_2(%arg0: i32) -> (i32, i32) {
    %c0_i32 = arith.constant 0 : i32
    %c0_i32_0 = arith.constant 0 : i32
    %c0_i32_1 = arith.constant 0 : i32
    return %c0_i32, %c0_i32_0 : i32, i32
  }
  func.func @transform_3(%arg0: i32) -> (i32, i32) {
    %c0_i32 = arith.constant 0 : i32
    %c0_i32_0 = arith.constant 0 : i32
    %c0_i32_1 = arith.constant 0 : i32
    return %c0_i32, %c0_i32_0 : i32, i32
  }
  func.func @transform_4(%arg0: i32) -> (i32, i32) {
    %c0_i32 = arith.constant 0 : i32
    %c0_i32_0 = arith.constant 0 : i32
    %c0_i32_1 = arith.constant 0 : i32
    return %c0_i32, %c0_i32_0 : i32, i32
  }
  func.func @transform_5(%arg0: i32) -> (i32, i32) {
    %c0_i32 = arith.constant 0 : i32
    %c0_i32_0 = arith.constant 0 : i32
    %c0_i32_1 = arith.constant 0 : i32
    return %c0_i32, %c0_i32_0 : i32, i32
  }
  func.func @transform_6(%arg0: i32) -> (i32, i32) {
    %c0_i32 = arith.constant 0 : i32
    %c0_i32_0 = arith.constant 0 : i32
    %c0_i32_1 = arith.constant 0 : i32
    return %c0_i32, %c0_i32_0 : i32, i32
  }
  func.func @transform_7(%arg0: i32) -> (i32, i32) {
    %c0_i32 = arith.constant 0 : i32
    %c0_i32_0 = arith.constant 0 : i32
    %c0_i32_1 = arith.constant 0 : i32
    return %c0_i32, %c0_i32_0 : i32, i32
  }
  func.func @transform_8(%arg0: i32) -> (i32, i32) {
    %c0_i32 = arith.constant 0 : i32
    %c0_i32_0 = arith.constant 0 : i32
    %c0_i32_1 = arith.constant 0 : i32
    return %c0_i32, %c0_i32_0 : i32, i32
  }
  func.func @transform_9(%arg0: i32) -> (i32, i32) {
    %c0_i32 = arith.constant 0 : i32
    %c0_i32_0 = arith.constant 0 : i32
    %c0_i32_1 = arith.constant 0 : i32
    return %c0_i32, %c0_i32_0 : i32, i32
  }
  func.func @transform_10(%arg0: i32) -> (i32, i32, i32) {
    %c0_i32 = arith.constant 0 : i32
    %c0_i32_0 = arith.constant 0 : i32
    %c0_i32_1 = arith.constant 0 : i32
    return %arg0, %c0_i32, %c0_i32_0 : i32, i32, i32
  }
}

module attributes {stable_mosaic.version = 11 : i64} {
  func.func @crate_layer_kernel(%arg0: i32, %arg1: memref<1x8x32xf32, #tpu.memory_space<vmem>>, %arg2: memref<1x32xf32, #tpu.memory_space<vmem>>, %arg3: memref<1x32xf32, #tpu.memory_space<vmem>>, %arg4: memref<32x32xbf16, #tpu.memory_space<vmem>>, %arg5: memref<32x32xbf16, #tpu.memory_space<vmem>>, %arg6: memref<1x32xf32, #tpu.memory_space<vmem>>, %arg7: memref<1x32xf32, #tpu.memory_space<vmem>>, %arg8: memref<32x128xbf16, #tpu.memory_space<vmem>>, %arg9: memref<128x32xbf16, #tpu.memory_space<vmem>>, %arg10: memref<128x32xbf16, #tpu.memory_space<vmem>>, %arg11: memref<1x8x32xf32, #tpu.memory_space<vmem>>, %arg12: memref<8x32xf32, #tpu.memory_space<vmem>>, %arg13: memref<8x32xf32, #tpu.memory_space<vmem>>) attributes {dimension_semantics = [#tpu.dimension_semantics<parallel>], iteration_bounds = array<i64: 2>, scalar_prefetch = 0 : i64, scratch_operands = 2 : i64, tpu.core_type = #tpu.core_type<tc>, window_params = [{transform_indices = @transform_0, window_bounds = array<i64: 1, 8, 32>}, {pipeline_mode = #tpu.pipeline_mode<synchronous>, transform_indices = @transform_1, window_bounds = array<i64: 1, 32>}, {pipeline_mode = #tpu.pipeline_mode<synchronous>, transform_indices = @transform_2, window_bounds = array<i64: 1, 32>}, {pipeline_mode = #tpu.pipeline_mode<synchronous>, transform_indices = @transform_3, window_bounds = array<i64: 32, 32>}, {pipeline_mode = #tpu.pipeline_mode<synchronous>, transform_indices = @transform_4, window_bounds = array<i64: 32, 32>}, {pipeline_mode = #tpu.pipeline_mode<synchronous>, transform_indices = @transform_5, window_bounds = array<i64: 1, 32>}, {pipeline_mode = #tpu.pipeline_mode<synchronous>, transform_indices = @transform_6, window_bounds = array<i64: 1, 32>}, {pipeline_mode = #tpu.pipeline_mode<synchronous>, transform_indices = @transform_7, window_bounds = array<i64: 32, 128>}, {pipeline_mode = #tpu.pipeline_mode<synchronous>, transform_indices = @transform_8, window_bounds = array<i64: 128, 32>}, {pipeline_mode = #tpu.pipeline_mode<synchronous>, transform_indices = @transform_9, window_bounds = array<i64: 128, 32>}, {transform_indices = @transform_10, window_bounds = array<i64: 1, 8, 32>}]} {
    %c0 = arith.constant 0 : index
    %c0_0 = arith.constant 0 : index
    %c0_1 = arith.constant 0 : index
    %0 = vector.load %arg1[%c0, %c0_0, %c0_1] : memref<1x8x32xf32, #tpu.memory_space<vmem>>, vector<1x8x32xf32>
    %1 = vector.shape_cast %0 : vector<1x8x32xf32> to vector<8x32xf32>
    %c0_2 = arith.constant 0 : index
    %c0_3 = arith.constant 0 : index
    %2 = vector.load %arg2[%c0_2, %c0_3] : memref<1x32xf32, #tpu.memory_space<vmem>>, vector<1x32xf32>
    %3 = vector.shape_cast %2 : vector<1x32xf32> to vector<32xf32>
    %c0_4 = arith.constant 0 : index
    %c0_5 = arith.constant 0 : index
    %4 = vector.load %arg3[%c0_4, %c0_5] : memref<1x32xf32, #tpu.memory_space<vmem>>, vector<1x32xf32>
    %5 = vector.shape_cast %4 : vector<1x32xf32> to vector<32xf32>
    %cst = arith.constant dense<0.000000e+00> : vector<8xf32>
    %6 = vector.multi_reduction <add>, %1, %cst [1] : vector<8x32xf32> to vector<8xf32>
    %7 = vector.shape_cast %6 : vector<8xf32> to vector<8x1xf32>
    %cst_6 = arith.constant 3.200000e+01 : f32
    %8 = vector.broadcast %cst_6 : f32 to vector<8x1xf32>
    %9 = arith.divf %7, %8 : vector<8x1xf32>
    %10 = vector.broadcast %9 : vector<8x1xf32> to vector<8x32xf32>
    %11 = arith.subf %1, %10 : vector<8x32xf32>
    %12 = arith.mulf %11, %11 : vector<8x32xf32>
    %cst_7 = arith.constant dense<0.000000e+00> : vector<8xf32>
    %13 = vector.multi_reduction <add>, %12, %cst_7 [1] : vector<8x32xf32> to vector<8xf32>
    %14 = vector.shape_cast %13 : vector<8xf32> to vector<8x1xf32>
    %cst_8 = arith.constant 3.200000e+01 : f32
    %15 = vector.broadcast %cst_8 : f32 to vector<8x1xf32>
    %16 = arith.divf %14, %15 : vector<8x1xf32>
    %17 = vector.broadcast %9 : vector<8x1xf32> to vector<8x32xf32>
    %18 = arith.subf %1, %17 : vector<8x32xf32>
    %cst_9 = arith.constant 9.99999997E-7 : f32
    %19 = vector.broadcast %cst_9 : f32 to vector<8x1xf32>
    %20 = arith.addf %16, %19 : vector<8x1xf32>
    %21 = math.rsqrt %20 : vector<8x1xf32>
    %22 = vector.broadcast %21 : vector<8x1xf32> to vector<8x32xf32>
    %23 = arith.mulf %18, %22 : vector<8x32xf32>
    %24 = vector.shape_cast %3 : vector<32xf32> to vector<1x32xf32>
    %25 = vector.broadcast %24 : vector<1x32xf32> to vector<8x32xf32>
    %26 = arith.mulf %23, %25 : vector<8x32xf32>
    %27 = vector.shape_cast %5 : vector<32xf32> to vector<1x32xf32>
    %28 = vector.broadcast %27 : vector<1x32xf32> to vector<8x32xf32>
    %29 = arith.addf %26, %28 : vector<8x32xf32>
    %30 = arith.truncf %29 : vector<8x32xf32> to vector<8x32xbf16>
    %c0_10 = arith.constant 0 : index
    %c0_11 = arith.constant 0 : index
    %31 = vector.load %arg4[%c0_10, %c0_11] : memref<32x32xbf16, #tpu.memory_space<vmem>>, vector<32x32xbf16>
    %cst_12 = arith.constant dense<0.000000e+00> : vector<8x32xf32>
    %32 = tpu.matmul %30, %31, %cst_12 {dimension_numbers = #tpu.dot_dimension_numbers<[1], [0], [0], [1], [0, 0, 1, 1], [], []>} : vector<8x32xbf16>, vector<32x32xbf16>, vector<8x32xf32> -> vector<8x32xf32>
    %c0_13 = arith.constant 0 : index
    %c0_14 = arith.constant 0 : index
    %33 = vector.load %arg12[%c0_13, %c0_14] : memref<8x32xf32, #tpu.memory_space<vmem>>, vector<8x32xf32>
    tpu.vector_store %arg12[%c0_13, %c0_14], %32 {strides = array<i32>} : memref<8x32xf32, #tpu.memory_space<vmem>>, vector<8x32xf32>,
    %c0_15 = arith.constant 0 : index
    %c0_16 = arith.constant 0 : index
    %34 = vector.load %arg12[%c0_15, %c0_16] : memref<8x32xf32, #tpu.memory_space<vmem>>, vector<8x8xf32>
    %35 = arith.truncf %34 : vector<8x8xf32> to vector<8x8xbf16>
    %cst_17 = arith.constant 0.353553385 : f32
    %36 = vector.broadcast %cst_17 : f32 to vector<8x8xf32>
    %37 = arith.mulf %34, %36 : vector<8x8xf32>
    %38 = arith.truncf %37 : vector<8x8xf32> to vector<8x8xbf16>
    %cst_18 = arith.constant dense<0.000000e+00> : vector<8x8xf32>
    %39 = tpu.matmul %38, %35, %cst_18 {dimension_numbers = #tpu.dot_dimension_numbers<[1], [1], [0], [0], [0, 0, 1, 0], [], []>} : vector<8x8xbf16>, vector<8x8xbf16>, vector<8x8xf32> -> vector<8x8xf32>
    %cst_19 = arith.constant dense<0xFF800000> : vector<8xf32>
    %40 = vector.multi_reduction <maximumf>, %39, %cst_19 [1] : vector<8x8xf32> to vector<8xf32>
    %41 = vector.shape_cast %40 : vector<8xf32> to vector<8x1xf32>
    %42 = vector.broadcast %41 : vector<8x1xf32> to vector<8x8xf32>
    %43 = arith.subf %39, %42 : vector<8x8xf32>
    %44 = math.exp %43 : vector<8x8xf32>
    %cst_20 = arith.constant dense<0.000000e+00> : vector<8xf32>
    %45 = vector.multi_reduction <add>, %44, %cst_20 [1] : vector<8x8xf32> to vector<8xf32>
    %46 = vector.shape_cast %45 : vector<8xf32> to vector<8x1xf32>
    %47 = tpu.reciprocal %46 {approx = true} : vector<8x1xf32> -> vector<8x1xf32>
    %48 = vector.broadcast %47 : vector<8x1xf32> to vector<8x8xf32>
    %49 = arith.mulf %44, %48 : vector<8x8xf32>
    %50 = arith.truncf %49 : vector<8x8xf32> to vector<8x8xbf16>
    %cst_21 = arith.constant dense<0.000000e+00> : vector<8x8xf32>
    %51 = tpu.matmul %50, %35, %cst_21 {dimension_numbers = #tpu.dot_dimension_numbers<[1], [0], [0], [1], [0, 0, 1, 1], [], []>} : vector<8x8xbf16>, vector<8x8xbf16>, vector<8x8xf32> -> vector<8x8xf32>
    %c0_22 = arith.constant 0 : index
    %c0_23 = arith.constant 0 : index
    %52 = vector.load %arg13[%c0_22, %c0_23] : memref<8x32xf32, #tpu.memory_space<vmem>>, vector<8x8xf32>
    tpu.vector_store %arg13[%c0_22, %c0_23], %51 {strides = array<i32>} : memref<8x32xf32, #tpu.memory_space<vmem>>, vector<8x8xf32>,
    %c0_24 = arith.constant 0 : index
    %c8 = arith.constant 8 : index
    %53 = vector.load %arg12[%c0_24, %c8] : memref<8x32xf32, #tpu.memory_space<vmem>>, vector<8x8xf32>
    %54 = arith.truncf %53 : vector<8x8xf32> to vector<8x8xbf16>
    %cst_25 = arith.constant 0.353553385 : f32
    %55 = vector.broadcast %cst_25 : f32 to vector<8x8xf32>
    %56 = arith.mulf %53, %55 : vector<8x8xf32>
    %57 = arith.truncf %56 : vector<8x8xf32> to vector<8x8xbf16>
    %cst_26 = arith.constant dense<0.000000e+00> : vector<8x8xf32>
    %58 = tpu.matmul %57, %54, %cst_26 {dimension_numbers = #tpu.dot_dimension_numbers<[1], [1], [0], [0], [0, 0, 1, 0], [], []>} : vector<8x8xbf16>, vector<8x8xbf16>, vector<8x8xf32> -> vector<8x8xf32>
    %cst_27 = arith.constant dense<0xFF800000> : vector<8xf32>
    %59 = vector.multi_reduction <maximumf>, %58, %cst_27 [1] : vector<8x8xf32> to vector<8xf32>
    %60 = vector.shape_cast %59 : vector<8xf32> to vector<8x1xf32>
    %61 = vector.broadcast %60 : vector<8x1xf32> to vector<8x8xf32>
    %62 = arith.subf %58, %61 : vector<8x8xf32>
    %63 = math.exp %62 : vector<8x8xf32>
    %cst_28 = arith.constant dense<0.000000e+00> : vector<8xf32>
    %64 = vector.multi_reduction <add>, %63, %cst_28 [1] : vector<8x8xf32> to vector<8xf32>
    %65 = vector.shape_cast %64 : vector<8xf32> to vector<8x1xf32>
    %66 = tpu.reciprocal %65 {approx = true} : vector<8x1xf32> -> vector<8x1xf32>
    %67 = vector.broadcast %66 : vector<8x1xf32> to vector<8x8xf32>
    %68 = arith.mulf %63, %67 : vector<8x8xf32>
    %69 = arith.truncf %68 : vector<8x8xf32> to vector<8x8xbf16>
    %cst_29 = arith.constant dense<0.000000e+00> : vector<8x8xf32>
    %70 = tpu.matmul %69, %54, %cst_29 {dimension_numbers = #tpu.dot_dimension_numbers<[1], [0], [0], [1], [0, 0, 1, 1], [], []>} : vector<8x8xbf16>, vector<8x8xbf16>, vector<8x8xf32> -> vector<8x8xf32>
    %c0_30 = arith.constant 0 : index
    %c8_31 = arith.constant 8 : index
    %71 = vector.load %arg13[%c0_30, %c8_31] : memref<8x32xf32, #tpu.memory_space<vmem>>, vector<8x8xf32>
    tpu.vector_store %arg13[%c0_30, %c8_31], %70 {strides = array<i32>} : memref<8x32xf32, #tpu.memory_space<vmem>>, vector<8x8xf32>,
    %c0_32 = arith.constant 0 : index
    %c16 = arith.constant 16 : index
    %72 = vector.load %arg12[%c0_32, %c16] : memref<8x32xf32, #tpu.memory_space<vmem>>, vector<8x8xf32>
    %73 = arith.truncf %72 : vector<8x8xf32> to vector<8x8xbf16>
    %cst_33 = arith.constant 0.353553385 : f32
    %74 = vector.broadcast %cst_33 : f32 to vector<8x8xf32>
    %75 = arith.mulf %72, %74 : vector<8x8xf32>
    %76 = arith.truncf %75 : vector<8x8xf32> to vector<8x8xbf16>
    %cst_34 = arith.constant dense<0.000000e+00> : vector<8x8xf32>
    %77 = tpu.matmul %76, %73, %cst_34 {dimension_numbers = #tpu.dot_dimension_numbers<[1], [1], [0], [0], [0, 0, 1, 0], [], []>} : vector<8x8xbf16>, vector<8x8xbf16>, vector<8x8xf32> -> vector<8x8xf32>
    %cst_35 = arith.constant dense<0xFF800000> : vector<8xf32>
    %78 = vector.multi_reduction <maximumf>, %77, %cst_35 [1] : vector<8x8xf32> to vector<8xf32>
    %79 = vector.shape_cast %78 : vector<8xf32> to vector<8x1xf32>
    %80 = vector.broadcast %79 : vector<8x1xf32> to vector<8x8xf32>
    %81 = arith.subf %77, %80 : vector<8x8xf32>
    %82 = math.exp %81 : vector<8x8xf32>
    %cst_36 = arith.constant dense<0.000000e+00> : vector<8xf32>
    %83 = vector.multi_reduction <add>, %82, %cst_36 [1] : vector<8x8xf32> to vector<8xf32>
    %84 = vector.shape_cast %83 : vector<8xf32> to vector<8x1xf32>
    %85 = tpu.reciprocal %84 {approx = true} : vector<8x1xf32> -> vector<8x1xf32>
    %86 = vector.broadcast %85 : vector<8x1xf32> to vector<8x8xf32>
    %87 = arith.mulf %82, %86 : vector<8x8xf32>
    %88 = arith.truncf %87 : vector<8x8xf32> to vector<8x8xbf16>
    %cst_37 = arith.constant dense<0.000000e+00> : vector<8x8xf32>
    %89 = tpu.matmul %88, %73, %cst_37 {dimension_numbers = #tpu.dot_dimension_numbers<[1], [0], [0], [1], [0, 0, 1, 1], [], []>} : vector<8x8xbf16>, vector<8x8xbf16>, vector<8x8xf32> -> vector<8x8xf32>
    %c0_38 = arith.constant 0 : index
    %c16_39 = arith.constant 16 : index
    %90 = vector.load %arg13[%c0_38, %c16_39] : memref<8x32xf32, #tpu.memory_space<vmem>>, vector<8x8xf32>
    tpu.vector_store %arg13[%c0_38, %c16_39], %89 {strides = array<i32>} : memref<8x32xf32, #tpu.memory_space<vmem>>, vector<8x8xf32>,
    %c0_40 = arith.constant 0 : index
    %c24 = arith.constant 24 : index
    %91 = vector.load %arg12[%c0_40, %c24] : memref<8x32xf32, #tpu.memory_space<vmem>>, vector<8x8xf32>
    %92 = arith.truncf %91 : vector<8x8xf32> to vector<8x8xbf16>
    %cst_41 = arith.constant 0.353553385 : f32
    %93 = vector.broadcast %cst_41 : f32 to vector<8x8xf32>
    %94 = arith.mulf %91, %93 : vector<8x8xf32>
    %95 = arith.truncf %94 : vector<8x8xf32> to vector<8x8xbf16>
    %cst_42 = arith.constant dense<0.000000e+00> : vector<8x8xf32>
    %96 = tpu.matmul %95, %92, %cst_42 {dimension_numbers = #tpu.dot_dimension_numbers<[1], [1], [0], [0], [0, 0, 1, 0], [], []>} : vector<8x8xbf16>, vector<8x8xbf16>, vector<8x8xf32> -> vector<8x8xf32>
    %cst_43 = arith.constant dense<0xFF800000> : vector<8xf32>
    %97 = vector.multi_reduction <maximumf>, %96, %cst_43 [1] : vector<8x8xf32> to vector<8xf32>
    %98 = vector.shape_cast %97 : vector<8xf32> to vector<8x1xf32>
    %99 = vector.broadcast %98 : vector<8x1xf32> to vector<8x8xf32>
    %100 = arith.subf %96, %99 : vector<8x8xf32>
    %101 = math.exp %100 : vector<8x8xf32>
    %cst_44 = arith.constant dense<0.000000e+00> : vector<8xf32>
    %102 = vector.multi_reduction <add>, %101, %cst_44 [1] : vector<8x8xf32> to vector<8xf32>
    %103 = vector.shape_cast %102 : vector<8xf32> to vector<8x1xf32>
    %104 = tpu.reciprocal %103 {approx = true} : vector<8x1xf32> -> vector<8x1xf32>
    %105 = vector.broadcast %104 : vector<8x1xf32> to vector<8x8xf32>
    %106 = arith.mulf %101, %105 : vector<8x8xf32>
    %107 = arith.truncf %106 : vector<8x8xf32> to vector<8x8xbf16>
    %cst_45 = arith.constant dense<0.000000e+00> : vector<8x8xf32>
    %108 = tpu.matmul %107, %92, %cst_45 {dimension_numbers = #tpu.dot_dimension_numbers<[1], [0], [0], [1], [0, 0, 1, 1], [], []>} : vector<8x8xbf16>, vector<8x8xbf16>, vector<8x8xf32> -> vector<8x8xf32>
    %c0_46 = arith.constant 0 : index
    %c24_47 = arith.constant 24 : index
    %109 = vector.load %arg13[%c0_46, %c24_47] : memref<8x32xf32, #tpu.memory_space<vmem>>, vector<8x8xf32>
    tpu.vector_store %arg13[%c0_46, %c24_47], %108 {strides = array<i32>} : memref<8x32xf32, #tpu.memory_space<vmem>>, vector<8x8xf32>,
    %c0_48 = arith.constant 0 : index
    %c0_49 = arith.constant 0 : index
    %110 = vector.load %arg13[%c0_48, %c0_49] : memref<8x32xf32, #tpu.memory_space<vmem>>, vector<8x32xf32>
    %111 = arith.truncf %110 : vector<8x32xf32> to vector<8x32xbf16>
    %c0_50 = arith.constant 0 : index
    %c0_51 = arith.constant 0 : index
    %112 = vector.load %arg5[%c0_50, %c0_51] : memref<32x32xbf16, #tpu.memory_space<vmem>>, vector<32x32xbf16>
    %cst_52 = arith.constant dense<0.000000e+00> : vector<8x32xf32>
    %113 = tpu.matmul %111, %112, %cst_52 {dimension_numbers = #tpu.dot_dimension_numbers<[1], [0], [0], [1], [0, 0, 1, 1], [], []>} : vector<8x32xbf16>, vector<32x32xbf16>, vector<8x32xf32> -> vector<8x32xf32>
    %114 = arith.addf %113, %1 : vector<8x32xf32>
    %c0_53 = arith.constant 0 : index
    %c0_54 = arith.constant 0 : index
    %115 = vector.load %arg6[%c0_53, %c0_54] : memref<1x32xf32, #tpu.memory_space<vmem>>, vector<1x32xf32>
    %116 = vector.shape_cast %115 : vector<1x32xf32> to vector<32xf32>
    %c0_55 = arith.constant 0 : index
    %c0_56 = arith.constant 0 : index
    %117 = vector.load %arg7[%c0_55, %c0_56] : memref<1x32xf32, #tpu.memory_space<vmem>>, vector<1x32xf32>
    %118 = vector.shape_cast %117 : vector<1x32xf32> to vector<32xf32>
    %cst_57 = arith.constant dense<0.000000e+00> : vector<8xf32>
    %119 = vector.multi_reduction <add>, %114, %cst_57 [1] : vector<8x32xf32> to vector<8xf32>
    %120 = vector.shape_cast %119 : vector<8xf32> to vector<8x1xf32>
    %cst_58 = arith.constant 3.200000e+01 : f32
    %121 = vector.broadcast %cst_58 : f32 to vector<8x1xf32>
    %122 = arith.divf %120, %121 : vector<8x1xf32>
    %123 = vector.broadcast %122 : vector<8x1xf32> to vector<8x32xf32>
    %124 = arith.subf %114, %123 : vector<8x32xf32>
    %125 = arith.mulf %124, %124 : vector<8x32xf32>
    %cst_59 = arith.constant dense<0.000000e+00> : vector<8xf32>
    %126 = vector.multi_reduction <add>, %125, %cst_59 [1] : vector<8x32xf32> to vector<8xf32>
    %127 = vector.shape_cast %126 : vector<8xf32> to vector<8x1xf32>
    %cst_60 = arith.constant 3.200000e+01 : f32
    %128 = vector.broadcast %cst_60 : f32 to vector<8x1xf32>
    %129 = arith.divf %127, %128 : vector<8x1xf32>
    %130 = vector.broadcast %122 : vector<8x1xf32> to vector<8x32xf32>
    %131 = arith.subf %114, %130 : vector<8x32xf32>
    %cst_61 = arith.constant 9.99999997E-7 : f32
    %132 = vector.broadcast %cst_61 : f32 to vector<8x1xf32>
    %133 = arith.addf %129, %132 : vector<8x1xf32>
    %134 = math.rsqrt %133 : vector<8x1xf32>
    %135 = vector.broadcast %134 : vector<8x1xf32> to vector<8x32xf32>
    %136 = arith.mulf %131, %135 : vector<8x32xf32>
    %137 = vector.shape_cast %116 : vector<32xf32> to vector<1x32xf32>
    %138 = vector.broadcast %137 : vector<1x32xf32> to vector<8x32xf32>
    %139 = arith.mulf %136, %138 : vector<8x32xf32>
    %140 = vector.shape_cast %118 : vector<32xf32> to vector<1x32xf32>
    %141 = vector.broadcast %140 : vector<1x32xf32> to vector<8x32xf32>
    %142 = arith.addf %139, %141 : vector<8x32xf32>
    %143 = arith.truncf %142 : vector<8x32xf32> to vector<8x32xbf16>
    %c0_62 = arith.constant 0 : index
    %c0_63 = arith.constant 0 : index
    %144 = vector.load %arg8[%c0_62, %c0_63] : memref<32x128xbf16, #tpu.memory_space<vmem>>, vector<32x128xbf16>
    %c0_64 = arith.constant 0 : index
    %c0_65 = arith.constant 0 : index
    %145 = vector.load %arg9[%c0_64, %c0_65] : memref<128x32xbf16, #tpu.memory_space<vmem>>, vector<128x32xbf16>
    %cst_66 = arith.constant dense<0.000000e+00> : vector<8x128xf32>
    %146 = tpu.matmul %143, %144, %cst_66 {dimension_numbers = #tpu.dot_dimension_numbers<[1], [0], [0], [1], [0, 0, 1, 1], [], []>} : vector<8x32xbf16>, vector<32x128xbf16>, vector<8x128xf32> -> vector<8x128xf32>
    %cst_67 = arith.constant 1.000000e-01 : f32
    %147 = vector.broadcast %cst_67 : f32 to vector<8x128xf32>
    %148 = arith.mulf %147, %146 : vector<8x128xf32>
    %cst_68 = arith.constant 0.00999999977 : f32
    %149 = vector.broadcast %cst_68 : f32 to vector<8x128xf32>
    %150 = arith.subf %148, %149 : vector<8x128xf32>
    %cst_69 = arith.constant 0.000000e+00 : f32
    %151 = vector.broadcast %cst_69 : f32 to vector<8x128xf32>
    %152 = arith.maximumf %150, %151 : vector<8x128xf32>
    %153 = arith.truncf %152 : vector<8x128xf32> to vector<8x128xbf16>
    %cst_70 = arith.constant dense<0.000000e+00> : vector<8x32xf32>
    %154 = tpu.matmul %153, %145, %cst_70 {dimension_numbers = #tpu.dot_dimension_numbers<[1], [0], [0], [1], [0, 0, 1, 1], [], []>} : vector<8x128xbf16>, vector<128x32xbf16>, vector<8x32xf32> -> vector<8x32xf32>
    %155 = arith.subf %154, %142 : vector<8x32xf32>
    %156 = arith.truncf %155 : vector<8x32xf32> to vector<8x32xbf16>
    %cst_71 = arith.constant dense<0.000000e+00> : vector<8x128xf32>
    %157 = tpu.matmul %156, %144, %cst_71 {dimension_numbers = #tpu.dot_dimension_numbers<[1], [0], [0], [1], [0, 0, 1, 1], [], []>} : vector<8x32xbf16>, vector<32x128xbf16>, vector<8x128xf32> -> vector<8x128xf32>
    %cst_72 = arith.constant 1.000000e-01 : f32
    %158 = vector.broadcast %cst_72 : f32 to vector<8x128xf32>
    %159 = arith.mulf %158, %157 : vector<8x128xf32>
    %160 = arith.subf %152, %159 : vector<8x128xf32>
    %cst_73 = arith.constant 0.00999999977 : f32
    %161 = vector.broadcast %cst_73 : f32 to vector<8x128xf32>
    %162 = arith.subf %160, %161 : vector<8x128xf32>
    %cst_74 = arith.constant 0.000000e+00 : f32
    %163 = vector.broadcast %cst_74 : f32 to vector<8x128xf32>
    %164 = arith.maximumf %162, %163 : vector<8x128xf32>
    %165 = arith.truncf %164 : vector<8x128xf32> to vector<8x128xbf16>
    %c0_75 = arith.constant 0 : index
    %c0_76 = arith.constant 0 : index
    %166 = vector.load %arg10[%c0_75, %c0_76] : memref<128x32xbf16, #tpu.memory_space<vmem>>, vector<128x32xbf16>
    %cst_77 = arith.constant dense<0.000000e+00> : vector<8x32xf32>
    %167 = tpu.matmul %165, %166, %cst_77 {dimension_numbers = #tpu.dot_dimension_numbers<[1], [0], [0], [1], [0, 0, 1, 1], [], []>} : vector<8x128xbf16>, vector<128x32xbf16>, vector<8x32xf32> -> vector<8x32xf32>
    %168 = arith.addf %167, %114 : vector<8x32xf32>
    %c0_78 = arith.constant 0 : index
    %c0_79 = arith.constant 0 : index
    %c0_80 = arith.constant 0 : index
    %169 = vector.load %arg11[%c0_78, %c0_79, %c0_80] : memref<1x8x32xf32, #tpu.memory_space<vmem>>, vector<1x8x32xf32>
    %170 = vector.shape_cast %169 : vector<1x8x32xf32> to vector<8x32xf32>
    %171 = vector.shape_cast %168 : vector<8x32xf32> to vector<1x8x32xf32>
    tpu.vector_store %arg11[%c0_78, %c0_79, %c0_80], %171 {strides = array<i32>} : memref<1x8x32xf32, #tpu.memory_space<vmem>>, vector<1x8x32xf32>,
    return
  }
  func.func @transform_0(%arg0: i32) -> (i32, i32, i32) {
    %c0_i32 = arith.constant 0 : i32
    %c0_i32_0 = arith.constant 0 : i32
    %c0_i32_1 = arith.constant 0 : i32
    return %arg0, %c0_i32, %c0_i32_0 : i32, i32, i32
  }
  func.func @transform_1(%arg0: i32) -> (i32, i32) {
    %c0_i32 = arith.constant 0 : i32
    %c0_i32_0 = arith.constant 0 : i32
    %c0_i32_1 = arith.constant 0 : i32
    return %c0_i32, %c0_i32_0 : i32, i32
  }
  func.func @transform_2(%arg0: i32) -> (i32, i32) {
    %c0_i32 = arith.constant 0 : i32
    %c0_i32_0 = arith.constant 0 : i32
    %c0_i32_1 = arith.constant 0 : i32
    return %c0_i32, %c0_i32_0 : i32, i32
  }
  func.func @transform_3(%arg0: i32) -> (i32, i32) {
    %c0_i32 = arith.constant 0 : i32
    %c0_i32_0 = arith.constant 0 : i32
    %c0_i32_1 = arith.constant 0 : i32
    return %c0_i32, %c0_i32_0 : i32, i32
  }
  func.func @transform_4(%arg0: i32) -> (i32, i32) {
    %c0_i32 = arith.constant 0 : i32
    %c0_i32_0 = arith.constant 0 : i32
    %c0_i32_1 = arith.constant 0 : i32
    return %c0_i32, %c0_i32_0 : i32, i32
  }
  func.func @transform_5(%arg0: i32) -> (i32, i32) {
    %c0_i32 = arith.constant 0 : i32
    %c0_i32_0 = arith.constant 0 : i32
    %c0_i32_1 = arith.constant 0 : i32
    return %c0_i32, %c0_i32_0 : i32, i32
  }
  func.func @transform_6(%arg0: i32) -> (i32, i32) {
    %c0_i32 = arith.constant 0 : i32
    %c0_i32_0 = arith.constant 0 : i32
    %c0_i32_1 = arith.constant 0 : i32
    return %c0_i32, %c0_i32_0 : i32, i32
  }
  func.func @transform_7(%arg0: i32) -> (i32, i32) {
    %c0_i32 = arith.constant 0 : i32
    %c0_i32_0 = arith.constant 0 : i32
    %c0_i32_1 = arith.constant 0 : i32
    return %c0_i32, %c0_i32_0 : i32, i32
  }
  func.func @transform_8(%arg0: i32) -> (i32, i32) {
    %c0_i32 = arith.constant 0 : i32
    %c0_i32_0 = arith.constant 0 : i32
    %c0_i32_1 = arith.constant 0 : i32
    return %c0_i32, %c0_i32_0 : i32, i32
  }
  func.func @transform_9(%arg0: i32) -> (i32, i32) {
    %c0_i32 = arith.constant 0 : i32
    %c0_i32_0 = arith.constant 0 : i32
    %c0_i32_1 = arith.constant 0 : i32
    return %c0_i32, %c0_i32_0 : i32, i32
  }
  func.func @transform_10(%arg0: i32) -> (i32, i32, i32) {
    %c0_i32 = arith.constant 0 : i32
    %c0_i32_0 = arith.constant 0 : i32
    %c0_i32_1 = arith.constant 0 : i32
    return %arg0, %c0_i32, %c0_i32_0 : i32, i32, i32
  }
}

module attributes {stable_mosaic.version = 11 : i64} {
  func.func @crate_layer_kernel(%arg0: i32, %arg1: memref<1x8x32xf32, #tpu.memory_space<vmem>>, %arg2: memref<1x32xf32, #tpu.memory_space<vmem>>, %arg3: memref<1x32xf32, #tpu.memory_space<vmem>>, %arg4: memref<32x32xbf16, #tpu.memory_space<vmem>>, %arg5: memref<32x32xbf16, #tpu.memory_space<vmem>>, %arg6: memref<1x32xf32, #tpu.memory_space<vmem>>, %arg7: memref<1x32xf32, #tpu.memory_space<vmem>>, %arg8: memref<32x128xbf16, #tpu.memory_space<vmem>>, %arg9: memref<128x32xbf16, #tpu.memory_space<vmem>>, %arg10: memref<128x32xbf16, #tpu.memory_space<vmem>>, %arg11: memref<1x8x32xf32, #tpu.memory_space<vmem>>, %arg12: memref<8x32xf32, #tpu.memory_space<vmem>>, %arg13: memref<8x32xf32, #tpu.memory_space<vmem>>) attributes {dimension_semantics = [#tpu.dimension_semantics<parallel>], iteration_bounds = array<i64: 2>, scalar_prefetch = 0 : i64, scratch_operands = 2 : i64, tpu.core_type = #tpu.core_type<tc>, window_params = [{transform_indices = @transform_0, window_bounds = array<i64: 1, 8, 32>}, {pipeline_mode = #tpu.pipeline_mode<synchronous>, transform_indices = @transform_1, window_bounds = array<i64: 1, 32>}, {pipeline_mode = #tpu.pipeline_mode<synchronous>, transform_indices = @transform_2, window_bounds = array<i64: 1, 32>}, {pipeline_mode = #tpu.pipeline_mode<synchronous>, transform_indices = @transform_3, window_bounds = array<i64: 32, 32>}, {pipeline_mode = #tpu.pipeline_mode<synchronous>, transform_indices = @transform_4, window_bounds = array<i64: 32, 32>}, {pipeline_mode = #tpu.pipeline_mode<synchronous>, transform_indices = @transform_5, window_bounds = array<i64: 1, 32>}, {pipeline_mode = #tpu.pipeline_mode<synchronous>, transform_indices = @transform_6, window_bounds = array<i64: 1, 32>}, {pipeline_mode = #tpu.pipeline_mode<synchronous>, transform_indices = @transform_7, window_bounds = array<i64: 32, 128>}, {pipeline_mode = #tpu.pipeline_mode<synchronous>, transform_indices = @transform_8, window_bounds = array<i64: 128, 32>}, {pipeline_mode = #tpu.pipeline_mode<synchronous>, transform_indices = @transform_9, window_bounds = array<i64: 128, 32>}, {transform_indices = @transform_10, window_bounds = array<i64: 1, 8, 32>}]} {
    %c0 = arith.constant 0 : index
    %c0_0 = arith.constant 0 : index
    %c0_1 = arith.constant 0 : index
    %0 = vector.load %arg1[%c0, %c0_0, %c0_1] : memref<1x8x32xf32, #tpu.memory_space<vmem>>, vector<1x8x32xf32>
    %1 = vector.shape_cast %0 : vector<1x8x32xf32> to vector<8x32xf32>
    %c0_2 = arith.constant 0 : index
    %c0_3 = arith.constant 0 : index
    %2 = vector.load %arg2[%c0_2, %c0_3] : memref<1x32xf32, #tpu.memory_space<vmem>>, vector<1x32xf32>
    %3 = vector.shape_cast %2 : vector<1x32xf32> to vector<32xf32>
    %c0_4 = arith.constant 0 : index
    %c0_5 = arith.constant 0 : index
    %4 = vector.load %arg3[%c0_4, %c0_5] : memref<1x32xf32, #tpu.memory_space<vmem>>, vector<1x32xf32>
    %5 = vector.shape_cast %4 : vector<1x32xf32> to vector<32xf32>
    %cst = arith.constant dense<0.000000e+00> : vector<8xf32>
    %6 = vector.multi_reduction <add>, %1, %cst [1] : vector<8x32xf32> to vector<8xf32>
    %7 = vector.shape_cast %6 : vector<8xf32> to vector<8x1xf32>
    %cst_6 = arith.constant 3.200000e+01 : f32
    %8 = vector.broadcast %cst_6 : f32 to vector<8x1xf32>
    %9 = arith.divf %7, %8 : vector<8x1xf32>
    %10 = vector.broadcast %9 : vector<8x1xf32> to vector<8x32xf32>
    %11 = arith.subf %1, %10 : vector<8x32xf32>
    %12 = arith.mulf %11, %11 : vector<8x32xf32>
    %cst_7 = arith.constant dense<0.000000e+00> : vector<8xf32>
    %13 = vector.multi_reduction <add>, %12, %cst_7 [1] : vector<8x32xf32> to vector<8xf32>
    %14 = vector.shape_cast %13 : vector<8xf32> to vector<8x1xf32>
    %cst_8 = arith.constant 3.200000e+01 : f32
    %15 = vector.broadcast %cst_8 : f32 to vector<8x1xf32>
    %16 = arith.divf %14, %15 : vector<8x1xf32>
    %17 = vector.broadcast %9 : vector<8x1xf32> to vector<8x32xf32>
    %18 = arith.subf %1, %17 : vector<8x32xf32>
    %cst_9 = arith.constant 9.99999997E-7 : f32
    %19 = vector.broadcast %cst_9 : f32 to vector<8x1xf32>
    %20 = arith.addf %16, %19 : vector<8x1xf32>
    %21 = math.rsqrt %20 : vector<8x1xf32>
    %22 = vector.broadcast %21 : vector<8x1xf32> to vector<8x32xf32>
    %23 = arith.mulf %18, %22 : vector<8x32xf32>
    %24 = vector.shape_cast %3 : vector<32xf32> to vector<1x32xf32>
    %25 = vector.broadcast %24 : vector<1x32xf32> to vector<8x32xf32>
    %26 = arith.mulf %23, %25 : vector<8x32xf32>
    %27 = vector.shape_cast %5 : vector<32xf32> to vector<1x32xf32>
    %28 = vector.broadcast %27 : vector<1x32xf32> to vector<8x32xf32>
    %29 = arith.addf %26, %28 : vector<8x32xf32>
    %30 = arith.truncf %29 : vector<8x32xf32> to vector<8x32xbf16>
    %c0_10 = arith.constant 0 : index
    %c0_11 = arith.constant 0 : index
    %31 = vector.load %arg4[%c0_10, %c0_11] : memref<32x32xbf16, #tpu.memory_space<vmem>>, vector<32x32xbf16>
    %cst_12 = arith.constant dense<0.000000e+00> : vector<8x32xf32>
    %32 = tpu.matmul %30, %31, %cst_12 {dimension_numbers = #tpu.dot_dimension_numbers<[1], [0], [0], [1], [0, 0, 1, 1], [], []>} : vector<8x32xbf16>, vector<32x32xbf16>, vector<8x32xf32> -> vector<8x32xf32>
    %c0_13 = arith.constant 0 : index
    %c0_14 = arith.constant 0 : index
    %33 = vector.load %arg12[%c0_13, %c0_14] : memref<8x32xf32, #tpu.memory_space<vmem>>, vector<8x32xf32>
    tpu.vector_store %arg12[%c0_13, %c0_14], %32 {strides = array<i32>} : memref<8x32xf32, #tpu.memory_space<vmem>>, vector<8x32xf32>,
    %c0_15 = arith.constant 0 : index
    %c0_16 = arith.constant 0 : index
    %34 = vector.load %arg12[%c0_15, %c0_16] : memref<8x32xf32, #tpu.memory_space<vmem>>, vector<8x8xf32>
    %35 = arith.truncf %34 : vector<8x8xf32> to vector<8x8xbf16>
    %cst_17 = arith.constant 0.353553385 : f32
    %36 = vector.broadcast %cst_17 : f32 to vector<8x8xf32>
    %37 = arith.mulf %34, %36 : vector<8x8xf32>
    %38 = arith.truncf %37 : vector<8x8xf32> to vector<8x8xbf16>
    %cst_18 = arith.constant dense<0.000000e+00> : vector<8x8xf32>
    %39 = tpu.matmul %38, %35, %cst_18 {dimension_numbers = #tpu.dot_dimension_numbers<[1], [1], [0], [0], [0, 0, 1, 0], [], []>} : vector<8x8xbf16>, vector<8x8xbf16>, vector<8x8xf32> -> vector<8x8xf32>
    %cst_19 = arith.constant dense<0xFF800000> : vector<8xf32>
    %40 = vector.multi_reduction <maximumf>, %39, %cst_19 [1] : vector<8x8xf32> to vector<8xf32>
    %41 = vector.shape_cast %40 : vector<8xf32> to vector<8x1xf32>
    %42 = vector.broadcast %41 : vector<8x1xf32> to vector<8x8xf32>
    %43 = arith.subf %39, %42 : vector<8x8xf32>
    %44 = math.exp %43 : vector<8x8xf32>
    %cst_20 = arith.constant dense<0.000000e+00> : vector<8xf32>
    %45 = vector.multi_reduction <add>, %44, %cst_20 [1] : vector<8x8xf32> to vector<8xf32>
    %46 = vector.shape_cast %45 : vector<8xf32> to vector<8x1xf32>
    %47 = tpu.reciprocal %46 {approx = true} : vector<8x1xf32> -> vector<8x1xf32>
    %48 = vector.broadcast %47 : vector<8x1xf32> to vector<8x8xf32>
    %49 = arith.mulf %44, %48 : vector<8x8xf32>
    %50 = arith.truncf %49 : vector<8x8xf32> to vector<8x8xbf16>
    %cst_21 = arith.constant dense<0.000000e+00> : vector<8x8xf32>
    %51 = tpu.matmul %50, %35, %cst_21 {dimension_numbers = #tpu.dot_dimension_numbers<[1], [0], [0], [1], [0, 0, 1, 1], [], []>} : vector<8x8xbf16>, vector<8x8xbf16>, vector<8x8xf32> -> vector<8x8xf32>
    %c0_22 = arith.constant 0 : index
    %c0_23 = arith.constant 0 : index
    %52 = vector.load %arg13[%c0_22, %c0_23] : memref<8x32xf32, #tpu.memory_space<vmem>>, vector<8x8xf32>
    tpu.vector_store %arg13[%c0_22, %c0_23], %51 {strides = array<i32>} : memref<8x32xf32, #tpu.memory_space<vmem>>, vector<8x8xf32>,
    %c0_24 = arith.constant 0 : index
    %c8 = arith.constant 8 : index
    %53 = vector.load %arg12[%c0_24, %c8] : memref<8x32xf32, #tpu.memory_space<vmem>>, vector<8x8xf32>
    %54 = arith.truncf %53 : vector<8x8xf32> to vector<8x8xbf16>
    %cst_25 = arith.constant 0.353553385 : f32
    %55 = vector.broadcast %cst_25 : f32 to vector<8x8xf32>
    %56 = arith.mulf %53, %55 : vector<8x8xf32>
    %57 = arith.truncf %56 : vector<8x8xf32> to vector<8x8xbf16>
    %cst_26 = arith.constant dense<0.000000e+00> : vector<8x8xf32>
    %58 = tpu.matmul %57, %54, %cst_26 {dimension_numbers = #tpu.dot_dimension_numbers<[1], [1], [0], [0], [0, 0, 1, 0], [], []>} : vector<8x8xbf16>, vector<8x8xbf16>, vector<8x8xf32> -> vector<8x8xf32>
    %cst_27 = arith.constant dense<0xFF800000> : vector<8xf32>
    %59 = vector.multi_reduction <maximumf>, %58, %cst_27 [1] : vector<8x8xf32> to vector<8xf32>
    %60 = vector.shape_cast %59 : vector<8xf32> to vector<8x1xf32>
    %61 = vector.broadcast %60 : vector<8x1xf32> to vector<8x8xf32>
    %62 = arith.subf %58, %61 : vector<8x8xf32>
    %63 = math.exp %62 : vector<8x8xf32>
    %cst_28 = arith.constant dense<0.000000e+00> : vector<8xf32>
    %64 = vector.multi_reduction <add>, %63, %cst_28 [1] : vector<8x8xf32> to vector<8xf32>
    %65 = vector.shape_cast %64 : vector<8xf32> to vector<8x1xf32>
    %66 = tpu.reciprocal %65 {approx = true} : vector<8x1xf32> -> vector<8x1xf32>
    %67 = vector.broadcast %66 : vector<8x1xf32> to vector<8x8xf32>
    %68 = arith.mulf %63, %67 : vector<8x8xf32>
    %69 = arith.truncf %68 : vector<8x8xf32> to vector<8x8xbf16>
    %cst_29 = arith.constant dense<0.000000e+00> : vector<8x8xf32>
    %70 = tpu.matmul %69, %54, %cst_29 {dimension_numbers = #tpu.dot_dimension_numbers<[1], [0], [0], [1], [0, 0, 1, 1], [], []>} : vector<8x8xbf16>, vector<8x8xbf16>, vector<8x8xf32> -> vector<8x8xf32>
    %c0_30 = arith.constant 0 : index
    %c8_31 = arith.constant 8 : index
    %71 = vector.load %arg13[%c0_30, %c8_31] : memref<8x32xf32, #tpu.memory_space<vmem>>, vector<8x8xf32>
    tpu.vector_store %arg13[%c0_30, %c8_31], %70 {strides = array<i32>} : memref<8x32xf32, #tpu.memory_space<vmem>>, vector<8x8xf32>,
    %c0_32 = arith.constant 0 : index
    %c16 = arith.constant 16 : index
    %72 = vector.load %arg12[%c0_32, %c16] : memref<8x32xf32, #tpu.memory_space<vmem>>, vector<8x8xf32>
    %73 = arith.truncf %72 : vector<8x8xf32> to vector<8x8xbf16>
    %cst_33 = arith.constant 0.353553385 : f32
    %74 = vector.broadcast %cst_33 : f32 to vector<8x8xf32>
    %75 = arith.mulf %72, %74 : vector<8x8xf32>
    %76 = arith.truncf %75 : vector<8x8xf32> to vector<8x8xbf16>
    %cst_34 = arith.constant dense<0.000000e+00> : vector<8x8xf32>
    %77 = tpu.matmul %76, %73, %cst_34 {dimension_numbers = #tpu.dot_dimension_numbers<[1], [1], [0], [0], [0, 0, 1, 0], [], []>} : vector<8x8xbf16>, vector<8x8xbf16>, vector<8x8xf32> -> vector<8x8xf32>
    %cst_35 = arith.constant dense<0xFF800000> : vector<8xf32>
    %78 = vector.multi_reduction <maximumf>, %77, %cst_35 [1] : vector<8x8xf32> to vector<8xf32>
    %79 = vector.shape_cast %78 : vector<8xf32> to vector<8x1xf32>
    %80 = vector.broadcast %79 : vector<8x1xf32> to vector<8x8xf32>
    %81 = arith.subf %77, %80 : vector<8x8xf32>
    %82 = math.exp %81 : vector<8x8xf32>
    %cst_36 = arith.constant dense<0.000000e+00> : vector<8xf32>
    %83 = vector.multi_reduction <add>, %82, %cst_36 [1] : vector<8x8xf32> to vector<8xf32>
    %84 = vector.shape_cast %83 : vector<8xf32> to vector<8x1xf32>
    %85 = tpu.reciprocal %84 {approx = true} : vector<8x1xf32> -> vector<8x1xf32>
    %86 = vector.broadcast %85 : vector<8x1xf32> to vector<8x8xf32>
    %87 = arith.mulf %82, %86 : vector<8x8xf32>
    %88 = arith.truncf %87 : vector<8x8xf32> to vector<8x8xbf16>
    %cst_37 = arith.constant dense<0.000000e+00> : vector<8x8xf32>
    %89 = tpu.matmul %88, %73, %cst_37 {dimension_numbers = #tpu.dot_dimension_numbers<[1], [0], [0], [1], [0, 0, 1, 1], [], []>} : vector<8x8xbf16>, vector<8x8xbf16>, vector<8x8xf32> -> vector<8x8xf32>
    %c0_38 = arith.constant 0 : index
    %c16_39 = arith.constant 16 : index
    %90 = vector.load %arg13[%c0_38, %c16_39] : memref<8x32xf32, #tpu.memory_space<vmem>>, vector<8x8xf32>
    tpu.vector_store %arg13[%c0_38, %c16_39], %89 {strides = array<i32>} : memref<8x32xf32, #tpu.memory_space<vmem>>, vector<8x8xf32>,
    %c0_40 = arith.constant 0 : index
    %c24 = arith.constant 24 : index
    %91 = vector.load %arg12[%c0_40, %c24] : memref<8x32xf32, #tpu.memory_space<vmem>>, vector<8x8xf32>
    %92 = arith.truncf %91 : vector<8x8xf32> to vector<8x8xbf16>
    %cst_41 = arith.constant 0.353553385 : f32
    %93 = vector.broadcast %cst_41 : f32 to vector<8x8xf32>
    %94 = arith.mulf %91, %93 : vector<8x8xf32>
    %95 = arith.truncf %94 : vector<8x8xf32> to vector<8x8xbf16>
    %cst_42 = arith.constant dense<0.000000e+00> : vector<8x8xf32>
    %96 = tpu.matmul %95, %92, %cst_42 {dimension_numbers = #tpu.dot_dimension_numbers<[1], [1], [0], [0], [0, 0, 1, 0], [], []>} : vector<8x8xbf16>, vector<8x8xbf16>, vector<8x8xf32> -> vector<8x8xf32>
    %cst_43 = arith.constant dense<0xFF800000> : vector<8xf32>
    %97 = vector.multi_reduction <maximumf>, %96, %cst_43 [1] : vector<8x8xf32> to vector<8xf32>
    %98 = vector.shape_cast %97 : vector<8xf32> to vector<8x1xf32>
    %99 = vector.broadcast %98 : vector<8x1xf32> to vector<8x8xf32>
    %100 = arith.subf %96, %99 : vector<8x8xf32>
    %101 = math.exp %100 : vector<8x8xf32>
    %cst_44 = arith.constant dense<0.000000e+00> : vector<8xf32>
    %102 = vector.multi_reduction <add>, %101, %cst_44 [1] : vector<8x8xf32> to vector<8xf32>
    %103 = vector.shape_cast %102 : vector<8xf32> to vector<8x1xf32>
    %104 = tpu.reciprocal %103 {approx = true} : vector<8x1xf32> -> vector<8x1xf32>
    %105 = vector.broadcast %104 : vector<8x1xf32> to vector<8x8xf32>
    %106 = arith.mulf %101, %105 : vector<8x8xf32>
    %107 = arith.truncf %106 : vector<8x8xf32> to vector<8x8xbf16>
    %cst_45 = arith.constant dense<0.000000e+00> : vector<8x8xf32>
    %108 = tpu.matmul %107, %92, %cst_45 {dimension_numbers = #tpu.dot_dimension_numbers<[1], [0], [0], [1], [0, 0, 1, 1], [], []>} : vector<8x8xbf16>, vector<8x8xbf16>, vector<8x8xf32> -> vector<8x8xf32>
    %c0_46 = arith.constant 0 : index
    %c24_47 = arith.constant 24 : index
    %109 = vector.load %arg13[%c0_46, %c24_47] : memref<8x32xf32, #tpu.memory_space<vmem>>, vector<8x8xf32>
    tpu.vector_store %arg13[%c0_46, %c24_47], %108 {strides = array<i32>} : memref<8x32xf32, #tpu.memory_space<vmem>>, vector<8x8xf32>,
    %c0_48 = arith.constant 0 : index
    %c0_49 = arith.constant 0 : index
    %110 = vector.load %arg13[%c0_48, %c0_49] : memref<8x32xf32, #tpu.memory_space<vmem>>, vector<8x32xf32>
    %111 = arith.truncf %110 : vector<8x32xf32> to vector<8x32xbf16>
    %c0_50 = arith.constant 0 : index
    %c0_51 = arith.constant 0 : index
    %112 = vector.load %arg5[%c0_50, %c0_51] : memref<32x32xbf16, #tpu.memory_space<vmem>>, vector<32x32xbf16>
    %cst_52 = arith.constant dense<0.000000e+00> : vector<8x32xf32>
    %113 = tpu.matmul %111, %112, %cst_52 {dimension_numbers = #tpu.dot_dimension_numbers<[1], [0], [0], [1], [0, 0, 1, 1], [], []>} : vector<8x32xbf16>, vector<32x32xbf16>, vector<8x32xf32> -> vector<8x32xf32>
    %114 = arith.addf %113, %1 : vector<8x32xf32>
    %c0_53 = arith.constant 0 : index
    %c0_54 = arith.constant 0 : index
    %115 = vector.load %arg6[%c0_53, %c0_54] : memref<1x32xf32, #tpu.memory_space<vmem>>, vector<1x32xf32>
    %116 = vector.shape_cast %115 : vector<1x32xf32> to vector<32xf32>
    %c0_55 = arith.constant 0 : index
    %c0_56 = arith.constant 0 : index
    %117 = vector.load %arg7[%c0_55, %c0_56] : memref<1x32xf32, #tpu.memory_space<vmem>>, vector<1x32xf32>
    %118 = vector.shape_cast %117 : vector<1x32xf32> to vector<32xf32>
    %cst_57 = arith.constant dense<0.000000e+00> : vector<8xf32>
    %119 = vector.multi_reduction <add>, %114, %cst_57 [1] : vector<8x32xf32> to vector<8xf32>
    %120 = vector.shape_cast %119 : vector<8xf32> to vector<8x1xf32>
    %cst_58 = arith.constant 3.200000e+01 : f32
    %121 = vector.broadcast %cst_58 : f32 to vector<8x1xf32>
    %122 = arith.divf %120, %121 : vector<8x1xf32>
    %123 = vector.broadcast %122 : vector<8x1xf32> to vector<8x32xf32>
    %124 = arith.subf %114, %123 : vector<8x32xf32>
    %125 = arith.mulf %124, %124 : vector<8x32xf32>
    %cst_59 = arith.constant dense<0.000000e+00> : vector<8xf32>
    %126 = vector.multi_reduction <add>, %125, %cst_59 [1] : vector<8x32xf32> to vector<8xf32>
    %127 = vector.shape_cast %126 : vector<8xf32> to vector<8x1xf32>
    %cst_60 = arith.constant 3.200000e+01 : f32
    %128 = vector.broadcast %cst_60 : f32 to vector<8x1xf32>
    %129 = arith.divf %127, %128 : vector<8x1xf32>
    %130 = vector.broadcast %122 : vector<8x1xf32> to vector<8x32xf32>
    %131 = arith.subf %114, %130 : vector<8x32xf32>
    %cst_61 = arith.constant 9.99999997E-7 : f32
    %132 = vector.broadcast %cst_61 : f32 to vector<8x1xf32>
    %133 = arith.addf %129, %132 : vector<8x1xf32>
    %134 = math.rsqrt %133 : vector<8x1xf32>
    %135 = vector.broadcast %134 : vector<8x1xf32> to vector<8x32xf32>
    %136 = arith.mulf %131, %135 : vector<8x32xf32>
    %137 = vector.shape_cast %116 : vector<32xf32> to vector<1x32xf32>
    %138 = vector.broadcast %137 : vector<1x32xf32> to vector<8x32xf32>
    %139 = arith.mulf %136, %138 : vector<8x32xf32>
    %140 = vector.shape_cast %118 : vector<32xf32> to vector<1x32xf32>
    %141 = vector.broadcast %140 : vector<1x32xf32> to vector<8x32xf32>
    %142 = arith.addf %139, %141 : vector<8x32xf32>
    %143 = arith.truncf %142 : vector<8x32xf32> to vector<8x32xbf16>
    %c0_62 = arith.constant 0 : index
    %c0_63 = arith.constant 0 : index
    %144 = vector.load %arg8[%c0_62, %c0_63] : memref<32x128xbf16, #tpu.memory_space<vmem>>, vector<32x128xbf16>
    %c0_64 = arith.constant 0 : index
    %c0_65 = arith.constant 0 : index
    %145 = vector.load %arg9[%c0_64, %c0_65] : memref<128x32xbf16, #tpu.memory_space<vmem>>, vector<128x32xbf16>
    %cst_66 = arith.constant dense<0.000000e+00> : vector<8x128xf32>
    %146 = tpu.matmul %143, %144, %cst_66 {dimension_numbers = #tpu.dot_dimension_numbers<[1], [0], [0], [1], [0, 0, 1, 1], [], []>} : vector<8x32xbf16>, vector<32x128xbf16>, vector<8x128xf32> -> vector<8x128xf32>
    %cst_67 = arith.constant 1.000000e-01 : f32
    %147 = vector.broadcast %cst_67 : f32 to vector<8x128xf32>
    %148 = arith.mulf %147, %146 : vector<8x128xf32>
    %cst_68 = arith.constant 0.00999999977 : f32
    %149 = vector.broadcast %cst_68 : f32 to vector<8x128xf32>
    %150 = arith.subf %148, %149 : vector<8x128xf32>
    %cst_69 = arith.constant 0.000000e+00 : f32
    %151 = vector.broadcast %cst_69 : f32 to vector<8x128xf32>
    %152 = arith.maximumf %150, %151 : vector<8x128xf32>
    %153 = arith.truncf %152 : vector<8x128xf32> to vector<8x128xbf16>
    %cst_70 = arith.constant dense<0.000000e+00> : vector<8x32xf32>
    %154 = tpu.matmul %153, %145, %cst_70 {dimension_numbers = #tpu.dot_dimension_numbers<[1], [0], [0], [1], [0, 0, 1, 1], [], []>} : vector<8x128xbf16>, vector<128x32xbf16>, vector<8x32xf32> -> vector<8x32xf32>
    %155 = arith.subf %154, %142 : vector<8x32xf32>
    %156 = arith.truncf %155 : vector<8x32xf32> to vector<8x32xbf16>
    %cst_71 = arith.constant dense<0.000000e+00> : vector<8x128xf32>
    %157 = tpu.matmul %156, %144, %cst_71 {dimension_numbers = #tpu.dot_dimension_numbers<[1], [0], [0], [1], [0, 0, 1, 1], [], []>} : vector<8x32xbf16>, vector<32x128xbf16>, vector<8x128xf32> -> vector<8x128xf32>
    %cst_72 = arith.constant 1.000000e-01 : f32
    %158 = vector.broadcast %cst_72 : f32 to vector<8x128xf32>
    %159 = arith.mulf %158, %157 : vector<8x128xf32>
    %160 = arith.subf %152, %159 : vector<8x128xf32>
    %cst_73 = arith.constant 0.00999999977 : f32
    %161 = vector.broadcast %cst_73 : f32 to vector<8x128xf32>
    %162 = arith.subf %160, %161 : vector<8x128xf32>
    %cst_74 = arith.constant 0.000000e+00 : f32
    %163 = vector.broadcast %cst_74 : f32 to vector<8x128xf32>
    %164 = arith.maximumf %162, %163 : vector<8x128xf32>
    %165 = arith.truncf %164 : vector<8x128xf32> to vector<8x128xbf16>
    %c0_75 = arith.constant 0 : index
    %c0_76 = arith.constant 0 : index
    %166 = vector.load %arg10[%c0_75, %c0_76] : memref<128x32xbf16, #tpu.memory_space<vmem>>, vector<128x32xbf16>
    %cst_77 = arith.constant dense<0.000000e+00> : vector<8x32xf32>
    %167 = tpu.matmul %165, %166, %cst_77 {dimension_numbers = #tpu.dot_dimension_numbers<[1], [0], [0], [1], [0, 0, 1, 1], [], []>} : vector<8x128xbf16>, vector<128x32xbf16>, vector<8x32xf32> -> vector<8x32xf32>
    %168 = arith.addf %167, %114 : vector<8x32xf32>
    %c0_78 = arith.constant 0 : index
    %c0_79 = arith.constant 0 : index
    %c0_80 = arith.constant 0 : index
    %169 = vector.load %arg11[%c0_78, %c0_79, %c0_80] : memref<1x8x32xf32, #tpu.memory_space<vmem>>, vector<1x8x32xf32>
    %170 = vector.shape_cast %169 : vector<1x8x32xf32> to vector<8x32xf32>
    %171 = vector.shape_cast %168 : vector<8x32xf32> to vector<1x8x32xf32>
    tpu.vector_store %arg11[%c0_78, %c0_79, %c0_80], %171 {strides = array<i32>} : memref<1x8x32xf32, #tpu.memory_space<vmem>>, vector<1x8x32xf32>,
    return
  }
  func.func @transform_0(%arg0: i32) -> (i32, i32, i32) {
    %c0_i32 = arith.constant 0 : i32
    %c0_i32_0 = arith.constant 0 : i32
    %c0_i32_1 = arith.constant 0 : i32
    return %arg0, %c0_i32, %c0_i32_0 : i32, i32, i32
  }
  func.func @transform_1(%arg0: i32) -> (i32, i32) {
    %c0_i32 = arith.constant 0 : i32
    %c0_i32_0 = arith.constant 0 : i32
    %c0_i32_1 = arith.constant 0 : i32
    return %c0_i32, %c0_i32_0 : i32, i32
  }
  func.func @transform_2(%arg0: i32) -> (i32, i32) {
    %c0_i32 = arith.constant 0 : i32
    %c0_i32_0 = arith.constant 0 : i32
    %c0_i32_1 = arith.constant 0 : i32
    return %c0_i32, %c0_i32_0 : i32, i32
  }
  func.func @transform_3(%arg0: i32) -> (i32, i32) {
    %c0_i32 = arith.constant 0 : i32
    %c0_i32_0 = arith.constant 0 : i32
    %c0_i32_1 = arith.constant 0 : i32
    return %c0_i32, %c0_i32_0 : i32, i32
  }
  func.func @transform_4(%arg0: i32) -> (i32, i32) {
    %c0_i32 = arith.constant 0 : i32
    %c0_i32_0 = arith.constant 0 : i32
    %c0_i32_1 = arith.constant 0 : i32
    return %c0_i32, %c0_i32_0 : i32, i32
  }
  func.func @transform_5(%arg0: i32) -> (i32, i32) {
    %c0_i32 = arith.constant 0 : i32
    %c0_i32_0 = arith.constant 0 : i32
    %c0_i32_1 = arith.constant 0 : i32
    return %c0_i32, %c0_i32_0 : i32, i32
  }
  func.func @transform_6(%arg0: i32) -> (i32, i32) {
    %c0_i32 = arith.constant 0 : i32
    %c0_i32_0 = arith.constant 0 : i32
    %c0_i32_1 = arith.constant 0 : i32
    return %c0_i32, %c0_i32_0 : i32, i32
  }
  func.func @transform_7(%arg0: i32) -> (i32, i32) {
    %c0_i32 = arith.constant 0 : i32
    %c0_i32_0 = arith.constant 0 : i32
    %c0_i32_1 = arith.constant 0 : i32
    return %c0_i32, %c0_i32_0 : i32, i32
  }
  func.func @transform_8(%arg0: i32) -> (i32, i32) {
    %c0_i32 = arith.constant 0 : i32
    %c0_i32_0 = arith.constant 0 : i32
    %c0_i32_1 = arith.constant 0 : i32
    return %c0_i32, %c0_i32_0 : i32, i32
  }
  func.func @transform_9(%arg0: i32) -> (i32, i32) {
    %c0_i32 = arith.constant 0 : i32
    %c0_i32_0 = arith.constant 0 : i32
    %c0_i32_1 = arith.constant 0 : i32
    return %c0_i32, %c0_i32_0 : i32, i32
  }
  func.func @transform_10(%arg0: i32) -> (i32, i32, i32) {
    %c0_i32 = arith.constant 0 : i32
    %c0_i32_0 = arith.constant 0 : i32
    %c0_i32_1 = arith.constant 0 : i32
    return %arg0, %c0_i32, %c0_i32_0 : i32, i32, i32
  }
}

</mosaic_0001>

<bundles_post_ra>
// kernel: transformer_forward.3
= control target key start
LH: loop header
LB: loop body
LE: loop exit
PB: predicated region body
PF: predicated region fallthrough
CT: control target
= control target key end

     0   :  { %15 = vsyncpa [#allocation5], 0  ;;  %s2258_s0 = inlined_call_operand.hbm [shape: f32[2,8,32], index: 0, kind: input, shape index: {}, may-alias: {0,10}]   ;;  %s2259_s1 = inlined_call_operand.vmem [shape: f32[1,32], index: 1, kind: input, shape index: {}]   ;;  %s2260_s2 = inlined_call_operand.vmem [shape: f32[1,32], index: 2, kind: input, shape index: {}]   ;;  %s2261_s3 = inlined_call_operand.vmem [shape: bf16[32,32], index: 3, kind: input, shape index: {}]   ;;  %s2262_s4 = inlined_call_operand.vmem [shape: bf16[32,32], index: 4, kind: input, shape index: {}]   ;;  %s2263_s5 = inlined_call_operand.vmem [shape: f32[1,32], index: 5, kind: input, shape index: {}]   ;;  %s2264_s6 = inlined_call_operand.vmem [shape: f32[1,32], index: 6, kind: input, shape index: {}]   ;;  %s2265_s7 = inlined_call_operand.vmem [shape: bf16[32,128], index: 7, kind: input, shape index: {}]   ;;  %s2266_s8 = inlined_call_operand.vmem [shape: bf16[128,32], index: 8, kind: input, shape index: {}]   ;;  %s2267_s9 = inlined_call_operand.vmem [shape: bf16[128,32], index: 9, kind: input, shape index: {}]   ;;  %s2268_s10 = inlined_call_operand.hbm [shape: f32[2,8,32], index: 10, kind: output, shape index: {}, may-alias: {0,10}]  }
   0x1   :  { %17 = vsyncpa [#allocation5 + $0x1], 0 }
   0x2   :  { %18 = vsyncpa [#allocation6], 0 }
   0x3   :  { %20 = vsyncpa [#allocation6 + $0x1], 0  ;;  %s1906_s13 = smov 0   ;;  %s1908_s14 = smov 0  }
   0x4   :  { %s1910_s15 = smov 0   ;;  %s1912_s16 = smov 0  }
   0x5 LB: > { %2274 = sst [smem:[#allocation10_spill]] %s1835_s15  ;;  %s1927_s17 = sadd.s32 4294967295, %s1839_s16   ;;  %s1839_s16 = sphi %s1912_s16, %s2288_s16   ;;  %s1835_s15 = sphi %s1910_s15, %s2290_s15   ;;  %s1831_s14 = sphi %s1908_s14, %s2292_s14   ;;  %s1827_s13 = sphi %s1906_s13, %s2291_s13  }
   0x6   : > { %s1433_s18 = sadd.s32 4294967294, %s1839_s16   ;;  %s1931_s19 = sadd.s32 1, %s1839_s16  }
   0x7   : > { %2275 = sst [smem:[#allocation11_spill]] %s1931_s19  ;;  %s33_s20 = sadd.s32 1, %s1835_s15 }
   0x8   : > { %s30_s21 = ssub.s32 %s1839_s16, %s1931_s19  ;;  %p40_p0 = scmp.ne.s32.totalorder %s1835_s15, %s1831_s14 }
   0x9   : > { %p31_p1 = scmp.eq.s32.totalorder %s30_s21, 0  ;;  %p41_p2 = scmp.eq.s32.totalorder %s1839_s16, 0 }
   0xa   : > { %p46_p3 = scmp.ne.s32.totalorder %s1831_s14, %s1827_s13  ;;  %p47_p4 = scmp.eq.s32.totalorder %s1927_s17, 0 }
   0xb   : > { %s1943_s22 = scalar_select %p31_p1, %s1835_s15, %s33_s20  }
   0xc   : > { %p1945_p5 = por %p41_p2, %p40_p0  ;;  %p1949_p6 = por %p47_p4, %p46_p3 }
   0xd   : > { %2276 = sst [smem:[#allocation12_spill]] %s1943_s22  ;;  %p259_p7 = scmp.eq.s32.totalorder %s1927_s17, 1 }
   0xe   : > { %s2278_s24 = scalar_select %p1949_p6, 1, 0 }
   0xf   : > { %p265_p8 = scmp.eq.s32.totalorder %s1433_s18, 1  ;;  %p1663_p10 = scmp.lt.s32.totalorder %s1839_s16, 2 }
  0x10   : > { %p1956_p11 = por %p259_p7, %p40_p0  ;;  %s312_s27 = sand.u32 1, %s1835_s15  }
  0x11   : > { %p1960_p12 = por %p265_p8, %p46_p3  ;;  %s1437_s28 = sshll.u32 %s1839_s16, 7 }
  0x12   : > { %s2279_s25 = scalar_select %p1956_p11, 1, 0 }
  0x13   : > { %s2280_s26 = scalar_select %p1960_p12, 1, 0 }
  0x14   : > { %s1436_s29 = sshll.u32 %s312_s27, 3  ;;  %s1969_s12 = scalar_lea.hbm %s2258_s0, %s1437_s28 }
  0x15   : > { %s316_s18 = scalar_lea.vmem [#allocation4], %s1436_s29  ;;  %p1973_p13 = pnand %p1663_p10, %p1945_p5 }
  0x16   : > { %s323_s20 = sshll.u32 %s316_s18, 4  ;;  %s313_s22 = scalar_lea.sflag [#allocation5], %s312_s27  ;;  %s1977_s20 = int_to_ptr.vmem [resolvable:$true] %s323_s20 }
  0x17   : > { %s1747_s15 = scalar_lea.hbm %s1969_s12, 128  ;;  %p1749_p3 = pneg %p1973_p13 }
  0x18   : > { %p1748_p2 = scmp.ne.s32.totalorder %s1969_s12, %s1747_s15  ;;  %s1752_s23 = scalar_lea.hbm %s2258_s0, 256 }
  0x19   : > { %p1753_p5 = scmp.lt.s32.totalorder %s1969_s12, %s2258_s0  ;;  %p1754_p8 = scmp.lt.s32.totalorder %s1752_s23, %s1747_s15 }
  0x1a   : > { %p1750_p4 = pnand %p1749_p3, %p1748_p2 }
  0x1b   : > { %p1755_p10 = por %p1754_p8, %p1753_p5 }
  0x1c   : > { %p1751_p7 = pneg %p1750_p4 }
  0x1e   : > { %p1756_p9 = pnand %p1755_p10, %p1751_p7 }
  0x20   : > { %1759 = shalt.err (!%p1756_p9)
}
  0x21   : > { %s1760_s27 = scalar_lea.vmem %s1977_s20, 128  ;;  %s1841_s18 = smov [#allocation4]  }
  0x22   : > { %p1761_p0 = scmp.ne.s32.totalorder %s1977_s20, %s1760_s27  ;;  %s1765_s19 = sshll.u32 %s1841_s18, 4  ;;  %s1766_s19 = int_to_ptr.vmem [resolvable:$false] %s1765_s19 }
  0x23   : > { %s1767_s28 = scalar_lea.vmem %s1766_s19, 256  ;;  %p1768_p4 = scmp.lt.s32.totalorder %s1977_s20, %s1766_s19 }
  0x24   : > { %p1763_p1 = pnand %p1761_p0, %p1749_p3  ;;  %p1769_p12 = scmp.lt.s32.totalorder %s1767_s28, %s1760_s27 }
  0x26   : > { %p1764_p2 = pneg %p1763_p1  ;;  %p1770_p11 = por %p1769_p12, %p1768_p4 }
  0x28   : > { %p1771_p6 = pnand %p1770_p11, %p1764_p2 }
  0x2a   : > { %1774 = shalt.err (!%p1771_p6)
}
  0x2b   : > { %1658 = dma.hbm_to_vmem [thread:$0]  (!%p1973_p13), %s1969_s12, 128, %s1977_s20, %s313_s22  }
  0x2c   : > { %p2282_p9 = scmp.lt.s32.totalorder %s1839_s16, 3  ;;  %p2283_p7 = scmp.ge.s32.totalorder %s1839_s16, 1 }
  0x2e   : > { %p329_p0 = pnand %p2283_p7, %p2282_p9 }
  0x2f   : > { %s2004_s15 = sand.u32 (!%p329_p0), 1, %s1831_s14   ;;  %p2284_p6 = scmp.ne.s32.totalorder (!%p329_p0), %s2278_s24, 0 }
  0x30   : > { %332 = sbr.rel (%p329_p0) target bundleno = 2847 (0xb1f), region = 60  ;;  %s1439_s19 = sshll.u32 (!%p329_p0), %s2004_s15, 3 }
  0x31   : > { %s335_s29 = scalar_lea.sflag (!%p329_p0), [#allocation5], %s2004_s15  ;;  %s338_s21 = scalar_lea.vmem (!%p329_p0), [#allocation4], %s1439_s19 }
  0x35   : > { %1818 = dma.done.wait (%p2284_p6), %s335_s29, 128  }
  0x36   : > { %1820 = vsyncadd (%p2284_p6), %s335_s29, 4294967168  ;;  %vm379_vm0 = vcmask 261120   ;;  %v2014_v0 = vld [vmem:[%s338_s21] sm:$0xff]  ;;  %v1705_v7 = vld [vmem:[%s2261_s3 + $0x8] sm:$0xff]   ;;  %v1842_v8 = vmov 0.0   ;;  %vm1843_vm1 = vmmov 0  }
  0x37   : > { %v380_v1 = vsel %vm379_vm0, %v2014_v0, 0.0  ;;  %1531 = vmatprep.subr.bf16.mxu1 %v1842_v8  ;;  %1535 = vmatprep.mubr.msk.bf16.mxu1 %vm1843_vm1, %v1842_v8  ;;  %v1706_v9 = vld [vmem:[%s2261_s3] sm:$0xff]   ;;  %vm473_vm2 = vcmask 64512   ;;  %vm535_vm3 = vcmask 1043456   ;;  %s1844_s18 = smov 112   ;;  %s1845_s28 = smov 120  }
  0x38   : > { %381 = vadd.xlane.f32.xlu0 %v380_v1  ;;  %1532 = vmatpush3.bf16.msra.mxu1 %v1705_v7  ;;  %v1441_v14 = vld [vmem:[%s2259_s1] ss:$0 sm:$0xff]  ;;  %s1846_s29 = smov 104   ;;  %s1847_s21 = smov 8   ;;  %vm696_vm4 = vcmask 130112   ;;  %vm815_vm5 = vcmask 195712  }
  0x39   : > { %1545 = vmatprep.subr.bf16.mxu0 %v1842_v8  ;;  %1533 = vmatprep.subr.bf16.mxu1 %v1842_v8  ;;  %v1442_v16 = vld [vmem:[%s2260_s2] ss:$0 sm:$0xff]  ;;  %s1848_s23 = smov 16   ;;  %s1849_s30 = smov 24   ;;  %vm934_vm6 = vcmask 261312  }
  0x3a   : > { %1547 = vmatprep.mubr.msk.bf16.mxu0 %vm1843_vm1, %v1842_v8  ;;  %p2285_p12 = scmp.ne.s32.totalorder %s2279_s25, 0 }
  0x3c   : > { %1534 = vmatpush3.bf16.msra.mxu1 %v1706_v9 }
  0x3d   : > { %1539 = vmatprep.subr.bf16.mxu1 %v1842_v8 }
  0xc1   : > { %v382_v2 = vpop.xlane.xlu0 %381 }
  0xc2   : > { %v384_v3 = vmul.f32 0.03125, %v382_v2 }
  0xc4   : > { %v385_v4 = vsub.f32 %v2014_v0, %v384_v3 }
  0xc6   : > { %v386_v5 = vmul.f32 %v385_v4, %v385_v4 }
  0xc8   : > { %v387_v6 = vsel %vm379_vm0, %v386_v5, 0.0 }
  0xc9   : > { %388 = vadd.xlane.f32.xlu0 %v387_v6 }
 0x152   : > { %v389_v10 = vpop.xlane.xlu0 %388 }
 0x153   : > { %v390_v11 = vmul.f32 0.03125, %v389_v10 }
 0x155   : > { %v391_v12 = vadd.f32 1e-06, %v390_v11 }
 0x157   : > { %1727 = vrsqrt.f32 %v391_v12 }
 0x164   : > { %v1728_v13 = vpop.eup %1727 }
 0x165   : > { %v393_v15 = vmul.f32 %v1728_v13, %v385_v4 }
 0x167   : > { %v400_v17 = vmul.f32 %v1441_v14, %v393_v15 }
 0x169   : > { %v407_v18 = vadd.f32 %v1442_v16, %v400_v17 }
 0x16b   : > { %v408_v19 = vpack.c.bf16 %v407_v18, %v407_v18 }
 0x16d   : > { %1536 = vmatmul.mubr.msk.bf16.vlgmr.msra.gmra.mxu1 %vm379_vm0, %v408_v19 }
 0x16e   : > { %1541 = vmatprep.mubr.msk.bf16.mxu1 %vm1843_vm1, %v1842_v8 }
 0x22d   : > { %v462_v20 = vpop.f32.mrf.mxu1 }
 0x22e   : > { %468 = vst.msk [vmem:[#allocation2] sm:$0xff] %vm379_vm0, %v462_v20 }
 0x22f   : > { %v1537_v21 = vpop.f32.mrf.mxu1 }
 0x231   : > { %v465_v22 = vpop.f32.mrf.mxu1 }
 0x233   : > { %v1538_v23 = vpop.f32.mrf.mxu1 }
 0x235   : > { %v698_v24 = vld [vmem:[#allocation2] sm:$0xff] }
 0x236   : > { %v699_v25 = vpack.c.bf16 %v698_v24, %v698_v24  ;;  %v581_v26 = vmul.f32 0.35355338, %v698_v24 }
 0x238   : > { %706 = vrot.lane.b32.xlu0 %v699_v25, %s1844_s18  ;;  %587 = vrot.lane.b32.xlu1 %v699_v25, %s1845_s28  ;;  %v478_v27 = vsel %vm473_vm2, %v699_v25, 0  ;;  %v536_v28 = vsel %vm535_vm3, %v699_v25, 0  ;;  %v582_v29 = vpack.c.bf16 %v581_v26, %v581_v26 }
 0x239   : > { %1540 = vmatpush3.bf16.xpose.msra.mxu1 %v478_v27  ;;  %1546 = vmatpush3.bf16.msra.mxu0 %v536_v28 }
 0x23a   : > { %1551 = vmatprep.subr.bf16.mxu1 %v1842_v8  ;;  %1557 = vmatprep.subr.bf16.mxu0 %v1842_v8 }
 0x23c   : > { %584 = vrot.lane.b32.xlu1 %v582_v29, %s1845_s28 }
 0x240   : > { %703 = vrot.lane.b32.xlu1 %v582_v29, %s1844_s18  ;;  %1542 = vmatmul.mubr.msk.bf16.vlgmr.msra.gmra.mxu1 %vm473_vm2, %v582_v29 }
 0x241   : > { %1553 = vmatprep.mubr.msk.bf16.mxu1 %vm1843_vm1, %v1842_v8 }
 0x244   : > { %825 = vrot.lane.b32.xlu1 %v699_v25, %s1846_s29 }
 0x248   : > { %822 = vrot.lane.b32.xlu1 %v582_v29, %s1846_s29  ;;  %s1482_s29 = sshll.u32 %s1927_s17, 7  ;;  %s1350_s17 = scalar_lea.sflag [#allocation6], %s2004_s15 }
 0x249   : > { %s2214_s20 = scalar_lea.hbm %s2268_s10, %s1482_s29 }
 0x2aa   : > { %v2051_v30 = vpop.permute.xlu1 %587  ;;  %v2056_v33 = vpop.permute.xlu0 %706 }
 0x2ab   : > { %v593_v31 = vsel %vm473_vm2, %v2051_v30, 0  ;;  %v712_v35 = vsel %vm473_vm2, %v2056_v33, 0  ;;  %v650_v21 = vsel %vm535_vm3, %v2051_v30, 0  ;;  %v769_v28 = vsel %vm535_vm3, %v2056_v33, 0 }
 0x2ac   : > { %1552 = vmatpush3.bf16.xpose.msra.mxu1 %v593_v31 }
 0x2ad   : > { %1563 = vmatprep.subr.bf16.mxu1 %v1842_v8 }
 0x2ae   : > { %v585_v32 = vpop.permute.xlu1 %584 }
 0x2b2   : > { %v704_v34 = vpop.permute.xlu1 %703 }
 0x2b3   : > { %1554 = vmatmul.mubr.msk.bf16.vlgmr.msra.gmra.mxu1 %vm473_vm2, %v585_v32 }
 0x2b4   : > { %1564 = vmatpush3.bf16.xpose.msra.mxu1 %v712_v35  ;;  %1565 = vmatprep.mubr.msk.bf16.mxu1 %vm1843_vm1, %v1842_v8 }
 0x2b5   : > { %1575 = vmatprep.subr.bf16.mxu1 %v1842_v8 }
 0x2b6   : > { %v2064_v36 = vpop.permute.xlu1 %825 }
 0x2b7   : > { %v831_v37 = vsel %vm473_vm2, %v2064_v36, 0  ;;  %v888_v32 = vsel %vm535_vm3, %v2064_v36, 0 }
 0x2ba   : > { %v823_v38 = vpop.permute.xlu1 %822 }
 0x2bb   : > { %1566 = vmatmul.mubr.msk.bf16.vlgmr.msra.gmra.mxu1 %vm473_vm2, %v704_v34 }
 0x2bc   : > { %1576 = vmatpush3.bf16.xpose.msra.mxu1 %v831_v37  ;;  %1577 = vmatprep.mubr.msk.bf16.mxu1 %vm1843_vm1, %v1842_v8 }
 0x2bd   : > { %1587 = vmatprep.subr.bf16.mxu1 %v1842_v8 }
 0x2c3   : > { %1578 = vmatmul.mubr.msk.bf16.vlgmr.msra.gmra.mxu1 %vm473_vm2, %v823_v38 }
 0x2c4   : > { %1591 = vmatprep.mubr.msk.bf16.mxu1 %vm1843_vm1, %v1842_v8 }
 0x300   : > { %v514_v39 = vpop.f32.mrf.mxu1 }
 0x301   : > { %v520_v40 = vsel %vm473_vm2, %v514_v39, -inf }
 0x302   : > { %521 = vmax.xlane.f32.xlu1 %v520_v40  ;;  %v1543_v41 = vpop.f32.mrf.mxu1 }
 0x304   : > { %v517_v42 = vpop.f32.mrf.mxu1 }
 0x306   : > { %v1544_v43 = vpop.f32.mrf.mxu1 }
 0x307   : > { %v1707_v43 = vld [vmem:[%s2262_s4 + $0x8] sm:$0xff]  }
 0x308   : > { %1588 = vmatpush3.bf16.msra.mxu1 %v1707_v43  ;;  %v1721_v43 = vld [vmem:[%s2267_s9 + $0x28] sm:$0xff]  }
 0x309   : > { %1589 = vmatprep.subr.bf16.mxu1 %v1842_v8 }
 0x373   : > { %v629_v44 = vpop.f32.mrf.mxu1 }
 0x374   : > { %v635_v45 = vsel %vm473_vm2, %v629_v44, -inf }
 0x375   : > { %636 = vmax.xlane.f32.xlu0 %v635_v45  ;;  %v1555_v46 = vpop.f32.mrf.mxu1  ;;  %v1708_v45 = vld [vmem:[%s2262_s4] sm:$0xff]  }
 0x376   : > { %1590 = vmatpush3.bf16.msra.mxu1 %v1708_v45  ;;  %v1723_v45 = vld [vmem:[%s2267_s9 + $0x18] sm:$0xff]  }
 0x377   : > { %v632_v47 = vpop.f32.mrf.mxu1  ;;  %1603 = vmatprep.subr.bf16.mxu1 %v1842_v8 }
 0x379   : > { %v1556_v48 = vpop.f32.mrf.mxu1 }
 0x37b   : > { %v748_v49 = vpop.f32.mrf.mxu1 }
 0x37c   : > { %v754_v50 = vsel %vm473_vm2, %v748_v49, -inf }
 0x37d   : > { %755 = vmax.xlane.f32.xlu1 %v754_v50  ;;  %v1567_v51 = vpop.f32.mrf.mxu1 }
 0x37f   : > { %v751_v52 = vpop.f32.mrf.mxu1 }
 0x381   : > { %v1568_v53 = vpop.f32.mrf.mxu1 }
 0x383   : > { %v867_v54 = vpop.f32.mrf.mxu1 }
 0x384   : > { %v873_v55 = vsel %vm473_vm2, %v867_v54, -inf }
 0x385   : > { %874 = vmax.xlane.f32.xlu1 %v873_v55  ;;  %v1579_v56 = vpop.f32.mrf.mxu1 }
 0x387   : > { %v870_v57 = vpop.f32.mrf.mxu1 }
 0x389   : > { %v1580_v58 = vpop.f32.mrf.mxu1 }
 0x38b   : > { %v522_v59 = vpop.xlane.xlu1 %521 }
 0x38c   : > { %v523_v60 = vsub.f32 %v514_v39, %v522_v59 }
 0x38e   : > { %v524_v61 = vmul.f32 1.442695, %v523_v60 }
 0x390   : > { %1729 = vpow2.f32 %v524_v61 }
 0x39d   : > { %v1730_v62 = vpop.eup %1729 }
 0x39e   : > { %v526_v63 = vsel %vm473_vm2, %v1730_v62, 0.0 }
 0x39f   : > { %527 = vadd.xlane.f32.xlu0 %v526_v63 }
 0x3fe   : > { %v637_v1 = vpop.xlane.xlu0 %636 }
 0x3ff   : > { %v638_v2 = vsub.f32 %v629_v44, %v637_v1 }
 0x401   : > { %v639_v3 = vmul.f32 1.442695, %v638_v2 }
 0x403   : > { %1731 = vpow2.f32 %v639_v3 }
 0x406   : > { %v756_v4 = vpop.xlane.xlu1 %755 }
 0x407   : > { %v757_v5 = vsub.f32 %v748_v49, %v756_v4 }
 0x409   : > { %v758_v6 = vmul.f32 1.442695, %v757_v5 }
 0x40b   : > { %1733 = vpow2.f32 %v758_v6 }
 0x40e   : > { %v875_v7 = vpop.xlane.xlu1 %874 }
 0x40f   : > { %v876_v9 = vsub.f32 %v867_v54, %v875_v7  ;;  %v1710_v7 = vld [vmem:[%s2265_s7] sm:$0xff]  }
 0x410   : > { %v1732_v10 = vpop.eup %1731 }
 0x411   : > { %v877_v11 = vmul.f32 1.442695, %v876_v9  ;;  %v641_v12 = vsel %vm473_vm2, %v1732_v10, 0.0  ;;  %v1711_v9 = vld [vmem:[%s2266_s8 + $0x38] sm:$0xff]  }
 0x412   : > { %642 = vadd.xlane.f32.xlu1 %v641_v12  ;;  %v1714_v12 = vld [vmem:[%s2266_s8 + $0x20] sm:$0xff]  }
 0x413   : > { %1735 = vpow2.f32 %v877_v11  ;;  %v1713_v11 = vld [vmem:[%s2266_s8 + $0x28] sm:$0xff]  }
 0x418   : > { %v1734_v13 = vpop.eup %1733 }
 0x419   : > { %v760_v14 = vsel %vm473_vm2, %v1734_v13, 0.0 }
 0x41a   : > { %761 = vadd.xlane.f32.xlu0 %v760_v14  ;;  %v1716_v14 = vld [vmem:[%s2266_s8 + $0x10] sm:$0xff]  }
 0x420   : > { %v1736_v15 = vpop.eup %1735 }
 0x421   : > { %v879_v16 = vsel %vm473_vm2, %v1736_v15, 0.0 }
 0x422   : > { %880 = vadd.xlane.f32.xlu1 %v879_v16 }
 0x428   : > { %v528_v17 = vpop.xlane.xlu0 %527 }
 0x429   : > { %1737 = vrcp.f32 %v528_v17 }
 0x436   : > { %v1738_v18 = vpop.eup %1737 }
 0x437   : > { %v530_v19 = vmul.f32 %v1738_v18, %v1730_v62 }
 0x439   : > { %v531_v20 = vpack.c.bf16 %v530_v19, %v530_v19  ;;  %v1457_v19 = vld [vmem:[%s2263_s5] ss:$0 sm:$0xff] }
 0x43b   : > { %1548 = vmatmul.mubr.msk.bf16.vlgmr.msra.gmra.mxu0 %vm473_vm2, %v531_v20 }
 0x43c   : > { %1558 = vmatpush3.bf16.msra.mxu0 %v650_v21  ;;  %1559 = vmatprep.mubr.msk.bf16.mxu0 %vm1843_vm1, %v1842_v8  ;;  %v1458_v21 = vld [vmem:[%s2264_s6] ss:$0 sm:$0xff] }
 0x43d   : > { %1569 = vmatprep.subr.bf16.mxu0 %v1842_v8 }
 0x49b   : > { %v643_v22 = vpop.xlane.xlu1 %642 }
 0x49c   : > { %1739 = vrcp.f32 %v643_v22 }
 0x4a3   : > { %v762_v23 = vpop.xlane.xlu0 %761 }
 0x4a4   : > { %1741 = vrcp.f32 %v762_v23 }
 0x4a9   : > { %v1740_v24 = vpop.eup %1739 }
 0x4aa   : > { %v645_v25 = vmul.f32 %v1740_v24, %v1732_v10  ;;  %v1712_v10 = vld [vmem:[%s2266_s8 + $0x30] sm:$0xff]  }
 0x4ab   : > { %v881_v26 = vpop.xlane.xlu1 %880 }
 0x4ac   : > { %1743 = vrcp.f32 %v881_v26  ;;  %v646_v27 = vpack.c.bf16 %v645_v25, %v645_v25  ;;  %v1717_v25 = vld [vmem:[%s2266_s8 + $0x8] sm:$0xff]   ;;  %v1718_v26 = vld [vmem:[%s2266_s8] sm:$0xff]  }
 0x4ae   : > { %1560 = vmatmul.mubr.msk.bf16.vlgmr.msra.gmra.mxu0 %vm473_vm2, %v646_v27 }
 0x4af   : > { %1570 = vmatpush3.bf16.msra.mxu0 %v769_v28  ;;  %1571 = vmatprep.mubr.msk.bf16.mxu0 %vm1843_vm1, %v1842_v8 }
 0x4b0   : > { %1581 = vmatprep.subr.bf16.mxu0 %v1842_v8 }
 0x4b1   : > { %v1742_v29 = vpop.eup %1741 }
 0x4b2   : > { %v764_v30 = vmul.f32 %v1742_v29, %v1734_v13  ;;  %v1715_v13 = vld [vmem:[%s2266_s8 + $0x18] sm:$0xff]  }
 0x4b4   : > { %v765_v31 = vpack.c.bf16 %v764_v30, %v764_v30 }
 0x4b6   : > { %1572 = vmatmul.mubr.msk.bf16.vlgmr.msra.gmra.mxu0 %vm473_vm2, %v765_v31 }
 0x4b7   : > { %1582 = vmatpush3.bf16.msra.mxu0 %v888_v32  ;;  %1583 = vmatprep.mubr.msk.bf16.mxu0 %vm1843_vm1, %v1842_v8 }
 0x4b8   : > { %1595 = vmatprep.subr.bf16.mxu0 %v1842_v8 }
 0x4b9   : > { %v1744_v33 = vpop.eup %1743 }
 0x4ba   : > { %v883_v34 = vmul.f32 %v1744_v33, %v1736_v15 }
 0x4bc   : > { %v884_v35 = vpack.c.bf16 %v883_v34, %v883_v34 }
 0x4be   : > { %1584 = vmatmul.mubr.msk.bf16.vlgmr.msra.gmra.mxu0 %vm473_vm2, %v884_v35 }
 0x4bf   : > { %1599 = vmatprep.mubr.msk.bf16.mxu0 %vm1843_vm1, %v1842_v8 }
 0x4fb   : > { %v572_v37 = vpop.f32.mrf.mxu0 }
 0x4fc   : > { %578 = vst.msk [vmem:[#allocation3] sm:$0xff] %vm473_vm2, %v572_v37 }
 0x4fd   : > { %v1549_v36 = vpop.f32.mrf.mxu0 }
 0x4ff   : > { %v575_v38 = vpop.f32.mrf.mxu0 }
 0x500   : > { %v1719_v38 = vld [vmem:[%s2267_s9 + $0x38] sm:$0xff]  }
 0x501   : > { %v1550_v39 = vpop.f32.mrf.mxu0 }
 0x56e   : > { %v686_v40 = vpop.f32.mrf.mxu0 }
 0x56f   : > { %693 = vrot.lane.b32.xlu0 %v686_v40, %s1847_s21  ;;  %s374_s21 = scalar_lea.vmem [#allocation7], %s1439_s19 }
 0x570   : > { %v1561_v41 = vpop.f32.mrf.mxu0  ;;  %s1363_s22 = sshll.u32 %s374_s21, 4  ;;  %s2216_s22 = int_to_ptr.vmem [resolvable:$true] %s1363_s22 }
 0x571   : > { %s1775_s19 = scalar_lea.vmem %s2216_s22, 128 }
 0x572   : > { %v689_v42 = vpop.f32.mrf.mxu0  ;;  %p1776_p11 = scmp.ne.s32.totalorder %s2216_s22, %s1775_s19 }
 0x573   : > { %v1720_v42 = vld [vmem:[%s2267_s9 + $0x30] sm:$0xff]  }
 0x574   : > { %v1562_v44 = vpop.f32.mrf.mxu0  ;;  %p1777_p13 = pnand %p1776_p11, %p2285_p12 }
 0x575   : > { %v1722_v44 = vld [vmem:[%s2267_s9 + $0x20] sm:$0xff]  }
 0x576   : > { %v805_v46 = vpop.f32.mrf.mxu0  ;;  %p1778_p1 = pneg %p1777_p13 }
 0x577   : > { %812 = vrot.lane.b32.xlu1 %v805_v46, %s1848_s23  ;;  %v1724_v46 = vld [vmem:[%s2267_s9 + $0x10] sm:$0xff]   ;;  %s1850_s23 = smov [#allocation7]  }
 0x578   : > { %v1573_v47 = vpop.f32.mrf.mxu0 }
 0x579   : > { %v1725_v47 = vld [vmem:[%s2267_s9 + $0x8] sm:$0xff]  }
 0x57a   : > { %v808_v48 = vpop.f32.mrf.mxu0 }
 0x57b   : > { %v1726_v48 = vld [vmem:[%s2267_s9] sm:$0xff]  }
 0x57c   : > { %v1574_v49 = vpop.f32.mrf.mxu0 }
 0x57e   : > { %v924_v50 = vpop.f32.mrf.mxu0 }
 0x57f   : > { %931 = vrot.lane.b32.xlu1 %v924_v50, %s1849_s30  ;;  %s1779_s30 = sshll.u32 %s1850_s23, 4  ;;  %s1780_s30 = int_to_ptr.vmem [resolvable:$false] %s1779_s30 }
 0x580   : > { %v1585_v51 = vpop.f32.mrf.mxu0  ;;  %s1781_s11 = scalar_lea.vmem %s1780_s30, 256  ;;  %p1782_p3 = scmp.lt.s32.totalorder %s2216_s22, %s1780_s30 }
 0x581   : > { %p1783_p5 = scmp.lt.s32.totalorder %s1781_s11, %s1775_s19 }
 0x582   : > { %v927_v52 = vpop.f32.mrf.mxu0 }
 0x583   : > { %p1784_p8 = por %p1783_p5, %p1782_p3 }
 0x584   : > { %v1586_v53 = vpop.f32.mrf.mxu0 }
 0x585   : > { %p1785_p10 = pnand %p1784_p8, %p1778_p1 }
 0x5e1   : > { %v694_v54 = vpop.permute.xlu0 %693 }
 0x5e2   : > { %697 = vst.msk [vmem:[#allocation3] sm:$0xff] %vm696_vm4, %v694_v54 }
 0x5e9   : > { %v813_v55 = vpop.permute.xlu1 %812 }
 0x5ea   : > { %816 = vst.msk [vmem:[#allocation3] sm:$0xff] %vm815_vm5, %v813_v55 }
 0x5f1   : > { %v932_v56 = vpop.permute.xlu1 %931 }
 0x5f2   : > { %935 = vst.msk [vmem:[#allocation3] sm:$0xff] %vm934_vm6, %v932_v56 }
 0x5f9   : > { %v936_v57 = vld [vmem:[#allocation3] sm:$0xff] }
 0x5fa   : > { %v937_v58 = vpack.c.bf16 %v936_v57, %v936_v57 }
 0x5fc   : > { %1592 = vmatmul.mubr.msk.bf16.vlgmr.msra.gmra.mxu1 %vm379_vm0, %v937_v58 }
 0x5fd   : > { %1619 = vmatprep.mubr.msk.bf16.mxu1 %vm1843_vm1, %v1842_v8  ;;  %1604 = vmatpush3.bf16.msra.mxu1 %v1711_v9 }
 0x5fe   : > { %1605 = vmatprep.subr.bf16.mxu1 %v1842_v8 }
 0x601   : > { %1606 = vmatpush3.bf16.msra.mxu1 %v1712_v10 }
 0x602   : > { %1607 = vmatprep.subr.bf16.mxu1 %v1842_v8 }
 0x605   : > { %1608 = vmatpush3.bf16.msra.mxu1 %v1713_v11 }
 0x606   : > { %1609 = vmatprep.subr.bf16.mxu1 %v1842_v8 }
 0x609   : > { %1610 = vmatpush3.bf16.msra.mxu1 %v1714_v12 }
 0x60a   : > { %1611 = vmatprep.subr.bf16.mxu1 %v1842_v8 }
 0x60d   : > { %1612 = vmatpush3.bf16.msra.mxu1 %v1715_v13 }
 0x60e   : > { %1613 = vmatprep.subr.bf16.mxu1 %v1842_v8 }
 0x611   : > { %1614 = vmatpush3.bf16.msra.mxu1 %v1716_v14 }
 0x612   : > { %1615 = vmatprep.subr.bf16.mxu1 %v1842_v8 }
 0x615   : > { %1616 = vmatpush3.bf16.msra.mxu1 %v1717_v25 }
 0x616   : > { %1617 = vmatprep.subr.bf16.mxu1 %v1842_v8 }
 0x619   : > { %1618 = vmatpush3.bf16.msra.mxu1 %v1718_v26 }
 0x6bc   : > { %v991_v59 = vpop.f32.mrf.mxu1 }
 0x6bd   : > { %v2117_v60 = vadd.f32 %v991_v59, %v2014_v0  ;;  %v1709_v0 = vld [vmem:[%s2265_s7 + $0x8] sm:$0xff]  }
 0x6be   : > { %v1593_v61 = vpop.f32.mrf.mxu1  ;;  %1596 = vmatpush3.bf16.msra.mxu0 %v1709_v0 }
 0x6bf   : > { %v999_v62 = vsel %vm379_vm0, %v2117_v60, 0.0  ;;  %1597 = vmatprep.subr.bf16.mxu0 %v1842_v8 }
 0x6c0   : > { %1000 = vadd.xlane.f32.xlu0 %v999_v62  ;;  %v994_v63 = vpop.f32.mrf.mxu1 }
 0x6c2   : > { %v1594_v1 = vpop.f32.mrf.mxu1  ;;  %1598 = vmatpush3.bf16.msra.mxu0 %v1710_v7 }
 0x6c3   : > { %1623 = vmatprep.subr.bf16.mxu0 %v1842_v8 }
 0x749   : > { %v1001_v2 = vpop.xlane.xlu0 %1000 }
 0x74a   : > { %v1002_v3 = vmul.f32 0.03125, %v1001_v2 }
 0x74c   : > { %v1003_v4 = vsub.f32 %v2117_v60, %v1002_v3 }
 0x74e   : > { %v1004_v5 = vmul.f32 %v1003_v4, %v1003_v4 }
 0x750   : > { %v1005_v6 = vsel %vm379_vm0, %v1004_v5, 0.0 }
 0x751   : > { %1006 = vadd.xlane.f32.xlu1 %v1005_v6 }
 0x7da   : > { %v1007_v15 = vpop.xlane.xlu1 %1006 }
 0x7db   : > { %v1008_v16 = vmul.f32 0.03125, %v1007_v15 }
 0x7dd   : > { %v1009_v17 = vadd.f32 1e-06, %v1008_v16 }
 0x7df   : > { %1745 = vrsqrt.f32 %v1009_v17 }
 0x7ec   : > { %v1746_v18 = vpop.eup %1745 }
 0x7ed   : > { %v1011_v20 = vmul.f32 %v1746_v18, %v1003_v4 }
 0x7ef   : > { %v1018_v22 = vmul.f32 %v1457_v19, %v1011_v20 }
 0x7f1   : > { %v1025_v23 = vadd.f32 %v1458_v21, %v1018_v22 }
 0x7f3   : > { %v1026_v24 = vpack.c.bf16 %v1025_v23, %v1025_v23 }
 0x7f5   : > { %1600 = vmatmul.mubr.msk.bf16.vlgmr.msra.gmra.mxu0 %vm379_vm0, %v1026_v24 }
 0x7f6   : > { %1624 = vmatpush3.bf16.msra.mxu0 %v1709_v0  ;;  %1627 = vmatprep.mubr.msk.bf16.mxu0 %vm1843_vm1, %v1842_v8 }
 0x7f7   : > { %1625 = vmatprep.subr.bf16.mxu0 %v1842_v8 }
 0x7fa   : > { %1626 = vmatpush3.bf16.msra.mxu0 %v1710_v7 }
 0x7fb   : > { %1631 = vmatprep.subr.bf16.mxu0 %v1842_v8 }
 0x8b5   : > { %v1096_v27 = vpop.f32.mrf.mxu0 }
 0x8b6   : > { %v1102_v28 = vmul.f32 0.1, %v1096_v27 }
 0x8b7   : > { %v1601_v29 = vpop.f32.mrf.mxu0 }
 0x8b8   : > { %v1462_v30 = vadd.f32 -0.01, %v1102_v28 }
 0x8b9   : > { %v1099_v31 = vpop.f32.mrf.mxu0 }
 0x8ba   : > { %v1104_v32 = vmax.f32 %v1462_v30, 0.0 }
 0x8bb   : > { %v1602_v33 = vpop.f32.mrf.mxu0 }
 0x8bc   : > { %v1105_v34 = vpack.c.bf16 %v1104_v32, %v1104_v32 }
 0x8be   : > { %1620 = vmatmul.mubr.bf16.vlgmr.msra.gmra.mxu1 %v1105_v34 }
 0x97e   : > { %v1188_v35 = vpop.f32.mrf.mxu1 }
 0x97f   : > { %v1194_v37 = vsub.f32 %v1188_v35, %v1025_v23 }
 0x980   : > { %v1621_v36 = vpop.f32.mrf.mxu1 }
 0x981   : > { %v1195_v39 = vpack.c.bf16 %v1194_v37, %v1194_v37 }
 0x982   : > { %v1191_v40 = vpop.f32.mrf.mxu1 }
 0x983   : > { %1628 = vmatmul.mubr.msk.bf16.vlgmr.msra.gmra.mxu0 %vm379_vm0, %v1195_v39 }
 0x984   : > { %v1622_v41 = vpop.f32.mrf.mxu1  ;;  %1632 = vmatpush3.bf16.msra.mxu0 %v1719_v38  ;;  %1647 = vmatprep.mubr.msk.bf16.mxu0 %vm1843_vm1, %v1842_v8 }
 0x985   : > { %1633 = vmatprep.subr.bf16.mxu0 %v1842_v8 }
 0x988   : > { %1634 = vmatpush3.bf16.msra.mxu0 %v1720_v42 }
 0x989   : > { %1635 = vmatprep.subr.bf16.mxu0 %v1842_v8 }
 0x98c   : > { %1636 = vmatpush3.bf16.msra.mxu0 %v1721_v43 }
 0x98d   : > { %1637 = vmatprep.subr.bf16.mxu0 %v1842_v8 }
 0x990   : > { %1638 = vmatpush3.bf16.msra.mxu0 %v1722_v44 }
 0x991   : > { %1639 = vmatprep.subr.bf16.mxu0 %v1842_v8 }
 0x994   : > { %1640 = vmatpush3.bf16.msra.mxu0 %v1723_v45 }
 0x995   : > { %1641 = vmatprep.subr.bf16.mxu0 %v1842_v8 }
 0x998   : > { %1642 = vmatpush3.bf16.msra.mxu0 %v1724_v46 }
 0x999   : > { %1643 = vmatprep.subr.bf16.mxu0 %v1842_v8 }
 0x99c   : > { %1644 = vmatpush3.bf16.msra.mxu0 %v1725_v47 }
 0x99d   : > { %1645 = vmatprep.subr.bf16.mxu0 %v1842_v8 }
 0x9a0   : > { %1646 = vmatpush3.bf16.msra.mxu0 %v1726_v48 }
 0xa43   : > { %v1233_v49 = vpop.f32.mrf.mxu0 }
 0xa44   : > { %v1239_v50 = vmul.f32 0.1, %v1233_v49 }
 0xa45   : > { %v1629_v51 = vpop.f32.mrf.mxu0 }
 0xa46   : > { %v1240_v52 = vsub.f32 %v1104_v32, %v1239_v50 }
 0xa47   : > { %v1236_v53 = vpop.f32.mrf.mxu0 }
 0xa48   : > { %v1472_v54 = vadd.f32 -0.01, %v1240_v52 }
 0xa49   : > { %v1630_v55 = vpop.f32.mrf.mxu0 }
 0xa4a   : > { %v1242_v56 = vmax.f32 %v1472_v54, 0.0 }
 0xa4c   : > { %v1243_v57 = vpack.c.bf16 %v1242_v56, %v1242_v56 }
 0xa4e   : > { %1648 = vmatmul.mubr.bf16.vlgmr.msra.gmra.mxu0 %v1243_v57 }
 0xb0e   : > { %v1342_v8 = vpop.f32.mrf.mxu0 }
 0xb0f   : > { %v1343_v58 = vadd.f32 %v1342_v8, %v2117_v60 }
 0xb10   : > { %v1649_v59 = vpop.f32.mrf.mxu0 }
 0xb11   : > { %1348 = vst.msk [vmem:[%s374_s21] sm:$0xff] %vm379_vm0, %v1343_v58 }
 0xb12   : > { %v1345_v61 = vpop.f32.mrf.mxu0 }
 0xb13   : > { %1788 = shalt.err (!%p1785_p10)
}
 0xb14   : > { %s1789_s27 = scalar_lea.hbm %s2214_s20, 128  ;;  %s1793_s28 = scalar_lea.hbm %s2268_s10, 256 }
 0xb15   : > { %p1790_p2 = scmp.ne.s32.totalorder %s2214_s20, %s1789_s27  ;;  %p1794_p7 = scmp.lt.s32.totalorder %s2214_s20, %s2268_s10 }
 0xb16   : > { %p1795_p0 = scmp.lt.s32.totalorder %s1793_s28, %s1789_s27 }
 0xb17   : > { %p1791_p4 = pnand %p1790_p2, %p2285_p12 }
 0xb18   : > { %p1796_p6 = por %p1795_p0, %p1794_p7 }
 0xb19   : > { %p1792_p9 = pneg %p1791_p4 }
 0xb1b   : > { %p1797_p11 = pnand %p1796_p6, %p1792_p9 }
 0xb1d   : > { %1800 = shalt.err (!%p1797_p11)
}
 0xb1e   : > { %1653 = dma.vmem_to_hbm [thread:$0]  (%p2285_p12), %s2216_s22, 128, %s2214_s20, %s1350_s17   ;;  %v1650_v60 = vpop.f32.mrf.mxu0 }
 0xb1f PF: > { %s1375_s12 = sand.u32 1, %s1827_s13   ;;  %p2286_p13 = scmp.ne.s32.totalorder %s2280_s26, 0 }
 0xb20   : > { %p2287_p1 = scmp.ge.s32.totalorder %s1839_s16, 2  ;;  %s1376_s24 = scalar_lea.sflag [#allocation6], %s1375_s12 }
 0xb22   : > { %p1660_p3 = pnand %p2287_p1, %p2286_p13 }
 0xb24   : > { %p1661_p5 = pneg %p1660_p3 }
 0xb26   : > { %1822 = dma.done.wait (%p1661_p5), %s1376_s24, 128  }
 0xb27   : > { %1824 = vsyncadd (%p1661_p5), %s1376_s24, 4294967168  ;;  %s2288_s16 = sld [smem:[#allocation11_spill]]  ;;  %s2291_s13 = smov %s1831_s14 }
 0xb28   : > { %s2289_s19 = sld [smem:[#allocation10_spill]] }
 0xb29   : > { %s2290_s15 = sld [smem:[#allocation12_spill]] }
 0xb2d   : > { %p23_p8 = scmp.ge.s32.totalorder %s2288_s16, 4  }
 0xb2e   : > { %s2292_s14 = smov %s2289_s19 }
 0xb2f   :  { %25 = sbr.rel (!%p23_p8) target bundleno = 5 (0x5), region = 105 }
 0xb34   :  { %1381 = vsyncpa [#allocation5], 1 }
 0xb35   :  { %1383 = vsyncpa [#allocation5 + $0x1], 1 }
 0xb36   :  { %1384 = vsyncpa [#allocation6], 1 }
 0xb37   :  { %1386 = vsyncpa [#allocation6 + $0x1], 1 }

// kernel: transformer_forward.2
= control target key start
LH: loop header
LB: loop body
LE: loop exit
PB: predicated region body
PF: predicated region fallthrough
CT: control target
= control target key end

     0   :  { %s1726_s13 = smov 0   ;;  %s1945_s0 = inlined_call_operand.vmem [shape: f32[2,8,32], index: 0, kind: input, shape index: {}, may-alias: {0,10}]   ;;  %s1946_s1 = inlined_call_operand.vmem [shape: f32[1,32], index: 1, kind: input, shape index: {}]   ;;  %s1947_s2 = inlined_call_operand.vmem [shape: f32[1,32], index: 2, kind: input, shape index: {}]   ;;  %s1948_s3 = inlined_call_operand.vmem [shape: bf16[32,32], index: 3, kind: input, shape index: {}]   ;;  %s1949_s4 = inlined_call_operand.vmem [shape: bf16[32,32], index: 4, kind: input, shape index: {}]   ;;  %s1950_s5 = inlined_call_operand.vmem [shape: f32[1,32], index: 5, kind: input, shape index: {}]   ;;  %s1951_s6 = inlined_call_operand.vmem [shape: f32[1,32], index: 6, kind: input, shape index: {}]   ;;  %s1952_s7 = inlined_call_operand.vmem [shape: bf16[32,128], index: 7, kind: input, shape index: {}]   ;;  %s1953_s8 = inlined_call_operand.vmem [shape: bf16[128,32], index: 8, kind: input, shape index: {}]   ;;  %s1954_s9 = inlined_call_operand.vmem [shape: bf16[128,32], index: 9, kind: input, shape index: {}]   ;;  %s1955_s10 = inlined_call_operand.vmem [shape: f32[2,8,32], index: 10, kind: output, shape index: {}, may-alias: {0,10}]  }
   0x1 LB: > { %s1382_s14 = sadd.s32 4294967295, %s1661_s13   ;;  %p1386_p0 = scmp.ge.s32.totalorder %s1661_s13, 1  ;;  %s1661_s13 = sphi %s1726_s13, %s20_s13  }
   0x2   : > { %p311_p1 = scmp.lt.s32.totalorder %s1661_s13, 3 }
   0x4   : > { %p312_p2 = pnand %p1386_p0, %p311_p1 }
   0x5   : > { %p347_p3 = scmp.lt.s32.totalorder (!%p312_p2), %s1382_s14, 1  ;;  %s1665_s27 = smov (!%p312_p2), 112  }
   0x6   : > { %315 = sbr.rel (%p312_p2) target bundleno = 2797 (0xaed), region = 60  ;;  %s1666_s28 = smov (!%p312_p2), 120  }
   0x7   : > { %s1667_s29 = smov (!%p312_p2), 104   ;;  %s1668_s30 = smov (!%p312_p2), 8  }
   0x8   : > { %s1670_s19 = smov (!%p312_p2), 24  }
   0xb   : > { %s1957_s14 = smov (!%p347_p3, %s1382_s14), 1  ;;  %vm359_vm0 = vcmask 261120   ;;  %v1613_v7 = vld [vmem:[%s1948_s3 + $0x8] sm:$0xff]   ;;  %v1663_v8 = vmov 0.0   ;;  %vm1664_vm1 = vmmov 0   ;;  %v1614_v9 = vld [vmem:[%s1948_s3] sm:$0xff]  }
   0xc   : > { %s1387_s15 = sshll.u32 %s1957_s14, 3  ;;  %1477 = vmatprep.subr.bf16.mxu1 %v1663_v8  ;;  %1481 = vmatprep.mubr.msk.bf16.mxu1 %vm1664_vm1, %v1663_v8  ;;  %v1389_v14 = vld [vmem:[%s1946_s1] ss:$0 sm:$0xff]  ;;  %vm453_vm2 = vcmask 64512   ;;  %vm515_vm3 = vcmask 1043456   ;;  %vm676_vm4 = vcmask 130112  }
   0xd   : > { %s350_s18 = scalar_lea.vmem %s1945_s0, %s1387_s15  ;;  %1478 = vmatpush3.bf16.msra.mxu1 %v1613_v7  ;;  %1491 = vmatprep.subr.bf16.mxu0 %v1663_v8  ;;  %v1390_v16 = vld [vmem:[%s1947_s2] ss:$0 sm:$0xff]  ;;  %vm795_vm5 = vcmask 195712   ;;  %vm914_vm6 = vcmask 261312  }
   0xe   : > { %v1742_v0 = vld [vmem:[%s350_s18] sm:$0xff]  ;;  %1479 = vmatprep.subr.bf16.mxu1 %v1663_v8  ;;  %1493 = vmatprep.mubr.msk.bf16.mxu0 %vm1664_vm1, %v1663_v8  ;;  %s1669_s18 = smov 16  }
   0xf   : > { %v360_v1 = vsel %vm359_vm0, %v1742_v0, 0.0 }
  0x10   : > { %361 = vadd.xlane.f32.xlu0 %v360_v1 }
  0x11   : > { %1480 = vmatpush3.bf16.msra.mxu1 %v1614_v9 }
  0x12   : > { %1485 = vmatprep.subr.bf16.mxu1 %v1663_v8 }
  0x99   : > { %v362_v2 = vpop.xlane.xlu0 %361 }
  0x9a   : > { %v364_v3 = vmul.f32 0.03125, %v362_v2 }
  0x9c   : > { %v365_v4 = vsub.f32 %v1742_v0, %v364_v3 }
  0x9e   : > { %v366_v5 = vmul.f32 %v365_v4, %v365_v4 }
  0xa0   : > { %v367_v6 = vsel %vm359_vm0, %v366_v5, 0.0 }
  0xa1   : > { %368 = vadd.xlane.f32.xlu0 %v367_v6 }
 0x12a   : > { %v369_v10 = vpop.xlane.xlu0 %368 }
 0x12b   : > { %v370_v11 = vmul.f32 0.03125, %v369_v10 }
 0x12d   : > { %v371_v12 = vadd.f32 1e-06, %v370_v11 }
 0x12f   : > { %1635 = vrsqrt.f32 %v371_v12 }
 0x13c   : > { %v1636_v13 = vpop.eup %1635 }
 0x13d   : > { %v373_v15 = vmul.f32 %v1636_v13, %v365_v4 }
 0x13f   : > { %v380_v17 = vmul.f32 %v1389_v14, %v373_v15 }
 0x141   : > { %v387_v18 = vadd.f32 %v1390_v16, %v380_v17 }
 0x143   : > { %v388_v19 = vpack.c.bf16 %v387_v18, %v387_v18 }
 0x145   : > { %1482 = vmatmul.mubr.msk.bf16.vlgmr.msra.gmra.mxu1 %vm359_vm0, %v388_v19 }
 0x146   : > { %1487 = vmatprep.mubr.msk.bf16.mxu1 %vm1664_vm1, %v1663_v8 }
 0x205   : > { %v442_v20 = vpop.f32.mrf.mxu1 }
 0x206   : > { %448 = vst.msk [vmem:[#allocation2] sm:$0xff] %vm359_vm0, %v442_v20 }
 0x207   : > { %v1483_v21 = vpop.f32.mrf.mxu1 }
 0x209   : > { %v445_v22 = vpop.f32.mrf.mxu1 }
 0x20b   : > { %v1484_v23 = vpop.f32.mrf.mxu1 }
 0x20d   : > { %v678_v24 = vld [vmem:[#allocation2] sm:$0xff] }
 0x20e   : > { %v679_v25 = vpack.c.bf16 %v678_v24, %v678_v24  ;;  %v561_v26 = vmul.f32 0.35355338, %v678_v24 }
 0x210   : > { %686 = vrot.lane.b32.xlu0 %v679_v25, %s1665_s27  ;;  %567 = vrot.lane.b32.xlu1 %v679_v25, %s1666_s28  ;;  %v458_v27 = vsel %vm453_vm2, %v679_v25, 0  ;;  %v516_v28 = vsel %vm515_vm3, %v679_v25, 0  ;;  %v562_v29 = vpack.c.bf16 %v561_v26, %v561_v26 }
 0x211   : > { %1486 = vmatpush3.bf16.xpose.msra.mxu1 %v458_v27  ;;  %1492 = vmatpush3.bf16.msra.mxu0 %v516_v28 }
 0x212   : > { %1497 = vmatprep.subr.bf16.mxu1 %v1663_v8  ;;  %1503 = vmatprep.subr.bf16.mxu0 %v1663_v8 }
 0x214   : > { %564 = vrot.lane.b32.xlu1 %v562_v29, %s1666_s28  ;;  %s354_s28 = scalar_lea.vmem %s1955_s10, %s1387_s15 }
 0x218   : > { %683 = vrot.lane.b32.xlu1 %v562_v29, %s1665_s27  ;;  %1488 = vmatmul.mubr.msk.bf16.vlgmr.msra.gmra.mxu1 %vm453_vm2, %v562_v29 }
 0x219   : > { %1499 = vmatprep.mubr.msk.bf16.mxu1 %vm1664_vm1, %v1663_v8 }
 0x21c   : > { %805 = vrot.lane.b32.xlu1 %v679_v25, %s1667_s29 }
 0x220   : > { %802 = vrot.lane.b32.xlu1 %v562_v29, %s1667_s29 }
 0x282   : > { %v1779_v30 = vpop.permute.xlu1 %567  ;;  %v1784_v33 = vpop.permute.xlu0 %686 }
 0x283   : > { %v573_v31 = vsel %vm453_vm2, %v1779_v30, 0  ;;  %v692_v35 = vsel %vm453_vm2, %v1784_v33, 0  ;;  %v630_v21 = vsel %vm515_vm3, %v1779_v30, 0  ;;  %v749_v28 = vsel %vm515_vm3, %v1784_v33, 0 }
 0x284   : > { %1498 = vmatpush3.bf16.xpose.msra.mxu1 %v573_v31 }
 0x285   : > { %1509 = vmatprep.subr.bf16.mxu1 %v1663_v8 }
 0x286   : > { %v565_v32 = vpop.permute.xlu1 %564 }
 0x28a   : > { %v684_v34 = vpop.permute.xlu1 %683 }
 0x28b   : > { %1500 = vmatmul.mubr.msk.bf16.vlgmr.msra.gmra.mxu1 %vm453_vm2, %v565_v32 }
 0x28c   : > { %1510 = vmatpush3.bf16.xpose.msra.mxu1 %v692_v35  ;;  %1511 = vmatprep.mubr.msk.bf16.mxu1 %vm1664_vm1, %v1663_v8 }
 0x28d   : > { %1521 = vmatprep.subr.bf16.mxu1 %v1663_v8 }
 0x28e   : > { %v1792_v36 = vpop.permute.xlu1 %805 }
 0x28f   : > { %v811_v37 = vsel %vm453_vm2, %v1792_v36, 0  ;;  %v868_v32 = vsel %vm515_vm3, %v1792_v36, 0 }
 0x292   : > { %v803_v38 = vpop.permute.xlu1 %802 }
 0x293   : > { %1512 = vmatmul.mubr.msk.bf16.vlgmr.msra.gmra.mxu1 %vm453_vm2, %v684_v34 }
 0x294   : > { %1522 = vmatpush3.bf16.xpose.msra.mxu1 %v811_v37  ;;  %1523 = vmatprep.mubr.msk.bf16.mxu1 %vm1664_vm1, %v1663_v8 }
 0x295   : > { %1533 = vmatprep.subr.bf16.mxu1 %v1663_v8 }
 0x29b   : > { %1524 = vmatmul.mubr.msk.bf16.vlgmr.msra.gmra.mxu1 %vm453_vm2, %v803_v38 }
 0x29c   : > { %1537 = vmatprep.mubr.msk.bf16.mxu1 %vm1664_vm1, %v1663_v8 }
 0x2d8   : > { %v494_v39 = vpop.f32.mrf.mxu1 }
 0x2d9   : > { %v500_v40 = vsel %vm453_vm2, %v494_v39, -inf }
 0x2da   : > { %501 = vmax.xlane.f32.xlu1 %v500_v40  ;;  %v1489_v41 = vpop.f32.mrf.mxu1 }
 0x2dc   : > { %v497_v42 = vpop.f32.mrf.mxu1 }
 0x2de   : > { %v1490_v43 = vpop.f32.mrf.mxu1 }
 0x2df   : > { %v1615_v43 = vld [vmem:[%s1949_s4 + $0x8] sm:$0xff]  }
 0x2e0   : > { %1534 = vmatpush3.bf16.msra.mxu1 %v1615_v43  ;;  %v1629_v43 = vld [vmem:[%s1954_s9 + $0x28] sm:$0xff]  }
 0x2e1   : > { %1535 = vmatprep.subr.bf16.mxu1 %v1663_v8 }
 0x34b   : > { %v609_v44 = vpop.f32.mrf.mxu1 }
 0x34c   : > { %v615_v45 = vsel %vm453_vm2, %v609_v44, -inf }
 0x34d   : > { %616 = vmax.xlane.f32.xlu0 %v615_v45  ;;  %v1501_v46 = vpop.f32.mrf.mxu1  ;;  %v1616_v45 = vld [vmem:[%s1949_s4] sm:$0xff]  }
 0x34e   : > { %1536 = vmatpush3.bf16.msra.mxu1 %v1616_v45  ;;  %v1631_v45 = vld [vmem:[%s1954_s9 + $0x18] sm:$0xff]  }
 0x34f   : > { %v612_v47 = vpop.f32.mrf.mxu1  ;;  %1549 = vmatprep.subr.bf16.mxu1 %v1663_v8 }
 0x351   : > { %v1502_v48 = vpop.f32.mrf.mxu1 }
 0x353   : > { %v728_v49 = vpop.f32.mrf.mxu1 }
 0x354   : > { %v734_v50 = vsel %vm453_vm2, %v728_v49, -inf }
 0x355   : > { %735 = vmax.xlane.f32.xlu1 %v734_v50  ;;  %v1513_v51 = vpop.f32.mrf.mxu1 }
 0x357   : > { %v731_v52 = vpop.f32.mrf.mxu1 }
 0x359   : > { %v1514_v53 = vpop.f32.mrf.mxu1 }
 0x35b   : > { %v847_v54 = vpop.f32.mrf.mxu1 }
 0x35c   : > { %v853_v55 = vsel %vm453_vm2, %v847_v54, -inf }
 0x35d   : > { %854 = vmax.xlane.f32.xlu1 %v853_v55  ;;  %v1525_v56 = vpop.f32.mrf.mxu1 }
 0x35f   : > { %v850_v57 = vpop.f32.mrf.mxu1 }
 0x361   : > { %v1526_v58 = vpop.f32.mrf.mxu1 }
 0x363   : > { %v502_v59 = vpop.xlane.xlu1 %501 }
 0x364   : > { %v503_v60 = vsub.f32 %v494_v39, %v502_v59 }
 0x366   : > { %v504_v61 = vmul.f32 1.442695, %v503_v60 }
 0x368   : > { %1637 = vpow2.f32 %v504_v61 }
 0x375   : > { %v1638_v62 = vpop.eup %1637 }
 0x376   : > { %v506_v63 = vsel %vm453_vm2, %v1638_v62, 0.0 }
 0x377   : > { %507 = vadd.xlane.f32.xlu0 %v506_v63 }
 0x3d6   : > { %v617_v1 = vpop.xlane.xlu0 %616 }
 0x3d7   : > { %v618_v2 = vsub.f32 %v609_v44, %v617_v1 }
 0x3d9   : > { %v619_v3 = vmul.f32 1.442695, %v618_v2 }
 0x3db   : > { %1639 = vpow2.f32 %v619_v3 }
 0x3de   : > { %v736_v4 = vpop.xlane.xlu1 %735 }
 0x3df   : > { %v737_v5 = vsub.f32 %v728_v49, %v736_v4 }
 0x3e1   : > { %v738_v6 = vmul.f32 1.442695, %v737_v5 }
 0x3e3   : > { %1641 = vpow2.f32 %v738_v6 }
 0x3e6   : > { %v855_v7 = vpop.xlane.xlu1 %854 }
 0x3e7   : > { %v856_v9 = vsub.f32 %v847_v54, %v855_v7  ;;  %v1618_v7 = vld [vmem:[%s1952_s7] sm:$0xff]  }
 0x3e8   : > { %v1640_v10 = vpop.eup %1639 }
 0x3e9   : > { %v857_v11 = vmul.f32 1.442695, %v856_v9  ;;  %v621_v12 = vsel %vm453_vm2, %v1640_v10, 0.0  ;;  %v1619_v9 = vld [vmem:[%s1953_s8 + $0x38] sm:$0xff]  }
 0x3ea   : > { %622 = vadd.xlane.f32.xlu1 %v621_v12  ;;  %v1622_v12 = vld [vmem:[%s1953_s8 + $0x20] sm:$0xff]  }
 0x3eb   : > { %1643 = vpow2.f32 %v857_v11  ;;  %v1621_v11 = vld [vmem:[%s1953_s8 + $0x28] sm:$0xff]  }
 0x3f0   : > { %v1642_v13 = vpop.eup %1641 }
 0x3f1   : > { %v740_v14 = vsel %vm453_vm2, %v1642_v13, 0.0 }
 0x3f2   : > { %741 = vadd.xlane.f32.xlu0 %v740_v14  ;;  %v1624_v14 = vld [vmem:[%s1953_s8 + $0x10] sm:$0xff]  }
 0x3f8   : > { %v1644_v15 = vpop.eup %1643 }
 0x3f9   : > { %v859_v16 = vsel %vm453_vm2, %v1644_v15, 0.0 }
 0x3fa   : > { %860 = vadd.xlane.f32.xlu1 %v859_v16 }
 0x400   : > { %v508_v17 = vpop.xlane.xlu0 %507 }
 0x401   : > { %1645 = vrcp.f32 %v508_v17 }
 0x40e   : > { %v1646_v18 = vpop.eup %1645 }
 0x40f   : > { %v510_v19 = vmul.f32 %v1646_v18, %v1638_v62 }
 0x411   : > { %v511_v20 = vpack.c.bf16 %v510_v19, %v510_v19  ;;  %v1405_v19 = vld [vmem:[%s1950_s5] ss:$0 sm:$0xff] }
 0x413   : > { %1494 = vmatmul.mubr.msk.bf16.vlgmr.msra.gmra.mxu0 %vm453_vm2, %v511_v20 }
 0x414   : > { %1504 = vmatpush3.bf16.msra.mxu0 %v630_v21  ;;  %1505 = vmatprep.mubr.msk.bf16.mxu0 %vm1664_vm1, %v1663_v8  ;;  %v1406_v21 = vld [vmem:[%s1951_s6] ss:$0 sm:$0xff] }
 0x415   : > { %1515 = vmatprep.subr.bf16.mxu0 %v1663_v8 }
 0x473   : > { %v623_v22 = vpop.xlane.xlu1 %622 }
 0x474   : > { %1647 = vrcp.f32 %v623_v22 }
 0x47b   : > { %v742_v23 = vpop.xlane.xlu0 %741 }
 0x47c   : > { %1649 = vrcp.f32 %v742_v23 }
 0x481   : > { %v1648_v24 = vpop.eup %1647 }
 0x482   : > { %v625_v25 = vmul.f32 %v1648_v24, %v1640_v10  ;;  %v1620_v10 = vld [vmem:[%s1953_s8 + $0x30] sm:$0xff]  }
 0x483   : > { %v861_v26 = vpop.xlane.xlu1 %860 }
 0x484   : > { %1651 = vrcp.f32 %v861_v26  ;;  %v626_v27 = vpack.c.bf16 %v625_v25, %v625_v25  ;;  %v1625_v25 = vld [vmem:[%s1953_s8 + $0x8] sm:$0xff]   ;;  %v1626_v26 = vld [vmem:[%s1953_s8] sm:$0xff]  }
 0x486   : > { %1506 = vmatmul.mubr.msk.bf16.vlgmr.msra.gmra.mxu0 %vm453_vm2, %v626_v27 }
 0x487   : > { %1516 = vmatpush3.bf16.msra.mxu0 %v749_v28  ;;  %1517 = vmatprep.mubr.msk.bf16.mxu0 %vm1664_vm1, %v1663_v8 }
 0x488   : > { %1527 = vmatprep.subr.bf16.mxu0 %v1663_v8 }
 0x489   : > { %v1650_v29 = vpop.eup %1649 }
 0x48a   : > { %v744_v30 = vmul.f32 %v1650_v29, %v1642_v13  ;;  %v1623_v13 = vld [vmem:[%s1953_s8 + $0x18] sm:$0xff]  }
 0x48c   : > { %v745_v31 = vpack.c.bf16 %v744_v30, %v744_v30 }
 0x48e   : > { %1518 = vmatmul.mubr.msk.bf16.vlgmr.msra.gmra.mxu0 %vm453_vm2, %v745_v31 }
 0x48f   : > { %1528 = vmatpush3.bf16.msra.mxu0 %v868_v32  ;;  %1529 = vmatprep.mubr.msk.bf16.mxu0 %vm1664_vm1, %v1663_v8 }
 0x490   : > { %1541 = vmatprep.subr.bf16.mxu0 %v1663_v8 }
 0x491   : > { %v1652_v33 = vpop.eup %1651 }
 0x492   : > { %v863_v34 = vmul.f32 %v1652_v33, %v1644_v15 }
 0x494   : > { %v864_v35 = vpack.c.bf16 %v863_v34, %v863_v34 }
 0x496   : > { %1530 = vmatmul.mubr.msk.bf16.vlgmr.msra.gmra.mxu0 %vm453_vm2, %v864_v35 }
 0x497   : > { %1545 = vmatprep.mubr.msk.bf16.mxu0 %vm1664_vm1, %v1663_v8 }
 0x4d3   : > { %v552_v37 = vpop.f32.mrf.mxu0 }
 0x4d4   : > { %558 = vst.msk [vmem:[#allocation3] sm:$0xff] %vm453_vm2, %v552_v37 }
 0x4d5   : > { %v1495_v36 = vpop.f32.mrf.mxu0 }
 0x4d7   : > { %v555_v38 = vpop.f32.mrf.mxu0 }
 0x4d8   : > { %v1627_v38 = vld [vmem:[%s1954_s9 + $0x38] sm:$0xff]  }
 0x4d9   : > { %v1496_v39 = vpop.f32.mrf.mxu0 }
 0x546   : > { %v666_v40 = vpop.f32.mrf.mxu0 }
 0x547   : > { %673 = vrot.lane.b32.xlu0 %v666_v40, %s1668_s30 }
 0x548   : > { %v1507_v41 = vpop.f32.mrf.mxu0 }
 0x54a   : > { %v669_v42 = vpop.f32.mrf.mxu0 }
 0x54b   : > { %v1628_v42 = vld [vmem:[%s1954_s9 + $0x30] sm:$0xff]  }
 0x54c   : > { %v1508_v44 = vpop.f32.mrf.mxu0 }
 0x54d   : > { %v1630_v44 = vld [vmem:[%s1954_s9 + $0x20] sm:$0xff]  }
 0x54e   : > { %v785_v46 = vpop.f32.mrf.mxu0 }
 0x54f   : > { %792 = vrot.lane.b32.xlu1 %v785_v46, %s1669_s18  ;;  %v1632_v46 = vld [vmem:[%s1954_s9 + $0x10] sm:$0xff]  }
 0x550   : > { %v1519_v47 = vpop.f32.mrf.mxu0 }
 0x551   : > { %v1633_v47 = vld [vmem:[%s1954_s9 + $0x8] sm:$0xff]  }
 0x552   : > { %v788_v48 = vpop.f32.mrf.mxu0 }
 0x553   : > { %v1634_v48 = vld [vmem:[%s1954_s9] sm:$0xff]  }
 0x554   : > { %v1520_v49 = vpop.f32.mrf.mxu0 }
 0x556   : > { %v904_v50 = vpop.f32.mrf.mxu0 }
 0x557   : > { %911 = vrot.lane.b32.xlu1 %v904_v50, %s1670_s19 }
 0x558   : > { %v1531_v51 = vpop.f32.mrf.mxu0 }
 0x55a   : > { %v907_v52 = vpop.f32.mrf.mxu0 }
 0x55c   : > { %v1532_v53 = vpop.f32.mrf.mxu0 }
 0x5b9   : > { %v674_v54 = vpop.permute.xlu0 %673 }
 0x5ba   : > { %677 = vst.msk [vmem:[#allocation3] sm:$0xff] %vm676_vm4, %v674_v54 }
 0x5c1   : > { %v793_v55 = vpop.permute.xlu1 %792 }
 0x5c2   : > { %796 = vst.msk [vmem:[#allocation3] sm:$0xff] %vm795_vm5, %v793_v55 }
 0x5c9   : > { %v912_v56 = vpop.permute.xlu1 %911 }
 0x5ca   : > { %915 = vst.msk [vmem:[#allocation3] sm:$0xff] %vm914_vm6, %v912_v56 }
 0x5d1   : > { %v916_v57 = vld [vmem:[#allocation3] sm:$0xff] }
 0x5d2   : > { %v917_v58 = vpack.c.bf16 %v916_v57, %v916_v57 }
 0x5d4   : > { %1538 = vmatmul.mubr.msk.bf16.vlgmr.msra.gmra.mxu1 %vm359_vm0, %v917_v58 }
 0x5d5   : > { %1565 = vmatprep.mubr.msk.bf16.mxu1 %vm1664_vm1, %v1663_v8  ;;  %1550 = vmatpush3.bf16.msra.mxu1 %v1619_v9 }
 0x5d6   : > { %1551 = vmatprep.subr.bf16.mxu1 %v1663_v8 }
 0x5d9   : > { %1552 = vmatpush3.bf16.msra.mxu1 %v1620_v10 }
 0x5da   : > { %1553 = vmatprep.subr.bf16.mxu1 %v1663_v8 }
 0x5dd   : > { %1554 = vmatpush3.bf16.msra.mxu1 %v1621_v11 }
 0x5de   : > { %1555 = vmatprep.subr.bf16.mxu1 %v1663_v8 }
 0x5e1   : > { %1556 = vmatpush3.bf16.msra.mxu1 %v1622_v12 }
 0x5e2   : > { %1557 = vmatprep.subr.bf16.mxu1 %v1663_v8 }
 0x5e5   : > { %1558 = vmatpush3.bf16.msra.mxu1 %v1623_v13 }
 0x5e6   : > { %1559 = vmatprep.subr.bf16.mxu1 %v1663_v8 }
 0x5e9   : > { %1560 = vmatpush3.bf16.msra.mxu1 %v1624_v14 }
 0x5ea   : > { %1561 = vmatprep.subr.bf16.mxu1 %v1663_v8 }
 0x5ed   : > { %1562 = vmatpush3.bf16.msra.mxu1 %v1625_v25 }
 0x5ee   : > { %1563 = vmatprep.subr.bf16.mxu1 %v1663_v8 }
 0x5f1   : > { %1564 = vmatpush3.bf16.msra.mxu1 %v1626_v26 }
 0x694   : > { %v971_v59 = vpop.f32.mrf.mxu1 }
 0x695   : > { %v1845_v60 = vadd.f32 %v971_v59, %v1742_v0  ;;  %v1617_v0 = vld [vmem:[%s1952_s7 + $0x8] sm:$0xff]  }
 0x696   : > { %v1539_v61 = vpop.f32.mrf.mxu1  ;;  %1542 = vmatpush3.bf16.msra.mxu0 %v1617_v0 }
 0x697   : > { %v979_v62 = vsel %vm359_vm0, %v1845_v60, 0.0  ;;  %1543 = vmatprep.subr.bf16.mxu0 %v1663_v8 }
 0x698   : > { %980 = vadd.xlane.f32.xlu0 %v979_v62  ;;  %v974_v63 = vpop.f32.mrf.mxu1 }
 0x69a   : > { %v1540_v1 = vpop.f32.mrf.mxu1  ;;  %1544 = vmatpush3.bf16.msra.mxu0 %v1618_v7 }
 0x69b   : > { %1569 = vmatprep.subr.bf16.mxu0 %v1663_v8 }
 0x721   : > { %v981_v2 = vpop.xlane.xlu0 %980 }
 0x722   : > { %v982_v3 = vmul.f32 0.03125, %v981_v2 }
 0x724   : > { %v983_v4 = vsub.f32 %v1845_v60, %v982_v3 }
 0x726   : > { %v984_v5 = vmul.f32 %v983_v4, %v983_v4 }
 0x728   : > { %v985_v6 = vsel %vm359_vm0, %v984_v5, 0.0 }
 0x729   : > { %986 = vadd.xlane.f32.xlu1 %v985_v6 }
 0x7b2   : > { %v987_v15 = vpop.xlane.xlu1 %986 }
 0x7b3   : > { %v988_v16 = vmul.f32 0.03125, %v987_v15 }
 0x7b5   : > { %v989_v17 = vadd.f32 1e-06, %v988_v16 }
 0x7b7   : > { %1653 = vrsqrt.f32 %v989_v17 }
 0x7c4   : > { %v1654_v18 = vpop.eup %1653 }
 0x7c5   : > { %v991_v20 = vmul.f32 %v1654_v18, %v983_v4 }
 0x7c7   : > { %v998_v22 = vmul.f32 %v1405_v19, %v991_v20 }
 0x7c9   : > { %v1005_v23 = vadd.f32 %v1406_v21, %v998_v22 }
 0x7cb   : > { %v1006_v24 = vpack.c.bf16 %v1005_v23, %v1005_v23 }
 0x7cd   : > { %1546 = vmatmul.mubr.msk.bf16.vlgmr.msra.gmra.mxu0 %vm359_vm0, %v1006_v24 }
 0x7ce   : > { %1570 = vmatpush3.bf16.msra.mxu0 %v1617_v0  ;;  %1573 = vmatprep.mubr.msk.bf16.mxu0 %vm1664_vm1, %v1663_v8 }
 0x7cf   : > { %1571 = vmatprep.subr.bf16.mxu0 %v1663_v8 }
 0x7d2   : > { %1572 = vmatpush3.bf16.msra.mxu0 %v1618_v7 }
 0x7d3   : > { %1577 = vmatprep.subr.bf16.mxu0 %v1663_v8 }
 0x88d   : > { %v1076_v27 = vpop.f32.mrf.mxu0 }
 0x88e   : > { %v1082_v28 = vmul.f32 0.1, %v1076_v27 }
 0x88f   : > { %v1547_v29 = vpop.f32.mrf.mxu0 }
 0x890   : > { %v1410_v30 = vadd.f32 -0.01, %v1082_v28 }
 0x891   : > { %v1079_v31 = vpop.f32.mrf.mxu0 }
 0x892   : > { %v1084_v32 = vmax.f32 %v1410_v30, 0.0 }
 0x893   : > { %v1548_v33 = vpop.f32.mrf.mxu0 }
 0x894   : > { %v1085_v34 = vpack.c.bf16 %v1084_v32, %v1084_v32 }
 0x896   : > { %1566 = vmatmul.mubr.bf16.vlgmr.msra.gmra.mxu1 %v1085_v34 }
 0x956   : > { %v1168_v35 = vpop.f32.mrf.mxu1 }
 0x957   : > { %v1174_v37 = vsub.f32 %v1168_v35, %v1005_v23 }
 0x958   : > { %v1567_v36 = vpop.f32.mrf.mxu1 }
 0x959   : > { %v1175_v39 = vpack.c.bf16 %v1174_v37, %v1174_v37 }
 0x95a   : > { %v1171_v40 = vpop.f32.mrf.mxu1 }
 0x95b   : > { %1574 = vmatmul.mubr.msk.bf16.vlgmr.msra.gmra.mxu0 %vm359_vm0, %v1175_v39 }
 0x95c   : > { %v1568_v41 = vpop.f32.mrf.mxu1  ;;  %1578 = vmatpush3.bf16.msra.mxu0 %v1627_v38  ;;  %1593 = vmatprep.mubr.msk.bf16.mxu0 %vm1664_vm1, %v1663_v8 }
 0x95d   : > { %1579 = vmatprep.subr.bf16.mxu0 %v1663_v8 }
 0x960   : > { %1580 = vmatpush3.bf16.msra.mxu0 %v1628_v42 }
 0x961   : > { %1581 = vmatprep.subr.bf16.mxu0 %v1663_v8 }
 0x964   : > { %1582 = vmatpush3.bf16.msra.mxu0 %v1629_v43 }
 0x965   : > { %1583 = vmatprep.subr.bf16.mxu0 %v1663_v8 }
 0x968   : > { %1584 = vmatpush3.bf16.msra.mxu0 %v1630_v44 }
 0x969   : > { %1585 = vmatprep.subr.bf16.mxu0 %v1663_v8 }
 0x96c   : > { %1586 = vmatpush3.bf16.msra.mxu0 %v1631_v45 }
 0x96d   : > { %1587 = vmatprep.subr.bf16.mxu0 %v1663_v8 }
 0x970   : > { %1588 = vmatpush3.bf16.msra.mxu0 %v1632_v46 }
 0x971   : > { %1589 = vmatprep.subr.bf16.mxu0 %v1663_v8 }
 0x974   : > { %1590 = vmatpush3.bf16.msra.mxu0 %v1633_v47 }
 0x975   : > { %1591 = vmatprep.subr.bf16.mxu0 %v1663_v8 }
 0x978   : > { %1592 = vmatpush3.bf16.msra.mxu0 %v1634_v48 }
 0xa1b   : > { %v1213_v49 = vpop.f32.mrf.mxu0 }
 0xa1c   : > { %v1219_v50 = vmul.f32 0.1, %v1213_v49 }
 0xa1d   : > { %v1575_v51 = vpop.f32.mrf.mxu0 }
 0xa1e   : > { %v1220_v52 = vsub.f32 %v1084_v32, %v1219_v50 }
 0xa1f   : > { %v1216_v53 = vpop.f32.mrf.mxu0 }
 0xa20   : > { %v1420_v54 = vadd.f32 -0.01, %v1220_v52 }
 0xa21   : > { %v1576_v55 = vpop.f32.mrf.mxu0 }
 0xa22   : > { %v1222_v56 = vmax.f32 %v1420_v54, 0.0 }
 0xa24   : > { %v1223_v57 = vpack.c.bf16 %v1222_v56, %v1222_v56 }
 0xa26   : > { %1594 = vmatmul.mubr.bf16.vlgmr.msra.gmra.mxu0 %v1223_v57 }
 0xae6   : > { %v1322_v8 = vpop.f32.mrf.mxu0 }
 0xae7   : > { %v1323_v58 = vadd.f32 %v1322_v8, %v1845_v60 }
 0xae8   : > { %v1595_v59 = vpop.f32.mrf.mxu0 }
 0xae9   : > { %1328 = vst.msk [vmem:[%s354_s28] sm:$0xff] %vm359_vm0, %v1323_v58 }
 0xaea   : > { %v1325_v61 = vpop.f32.mrf.mxu0 }
 0xaec   : > { %v1596_v62 = vpop.f32.mrf.mxu0 }
 0xaed PF: > { %s20_s13 = sadd.s32 1, %s1661_s13  }
 0xaee   : > { %p17_p4 = scmp.ge.s32.totalorder %s20_s13, 4  }
 0xaf0   :  { %19 = sbr.rel (!%p17_p4) target bundleno = 1 (0x1), region = 90 }

// kernel: transformer_forward.3
= control target key start
LH: loop header
LB: loop body
LE: loop exit
PB: predicated region body
PF: predicated region fallthrough
CT: control target
= control target key end

     0   :  { %15 = vsyncpa [#allocation5], 0  ;;  %s2258_s0 = inlined_call_operand.hbm [shape: f32[2,8,32], index: 0, kind: input, shape index: {}, may-alias: {0,10}]   ;;  %s2259_s1 = inlined_call_operand.vmem [shape: f32[1,32], index: 1, kind: input, shape index: {}]   ;;  %s2260_s2 = inlined_call_operand.vmem [shape: f32[1,32], index: 2, kind: input, shape index: {}]   ;;  %s2261_s3 = inlined_call_operand.vmem [shape: bf16[32,32], index: 3, kind: input, shape index: {}]   ;;  %s2262_s4 = inlined_call_operand.vmem [shape: bf16[32,32], index: 4, kind: input, shape index: {}]   ;;  %s2263_s5 = inlined_call_operand.vmem [shape: f32[1,32], index: 5, kind: input, shape index: {}]   ;;  %s2264_s6 = inlined_call_operand.vmem [shape: f32[1,32], index: 6, kind: input, shape index: {}]   ;;  %s2265_s7 = inlined_call_operand.vmem [shape: bf16[32,128], index: 7, kind: input, shape index: {}]   ;;  %s2266_s8 = inlined_call_operand.vmem [shape: bf16[128,32], index: 8, kind: input, shape index: {}]   ;;  %s2267_s9 = inlined_call_operand.vmem [shape: bf16[128,32], index: 9, kind: input, shape index: {}]   ;;  %s2268_s10 = inlined_call_operand.hbm [shape: f32[2,8,32], index: 10, kind: output, shape index: {}, may-alias: {0,10}]  }
   0x1   :  { %17 = vsyncpa [#allocation5 + $0x1], 0 }
   0x2   :  { %18 = vsyncpa [#allocation6], 0 }
   0x3   :  { %20 = vsyncpa [#allocation6 + $0x1], 0  ;;  %s1906_s13 = smov 0   ;;  %s1908_s14 = smov 0  }
   0x4   :  { %s1910_s15 = smov 0   ;;  %s1912_s16 = smov 0  }
   0x5 LB: > { %2274 = sst [smem:[#allocation10_spill]] %s1835_s15  ;;  %s1927_s17 = sadd.s32 4294967295, %s1839_s16   ;;  %s1839_s16 = sphi %s1912_s16, %s2288_s16   ;;  %s1835_s15 = sphi %s1910_s15, %s2290_s15   ;;  %s1831_s14 = sphi %s1908_s14, %s2292_s14   ;;  %s1827_s13 = sphi %s1906_s13, %s2291_s13  }
   0x6   : > { %s1433_s18 = sadd.s32 4294967294, %s1839_s16   ;;  %s1931_s19 = sadd.s32 1, %s1839_s16  }
   0x7   : > { %2275 = sst [smem:[#allocation11_spill]] %s1931_s19  ;;  %s33_s20 = sadd.s32 1, %s1835_s15 }
   0x8   : > { %s30_s21 = ssub.s32 %s1839_s16, %s1931_s19  ;;  %p40_p0 = scmp.ne.s32.totalorder %s1835_s15, %s1831_s14 }
   0x9   : > { %p31_p1 = scmp.eq.s32.totalorder %s30_s21, 0  ;;  %p41_p2 = scmp.eq.s32.totalorder %s1839_s16, 0 }
   0xa   : > { %p46_p3 = scmp.ne.s32.totalorder %s1831_s14, %s1827_s13  ;;  %p47_p4 = scmp.eq.s32.totalorder %s1927_s17, 0 }
   0xb   : > { %s1943_s22 = scalar_select %p31_p1, %s1835_s15, %s33_s20  }
   0xc   : > { %p1945_p5 = por %p41_p2, %p40_p0  ;;  %p1949_p6 = por %p47_p4, %p46_p3 }
   0xd   : > { %2276 = sst [smem:[#allocation12_spill]] %s1943_s22  ;;  %p259_p7 = scmp.eq.s32.totalorder %s1927_s17, 1 }
   0xe   : > { %s2278_s24 = scalar_select %p1949_p6, 1, 0 }
   0xf   : > { %p265_p8 = scmp.eq.s32.totalorder %s1433_s18, 1  ;;  %p1663_p10 = scmp.lt.s32.totalorder %s1839_s16, 2 }
  0x10   : > { %p1956_p11 = por %p259_p7, %p40_p0  ;;  %s312_s27 = sand.u32 1, %s1835_s15  }
  0x11   : > { %p1960_p12 = por %p265_p8, %p46_p3  ;;  %s1437_s28 = sshll.u32 %s1839_s16, 7 }
  0x12   : > { %s2279_s25 = scalar_select %p1956_p11, 1, 0 }
  0x13   : > { %s2280_s26 = scalar_select %p1960_p12, 1, 0 }
  0x14   : > { %s1436_s29 = sshll.u32 %s312_s27, 3  ;;  %s1969_s12 = scalar_lea.hbm %s2258_s0, %s1437_s28 }
  0x15   : > { %s316_s18 = scalar_lea.vmem [#allocation4], %s1436_s29  ;;  %p1973_p13 = pnand %p1663_p10, %p1945_p5 }
  0x16   : > { %s323_s20 = sshll.u32 %s316_s18, 4  ;;  %s313_s22 = scalar_lea.sflag [#allocation5], %s312_s27  ;;  %s1977_s20 = int_to_ptr.vmem [resolvable:$true] %s323_s20 }
  0x17   : > { %s1747_s15 = scalar_lea.hbm %s1969_s12, 128  ;;  %p1749_p3 = pneg %p1973_p13 }
  0x18   : > { %p1748_p2 = scmp.ne.s32.totalorder %s1969_s12, %s1747_s15  ;;  %s1752_s23 = scalar_lea.hbm %s2258_s0, 256 }
  0x19   : > { %p1753_p5 = scmp.lt.s32.totalorder %s1969_s12, %s2258_s0  ;;  %p1754_p8 = scmp.lt.s32.totalorder %s1752_s23, %s1747_s15 }
  0x1a   : > { %p1750_p4 = pnand %p1749_p3, %p1748_p2 }
  0x1b   : > { %p1755_p10 = por %p1754_p8, %p1753_p5 }
  0x1c   : > { %p1751_p7 = pneg %p1750_p4 }
  0x1e   : > { %p1756_p9 = pnand %p1755_p10, %p1751_p7 }
  0x20   : > { %1759 = shalt.err (!%p1756_p9)
}
  0x21   : > { %s1760_s27 = scalar_lea.vmem %s1977_s20, 128  ;;  %s1841_s18 = smov [#allocation4]  }
  0x22   : > { %p1761_p0 = scmp.ne.s32.totalorder %s1977_s20, %s1760_s27  ;;  %s1765_s19 = sshll.u32 %s1841_s18, 4  ;;  %s1766_s19 = int_to_ptr.vmem [resolvable:$false] %s1765_s19 }
  0x23   : > { %s1767_s28 = scalar_lea.vmem %s1766_s19, 256  ;;  %p1768_p4 = scmp.lt.s32.totalorder %s1977_s20, %s1766_s19 }
  0x24   : > { %p1763_p1 = pnand %p1761_p0, %p1749_p3  ;;  %p1769_p12 = scmp.lt.s32.totalorder %s1767_s28, %s1760_s27 }
  0x26   : > { %p1764_p2 = pneg %p1763_p1  ;;  %p1770_p11 = por %p1769_p12, %p1768_p4 }
  0x28   : > { %p1771_p6 = pnand %p1770_p11, %p1764_p2 }
  0x2a   : > { %1774 = shalt.err (!%p1771_p6)
}
  0x2b   : > { %1658 = dma.hbm_to_vmem [thread:$0]  (!%p1973_p13), %s1969_s12, 128, %s1977_s20, %s313_s22  }
  0x2c   : > { %p2282_p9 = scmp.lt.s32.totalorder %s1839_s16, 3  ;;  %p2283_p7 = scmp.ge.s32.totalorder %s1839_s16, 1 }
  0x2e   : > { %p329_p0 = pnand %p2283_p7, %p2282_p9 }
  0x2f   : > { %s2004_s15 = sand.u32 (!%p329_p0), 1, %s1831_s14   ;;  %p2284_p6 = scmp.ne.s32.totalorder (!%p329_p0), %s2278_s24, 0 }
  0x30   : > { %332 = sbr.rel (%p329_p0) target bundleno = 2847 (0xb1f), region = 60  ;;  %s1439_s19 = sshll.u32 (!%p329_p0), %s2004_s15, 3 }
  0x31   : > { %s335_s29 = scalar_lea.sflag (!%p329_p0), [#allocation5], %s2004_s15  ;;  %s338_s21 = scalar_lea.vmem (!%p329_p0), [#allocation4], %s1439_s19 }
  0x35   : > { %1818 = dma.done.wait (%p2284_p6), %s335_s29, 128  }
  0x36   : > { %1820 = vsyncadd (%p2284_p6), %s335_s29, 4294967168  ;;  %vm379_vm0 = vcmask 261120   ;;  %v2014_v0 = vld [vmem:[%s338_s21] sm:$0xff]  ;;  %v1705_v7 = vld [vmem:[%s2261_s3 + $0x8] sm:$0xff]   ;;  %v1842_v8 = vmov 0.0   ;;  %vm1843_vm1 = vmmov 0  }
  0x37   : > { %v380_v1 = vsel %vm379_vm0, %v2014_v0, 0.0  ;;  %1531 = vmatprep.subr.bf16.mxu1 %v1842_v8  ;;  %1535 = vmatprep.mubr.msk.bf16.mxu1 %vm1843_vm1, %v1842_v8  ;;  %v1706_v9 = vld [vmem:[%s2261_s3] sm:$0xff]   ;;  %vm473_vm2 = vcmask 64512   ;;  %vm535_vm3 = vcmask 1043456   ;;  %s1844_s18 = smov 112   ;;  %s1845_s28 = smov 120  }
  0x38   : > { %381 = vadd.xlane.f32.xlu0 %v380_v1  ;;  %1532 = vmatpush3.bf16.msra.mxu1 %v1705_v7  ;;  %v1441_v14 = vld [vmem:[%s2259_s1] ss:$0 sm:$0xff]  ;;  %s1846_s29 = smov 104   ;;  %s1847_s21 = smov 8   ;;  %vm696_vm4 = vcmask 130112   ;;  %vm815_vm5 = vcmask 195712  }
  0x39   : > { %1545 = vmatprep.subr.bf16.mxu0 %v1842_v8  ;;  %1533 = vmatprep.subr.bf16.mxu1 %v1842_v8  ;;  %v1442_v16 = vld [vmem:[%s2260_s2] ss:$0 sm:$0xff]  ;;  %s1848_s23 = smov 16   ;;  %s1849_s30 = smov 24   ;;  %vm934_vm6 = vcmask 261312  }
  0x3a   : > { %1547 = vmatprep.mubr.msk.bf16.mxu0 %vm1843_vm1, %v1842_v8  ;;  %p2285_p12 = scmp.ne.s32.totalorder %s2279_s25, 0 }
  0x3c   : > { %1534 = vmatpush3.bf16.msra.mxu1 %v1706_v9 }
  0x3d   : > { %1539 = vmatprep.subr.bf16.mxu1 %v1842_v8 }
  0xc1   : > { %v382_v2 = vpop.xlane.xlu0 %381 }
  0xc2   : > { %v384_v3 = vmul.f32 0.03125, %v382_v2 }
  0xc4   : > { %v385_v4 = vsub.f32 %v2014_v0, %v384_v3 }
  0xc6   : > { %v386_v5 = vmul.f32 %v385_v4, %v385_v4 }
  0xc8   : > { %v387_v6 = vsel %vm379_vm0, %v386_v5, 0.0 }
  0xc9   : > { %388 = vadd.xlane.f32.xlu0 %v387_v6 }
 0x152   : > { %v389_v10 = vpop.xlane.xlu0 %388 }
 0x153   : > { %v390_v11 = vmul.f32 0.03125, %v389_v10 }
 0x155   : > { %v391_v12 = vadd.f32 1e-06, %v390_v11 }
 0x157   : > { %1727 = vrsqrt.f32 %v391_v12 }
 0x164   : > { %v1728_v13 = vpop.eup %1727 }
 0x165   : > { %v393_v15 = vmul.f32 %v1728_v13, %v385_v4 }
 0x167   : > { %v400_v17 = vmul.f32 %v1441_v14, %v393_v15 }
 0x169   : > { %v407_v18 = vadd.f32 %v1442_v16, %v400_v17 }
 0x16b   : > { %v408_v19 = vpack.c.bf16 %v407_v18, %v407_v18 }
 0x16d   : > { %1536 = vmatmul.mubr.msk.bf16.vlgmr.msra.gmra.mxu1 %vm379_vm0, %v408_v19 }
 0x16e   : > { %1541 = vmatprep.mubr.msk.bf16.mxu1 %vm1843_vm1, %v1842_v8 }
 0x22d   : > { %v462_v20 = vpop.f32.mrf.mxu1 }
 0x22e   : > { %468 = vst.msk [vmem:[#allocation2] sm:$0xff] %vm379_vm0, %v462_v20 }
 0x22f   : > { %v1537_v21 = vpop.f32.mrf.mxu1 }
 0x231   : > { %v465_v22 = vpop.f32.mrf.mxu1 }
 0x233   : > { %v1538_v23 = vpop.f32.mrf.mxu1 }
 0x235   : > { %v698_v24 = vld [vmem:[#allocation2] sm:$0xff] }
 0x236   : > { %v699_v25 = vpack.c.bf16 %v698_v24, %v698_v24  ;;  %v581_v26 = vmul.f32 0.35355338, %v698_v24 }
 0x238   : > { %706 = vrot.lane.b32.xlu0 %v699_v25, %s1844_s18  ;;  %587 = vrot.lane.b32.xlu1 %v699_v25, %s1845_s28  ;;  %v478_v27 = vsel %vm473_vm2, %v699_v25, 0  ;;  %v536_v28 = vsel %vm535_vm3, %v699_v25, 0  ;;  %v582_v29 = vpack.c.bf16 %v581_v26, %v581_v26 }
 0x239   : > { %1540 = vmatpush3.bf16.xpose.msra.mxu1 %v478_v27  ;;  %1546 = vmatpush3.bf16.msra.mxu0 %v536_v28 }
 0x23a   : > { %1551 = vmatprep.subr.bf16.mxu1 %v1842_v8  ;;  %1557 = vmatprep.subr.bf16.mxu0 %v1842_v8 }
 0x23c   : > { %584 = vrot.lane.b32.xlu1 %v582_v29, %s1845_s28 }
 0x240   : > { %703 = vrot.lane.b32.xlu1 %v582_v29, %s1844_s18  ;;  %1542 = vmatmul.mubr.msk.bf16.vlgmr.msra.gmra.mxu1 %vm473_vm2, %v582_v29 }
 0x241   : > { %1553 = vmatprep.mubr.msk.bf16.mxu1 %vm1843_vm1, %v1842_v8 }
 0x244   : > { %825 = vrot.lane.b32.xlu1 %v699_v25, %s1846_s29 }
 0x248   : > { %822 = vrot.lane.b32.xlu1 %v582_v29, %s1846_s29  ;;  %s1482_s29 = sshll.u32 %s1927_s17, 7  ;;  %s1350_s17 = scalar_lea.sflag [#allocation6], %s2004_s15 }
 0x249   : > { %s2214_s20 = scalar_lea.hbm %s2268_s10, %s1482_s29 }
 0x2aa   : > { %v2051_v30 = vpop.permute.xlu1 %587  ;;  %v2056_v33 = vpop.permute.xlu0 %706 }
 0x2ab   : > { %v593_v31 = vsel %vm473_vm2, %v2051_v30, 0  ;;  %v712_v35 = vsel %vm473_vm2, %v2056_v33, 0  ;;  %v650_v21 = vsel %vm535_vm3, %v2051_v30, 0  ;;  %v769_v28 = vsel %vm535_vm3, %v2056_v33, 0 }
 0x2ac   : > { %1552 = vmatpush3.bf16.xpose.msra.mxu1 %v593_v31 }
 0x2ad   : > { %1563 = vmatprep.subr.bf16.mxu1 %v1842_v8 }
 0x2ae   : > { %v585_v32 = vpop.permute.xlu1 %584 }
 0x2b2   : > { %v704_v34 = vpop.permute.xlu1 %703 }
 0x2b3   : > { %1554 = vmatmul.mubr.msk.bf16.vlgmr.msra.gmra.mxu1 %vm473_vm2, %v585_v32 }
 0x2b4   : > { %1564 = vmatpush3.bf16.xpose.msra.mxu1 %v712_v35  ;;  %1565 = vmatprep.mubr.msk.bf16.mxu1 %vm1843_vm1, %v1842_v8 }
 0x2b5   : > { %1575 = vmatprep.subr.bf16.mxu1 %v1842_v8 }
 0x2b6   : > { %v2064_v36 = vpop.permute.xlu1 %825 }
 0x2b7   : > { %v831_v37 = vsel %vm473_vm2, %v2064_v36, 0  ;;  %v888_v32 = vsel %vm535_vm3, %v2064_v36, 0 }
 0x2ba   : > { %v823_v38 = vpop.permute.xlu1 %822 }
 0x2bb   : > { %1566 = vmatmul.mubr.msk.bf16.vlgmr.msra.gmra.mxu1 %vm473_vm2, %v704_v34 }
 0x2bc   : > { %1576 = vmatpush3.bf16.xpose.msra.mxu1 %v831_v37  ;;  %1577 = vmatprep.mubr.msk.bf16.mxu1 %vm1843_vm1, %v1842_v8 }
 0x2bd   : > { %1587 = vmatprep.subr.bf16.mxu1 %v1842_v8 }
 0x2c3   : > { %1578 = vmatmul.mubr.msk.bf16.vlgmr.msra.gmra.mxu1 %vm473_vm2, %v823_v38 }
 0x2c4   : > { %1591 = vmatprep.mubr.msk.bf16.mxu1 %vm1843_vm1, %v1842_v8 }
 0x300   : > { %v514_v39 = vpop.f32.mrf.mxu1 }
 0x301   : > { %v520_v40 = vsel %vm473_vm2, %v514_v39, -inf }
 0x302   : > { %521 = vmax.xlane.f32.xlu1 %v520_v40  ;;  %v1543_v41 = vpop.f32.mrf.mxu1 }
 0x304   : > { %v517_v42 = vpop.f32.mrf.mxu1 }
 0x306   : > { %v1544_v43 = vpop.f32.mrf.mxu1 }
 0x307   : > { %v1707_v43 = vld [vmem:[%s2262_s4 + $0x8] sm:$0xff]  }
 0x308   : > { %1588 = vmatpush3.bf16.msra.mxu1 %v1707_v43  ;;  %v1721_v43 = vld [vmem:[%s2267_s9 + $0x28] sm:$0xff]  }
 0x309   : > { %1589 = vmatprep.subr.bf16.mxu1 %v1842_v8 }
 0x373   : > { %v629_v44 = vpop.f32.mrf.mxu1 }
 0x374   : > { %v635_v45 = vsel %vm473_vm2, %v629_v44, -inf }
 0x375   : > { %636 = vmax.xlane.f32.xlu0 %v635_v45  ;;  %v1555_v46 = vpop.f32.mrf.mxu1  ;;  %v1708_v45 = vld [vmem:[%s2262_s4] sm:$0xff]  }
 0x376   : > { %1590 = vmatpush3.bf16.msra.mxu1 %v1708_v45  ;;  %v1723_v45 = vld [vmem:[%s2267_s9 + $0x18] sm:$0xff]  }
 0x377   : > { %v632_v47 = vpop.f32.mrf.mxu1  ;;  %1603 = vmatprep.subr.bf16.mxu1 %v1842_v8 }
 0x379   : > { %v1556_v48 = vpop.f32.mrf.mxu1 }
 0x37b   : > { %v748_v49 = vpop.f32.mrf.mxu1 }
 0x37c   : > { %v754_v50 = vsel %vm473_vm2, %v748_v49, -inf }
 0x37d   : > { %755 = vmax.xlane.f32.xlu1 %v754_v50  ;;  %v1567_v51 = vpop.f32.mrf.mxu1 }
 0x37f   : > { %v751_v52 = vpop.f32.mrf.mxu1 }
 0x381   : > { %v1568_v53 = vpop.f32.mrf.mxu1 }
 0x383   : > { %v867_v54 = vpop.f32.mrf.mxu1 }
 0x384   : > { %v873_v55 = vsel %vm473_vm2, %v867_v54, -inf }
 0x385   : > { %874 = vmax.xlane.f32.xlu1 %v873_v55  ;;  %v1579_v56 = vpop.f32.mrf.mxu1 }
 0x387   : > { %v870_v57 = vpop.f32.mrf.mxu1 }
 0x389   : > { %v1580_v58 = vpop.f32.mrf.mxu1 }
 0x38b   : > { %v522_v59 = vpop.xlane.xlu1 %521 }
 0x38c   : > { %v523_v60 = vsub.f32 %v514_v39, %v522_v59 }
 0x38e   : > { %v524_v61 = vmul.f32 1.442695, %v523_v60 }
 0x390   : > { %1729 = vpow2.f32 %v524_v61 }
 0x39d   : > { %v1730_v62 = vpop.eup %1729 }
 0x39e   : > { %v526_v63 = vsel %vm473_vm2, %v1730_v62, 0.0 }
 0x39f   : > { %527 = vadd.xlane.f32.xlu0 %v526_v63 }
 0x3fe   : > { %v637_v1 = vpop.xlane.xlu0 %636 }
 0x3ff   : > { %v638_v2 = vsub.f32 %v629_v44, %v637_v1 }
 0x401   : > { %v639_v3 = vmul.f32 1.442695, %v638_v2 }
 0x403   : > { %1731 = vpow2.f32 %v639_v3 }
 0x406   : > { %v756_v4 = vpop.xlane.xlu1 %755 }
 0x407   : > { %v757_v5 = vsub.f32 %v748_v49, %v756_v4 }
 0x409   : > { %v758_v6 = vmul.f32 1.442695, %v757_v5 }
 0x40b   : > { %1733 = vpow2.f32 %v758_v6 }
 0x40e   : > { %v875_v7 = vpop.xlane.xlu1 %874 }
 0x40f   : > { %v876_v9 = vsub.f32 %v867_v54, %v875_v7  ;;  %v1710_v7 = vld [vmem:[%s2265_s7] sm:$0xff]  }
 0x410   : > { %v1732_v10 = vpop.eup %1731 }
 0x411   : > { %v877_v11 = vmul.f32 1.442695, %v876_v9  ;;  %v641_v12 = vsel %vm473_vm2, %v1732_v10, 0.0  ;;  %v1711_v9 = vld [vmem:[%s2266_s8 + $0x38] sm:$0xff]  }
 0x412   : > { %642 = vadd.xlane.f32.xlu1 %v641_v12  ;;  %v1714_v12 = vld [vmem:[%s2266_s8 + $0x20] sm:$0xff]  }
 0x413   : > { %1735 = vpow2.f32 %v877_v11  ;;  %v1713_v11 = vld [vmem:[%s2266_s8 + $0x28] sm:$0xff]  }
 0x418   : > { %v1734_v13 = vpop.eup %1733 }
 0x419   : > { %v760_v14 = vsel %vm473_vm2, %v1734_v13, 0.0 }
 0x41a   : > { %761 = vadd.xlane.f32.xlu0 %v760_v14  ;;  %v1716_v14 = vld [vmem:[%s2266_s8 + $0x10] sm:$0xff]  }
 0x420   : > { %v1736_v15 = vpop.eup %1735 }
 0x421   : > { %v879_v16 = vsel %vm473_vm2, %v1736_v15, 0.0 }
 0x422   : > { %880 = vadd.xlane.f32.xlu1 %v879_v16 }
 0x428   : > { %v528_v17 = vpop.xlane.xlu0 %527 }
 0x429   : > { %1737 = vrcp.f32 %v528_v17 }
 0x436   : > { %v1738_v18 = vpop.eup %1737 }
 0x437   : > { %v530_v19 = vmul.f32 %v1738_v18, %v1730_v62 }
 0x439   : > { %v531_v20 = vpack.c.bf16 %v530_v19, %v530_v19  ;;  %v1457_v19 = vld [vmem:[%s2263_s5] ss:$0 sm:$0xff] }
 0x43b   : > { %1548 = vmatmul.mubr.msk.bf16.vlgmr.msra.gmra.mxu0 %vm473_vm2, %v531_v20 }
 0x43c   : > { %1558 = vmatpush3.bf16.msra.mxu0 %v650_v21  ;;  %1559 = vmatprep.mubr.msk.bf16.mxu0 %vm1843_vm1, %v1842_v8  ;;  %v1458_v21 = vld [vmem:[%s2264_s6] ss:$0 sm:$0xff] }
 0x43d   : > { %1569 = vmatprep.subr.bf16.mxu0 %v1842_v8 }
 0x49b   : > { %v643_v22 = vpop.xlane.xlu1 %642 }
 0x49c   : > { %1739 = vrcp.f32 %v643_v22 }
 0x4a3   : > { %v762_v23 = vpop.xlane.xlu0 %761 }
 0x4a4   : > { %1741 = vrcp.f32 %v762_v23 }
 0x4a9   : > { %v1740_v24 = vpop.eup %1739 }
 0x4aa   : > { %v645_v25 = vmul.f32 %v1740_v24, %v1732_v10  ;;  %v1712_v10 = vld [vmem:[%s2266_s8 + $0x30] sm:$0xff]  }
 0x4ab   : > { %v881_v26 = vpop.xlane.xlu1 %880 }
 0x4ac   : > { %1743 = vrcp.f32 %v881_v26  ;;  %v646_v27 = vpack.c.bf16 %v645_v25, %v645_v25  ;;  %v1717_v25 = vld [vmem:[%s2266_s8 + $0x8] sm:$0xff]   ;;  %v1718_v26 = vld [vmem:[%s2266_s8] sm:$0xff]  }
 0x4ae   : > { %1560 = vmatmul.mubr.msk.bf16.vlgmr.msra.gmra.mxu0 %vm473_vm2, %v646_v27 }
 0x4af   : > { %1570 = vmatpush3.bf16.msra.mxu0 %v769_v28  ;;  %1571 = vmatprep.mubr.msk.bf16.mxu0 %vm1843_vm1, %v1842_v8 }
 0x4b0   : > { %1581 = vmatprep.subr.bf16.mxu0 %v1842_v8 }
 0x4b1   : > { %v1742_v29 = vpop.eup %1741 }
 0x4b2   : > { %v764_v30 = vmul.f32 %v1742_v29, %v1734_v13  ;;  %v1715_v13 = vld [vmem:[%s2266_s8 + $0x18] sm:$0xff]  }
 0x4b4   : > { %v765_v31 = vpack.c.bf16 %v764_v30, %v764_v30 }
 0x4b6   : > { %1572 = vmatmul.mubr.msk.bf16.vlgmr.msra.gmra.mxu0 %vm473_vm2, %v765_v31 }
 0x4b7   : > { %1582 = vmatpush3.bf16.msra.mxu0 %v888_v32  ;;  %1583 = vmatprep.mubr.msk.bf16.mxu0 %vm1843_vm1, %v1842_v8 }
 0x4b8   : > { %1595 = vmatprep.subr.bf16.mxu0 %v1842_v8 }
 0x4b9   : > { %v1744_v33 = vpop.eup %1743 }
 0x4ba   : > { %v883_v34 = vmul.f32 %v1744_v33, %v1736_v15 }
 0x4bc   : > { %v884_v35 = vpack.c.bf16 %v883_v34, %v883_v34 }
 0x4be   : > { %1584 = vmatmul.mubr.msk.bf16.vlgmr.msra.gmra.mxu0 %vm473_vm2, %v884_v35 }
 0x4bf   : > { %1599 = vmatprep.mubr.msk.bf16.mxu0 %vm1843_vm1, %v1842_v8 }
 0x4fb   : > { %v572_v37 = vpop.f32.mrf.mxu0 }
 0x4fc   : > { %578 = vst.msk [vmem:[#allocation3] sm:$0xff] %vm473_vm2, %v572_v37 }
 0x4fd   : > { %v1549_v36 = vpop.f32.mrf.mxu0 }
 0x4ff   : > { %v575_v38 = vpop.f32.mrf.mxu0 }
 0x500   : > { %v1719_v38 = vld [vmem:[%s2267_s9 + $0x38] sm:$0xff]  }
 0x501   : > { %v1550_v39 = vpop.f32.mrf.mxu0 }
 0x56e   : > { %v686_v40 = vpop.f32.mrf.mxu0 }
 0x56f   : > { %693 = vrot.lane.b32.xlu0 %v686_v40, %s1847_s21  ;;  %s374_s21 = scalar_lea.vmem [#allocation7], %s1439_s19 }
 0x570   : > { %v1561_v41 = vpop.f32.mrf.mxu0  ;;  %s1363_s22 = sshll.u32 %s374_s21, 4  ;;  %s2216_s22 = int_to_ptr.vmem [resolvable:$true] %s1363_s22 }
 0x571   : > { %s1775_s19 = scalar_lea.vmem %s2216_s22, 128 }
 0x572   : > { %v689_v42 = vpop.f32.mrf.mxu0  ;;  %p1776_p11 = scmp.ne.s32.totalorder %s2216_s22, %s1775_s19 }
 0x573   : > { %v1720_v42 = vld [vmem:[%s2267_s9 + $0x30] sm:$0xff]  }
 0x574   : > { %v1562_v44 = vpop.f32.mrf.mxu0  ;;  %p1777_p13 = pnand %p1776_p11, %p2285_p12 }
 0x575   : > { %v1722_v44 = vld [vmem:[%s2267_s9 + $0x20] sm:$0xff]  }
 0x576   : > { %v805_v46 = vpop.f32.mrf.mxu0  ;;  %p1778_p1 = pneg %p1777_p13 }
 0x577   : > { %812 = vrot.lane.b32.xlu1 %v805_v46, %s1848_s23  ;;  %v1724_v46 = vld [vmem:[%s2267_s9 + $0x10] sm:$0xff]   ;;  %s1850_s23 = smov [#allocation7]  }
 0x578   : > { %v1573_v47 = vpop.f32.mrf.mxu0 }
 0x579   : > { %v1725_v47 = vld [vmem:[%s2267_s9 + $0x8] sm:$0xff]  }
 0x57a   : > { %v808_v48 = vpop.f32.mrf.mxu0 }
 0x57b   : > { %v1726_v48 = vld [vmem:[%s2267_s9] sm:$0xff]  }
 0x57c   : > { %v1574_v49 = vpop.f32.mrf.mxu0 }
 0x57e   : > { %v924_v50 = vpop.f32.mrf.mxu0 }
 0x57f   : > { %931 = vrot.lane.b32.xlu1 %v924_v50, %s1849_s30  ;;  %s1779_s30 = sshll.u32 %s1850_s23, 4  ;;  %s1780_s30 = int_to_ptr.vmem [resolvable:$false] %s1779_s30 }
 0x580   : > { %v1585_v51 = vpop.f32.mrf.mxu0  ;;  %s1781_s11 = scalar_lea.vmem %s1780_s30, 256  ;;  %p1782_p3 = scmp.lt.s32.totalorder %s2216_s22, %s1780_s30 }
 0x581   : > { %p1783_p5 = scmp.lt.s32.totalorder %s1781_s11, %s1775_s19 }
 0x582   : > { %v927_v52 = vpop.f32.mrf.mxu0 }
 0x583   : > { %p1784_p8 = por %p1783_p5, %p1782_p3 }
 0x584   : > { %v1586_v53 = vpop.f32.mrf.mxu0 }
 0x585   : > { %p1785_p10 = pnand %p1784_p8, %p1778_p1 }
 0x5e1   : > { %v694_v54 = vpop.permute.xlu0 %693 }
 0x5e2   : > { %697 = vst.msk [vmem:[#allocation3] sm:$0xff] %vm696_vm4, %v694_v54 }
 0x5e9   : > { %v813_v55 = vpop.permute.xlu1 %812 }
 0x5ea   : > { %816 = vst.msk [vmem:[#allocation3] sm:$0xff] %vm815_vm5, %v813_v55 }
 0x5f1   : > { %v932_v56 = vpop.permute.xlu1 %931 }
 0x5f2   : > { %935 = vst.msk [vmem:[#allocation3] sm:$0xff] %vm934_vm6, %v932_v56 }
 0x5f9   : > { %v936_v57 = vld [vmem:[#allocation3] sm:$0xff] }
 0x5fa   : > { %v937_v58 = vpack.c.bf16 %v936_v57, %v936_v57 }
 0x5fc   : > { %1592 = vmatmul.mubr.msk.bf16.vlgmr.msra.gmra.mxu1 %vm379_vm0, %v937_v58 }
 0x5fd   : > { %1619 = vmatprep.mubr.msk.bf16.mxu1 %vm1843_vm1, %v1842_v8  ;;  %1604 = vmatpush3.bf16.msra.mxu1 %v1711_v9 }
 0x5fe   : > { %1605 = vmatprep.subr.bf16.mxu1 %v1842_v8 }
 0x601   : > { %1606 = vmatpush3.bf16.msra.mxu1 %v1712_v10 }
 0x602   : > { %1607 = vmatprep.subr.bf16.mxu1 %v1842_v8 }
 0x605   : > { %1608 = vmatpush3.bf16.msra.mxu1 %v1713_v11 }
 0x606   : > { %1609 = vmatprep.subr.bf16.mxu1 %v1842_v8 }
 0x609   : > { %1610 = vmatpush3.bf16.msra.mxu1 %v1714_v12 }
 0x60a   : > { %1611 = vmatprep.subr.bf16.mxu1 %v1842_v8 }
 0x60d   : > { %1612 = vmatpush3.bf16.msra.mxu1 %v1715_v13 }
 0x60e   : > { %1613 = vmatprep.subr.bf16.mxu1 %v1842_v8 }
 0x611   : > { %1614 = vmatpush3.bf16.msra.mxu1 %v1716_v14 }
 0x612   : > { %1615 = vmatprep.subr.bf16.mxu1 %v1842_v8 }
 0x615   : > { %1616 = vmatpush3.bf16.msra.mxu1 %v1717_v25 }
 0x616   : > { %1617 = vmatprep.subr.bf16.mxu1 %v1842_v8 }
 0x619   : > { %1618 = vmatpush3.bf16.msra.mxu1 %v1718_v26 }
 0x6bc   : > { %v991_v59 = vpop.f32.mrf.mxu1 }
 0x6bd   : > { %v2117_v60 = vadd.f32 %v991_v59, %v2014_v0  ;;  %v1709_v0 = vld [vmem:[%s2265_s7 + $0x8] sm:$0xff]  }
 0x6be   : > { %v1593_v61 = vpop.f32.mrf.mxu1  ;;  %1596 = vmatpush3.bf16.msra.mxu0 %v1709_v0 }
 0x6bf   : > { %v999_v62 = vsel %vm379_vm0, %v2117_v60, 0.0  ;;  %1597 = vmatprep.subr.bf16.mxu0 %v1842_v8 }
 0x6c0   : > { %1000 = vadd.xlane.f32.xlu0 %v999_v62  ;;  %v994_v63 = vpop.f32.mrf.mxu1 }
 0x6c2   : > { %v1594_v1 = vpop.f32.mrf.mxu1  ;;  %1598 = vmatpush3.bf16.msra.mxu0 %v1710_v7 }
 0x6c3   : > { %1623 = vmatprep.subr.bf16.mxu0 %v1842_v8 }
 0x749   : > { %v1001_v2 = vpop.xlane.xlu0 %1000 }
 0x74a   : > { %v1002_v3 = vmul.f32 0.03125, %v1001_v2 }
 0x74c   : > { %v1003_v4 = vsub.f32 %v2117_v60, %v1002_v3 }
 0x74e   : > { %v1004_v5 = vmul.f32 %v1003_v4, %v1003_v4 }
 0x750   : > { %v1005_v6 = vsel %vm379_vm0, %v1004_v5, 0.0 }
 0x751   : > { %1006 = vadd.xlane.f32.xlu1 %v1005_v6 }
 0x7da   : > { %v1007_v15 = vpop.xlane.xlu1 %1006 }
 0x7db   : > { %v1008_v16 = vmul.f32 0.03125, %v1007_v15 }
 0x7dd   : > { %v1009_v17 = vadd.f32 1e-06, %v1008_v16 }
 0x7df   : > { %1745 = vrsqrt.f32 %v1009_v17 }
 0x7ec   : > { %v1746_v18 = vpop.eup %1745 }
 0x7ed   : > { %v1011_v20 = vmul.f32 %v1746_v18, %v1003_v4 }
 0x7ef   : > { %v1018_v22 = vmul.f32 %v1457_v19, %v1011_v20 }
 0x7f1   : > { %v1025_v23 = vadd.f32 %v1458_v21, %v1018_v22 }
 0x7f3   : > { %v1026_v24 = vpack.c.bf16 %v1025_v23, %v1025_v23 }
 0x7f5   : > { %1600 = vmatmul.mubr.msk.bf16.vlgmr.msra.gmra.mxu0 %vm379_vm0, %v1026_v24 }
 0x7f6   : > { %1624 = vmatpush3.bf16.msra.mxu0 %v1709_v0  ;;  %1627 = vmatprep.mubr.msk.bf16.mxu0 %vm1843_vm1, %v1842_v8 }
 0x7f7   : > { %1625 = vmatprep.subr.bf16.mxu0 %v1842_v8 }
 0x7fa   : > { %1626 = vmatpush3.bf16.msra.mxu0 %v1710_v7 }
 0x7fb   : > { %1631 = vmatprep.subr.bf16.mxu0 %v1842_v8 }
 0x8b5   : > { %v1096_v27 = vpop.f32.mrf.mxu0 }
 0x8b6   : > { %v1102_v28 = vmul.f32 0.1, %v1096_v27 }
 0x8b7   : > { %v1601_v29 = vpop.f32.mrf.mxu0 }
 0x8b8   : > { %v1462_v30 = vadd.f32 -0.01, %v1102_v28 }
 0x8b9   : > { %v1099_v31 = vpop.f32.mrf.mxu0 }
 0x8ba   : > { %v1104_v32 = vmax.f32 %v1462_v30, 0.0 }
 0x8bb   : > { %v1602_v33 = vpop.f32.mrf.mxu0 }
 0x8bc   : > { %v1105_v34 = vpack.c.bf16 %v1104_v32, %v1104_v32 }
 0x8be   : > { %1620 = vmatmul.mubr.bf16.vlgmr.msra.gmra.mxu1 %v1105_v34 }
 0x97e   : > { %v1188_v35 = vpop.f32.mrf.mxu1 }
 0x97f   : > { %v1194_v37 = vsub.f32 %v1188_v35, %v1025_v23 }
 0x980   : > { %v1621_v36 = vpop.f32.mrf.mxu1 }
 0x981   : > { %v1195_v39 = vpack.c.bf16 %v1194_v37, %v1194_v37 }
 0x982   : > { %v1191_v40 = vpop.f32.mrf.mxu1 }
 0x983   : > { %1628 = vmatmul.mubr.msk.bf16.vlgmr.msra.gmra.mxu0 %vm379_vm0, %v1195_v39 }
 0x984   : > { %v1622_v41 = vpop.f32.mrf.mxu1  ;;  %1632 = vmatpush3.bf16.msra.mxu0 %v1719_v38  ;;  %1647 = vmatprep.mubr.msk.bf16.mxu0 %vm1843_vm1, %v1842_v8 }
 0x985   : > { %1633 = vmatprep.subr.bf16.mxu0 %v1842_v8 }
 0x988   : > { %1634 = vmatpush3.bf16.msra.mxu0 %v1720_v42 }
 0x989   : > { %1635 = vmatprep.subr.bf16.mxu0 %v1842_v8 }
 0x98c   : > { %1636 = vmatpush3.bf16.msra.mxu0 %v1721_v43 }
 0x98d   : > { %1637 = vmatprep.subr.bf16.mxu0 %v1842_v8 }
 0x990   : > { %1638 = vmatpush3.bf16.msra.mxu0 %v1722_v44 }
 0x991   : > { %1639 = vmatprep.subr.bf16.mxu0 %v1842_v8 }
 0x994   : > { %1640 = vmatpush3.bf16.msra.mxu0 %v1723_v45 }
 0x995   : > { %1641 = vmatprep.subr.bf16.mxu0 %v1842_v8 }
 0x998   : > { %1642 = vmatpush3.bf16.msra.mxu0 %v1724_v46 }
 0x999   : > { %1643 = vmatprep.subr.bf16.mxu0 %v1842_v8 }
 0x99c   : > { %1644 = vmatpush3.bf16.msra.mxu0 %v1725_v47 }
 0x99d   : > { %1645 = vmatprep.subr.bf16.mxu0 %v1842_v8 }
 0x9a0   : > { %1646 = vmatpush3.bf16.msra.mxu0 %v1726_v48 }
 0xa43   : > { %v1233_v49 = vpop.f32.mrf.mxu0 }
 0xa44   : > { %v1239_v50 = vmul.f32 0.1, %v1233_v49 }
 0xa45   : > { %v1629_v51 = vpop.f32.mrf.mxu0 }
 0xa46   : > { %v1240_v52 = vsub.f32 %v1104_v32, %v1239_v50 }
 0xa47   : > { %v1236_v53 = vpop.f32.mrf.mxu0 }
 0xa48   : > { %v1472_v54 = vadd.f32 -0.01, %v1240_v52 }
 0xa49   : > { %v1630_v55 = vpop.f32.mrf.mxu0 }
 0xa4a   : > { %v1242_v56 = vmax.f32 %v1472_v54, 0.0 }
 0xa4c   : > { %v1243_v57 = vpack.c.bf16 %v1242_v56, %v1242_v56 }
 0xa4e   : > { %1648 = vmatmul.mubr.bf16.vlgmr.msra.gmra.mxu0 %v1243_v57 }
 0xb0e   : > { %v1342_v8 = vpop.f32.mrf.mxu0 }
 0xb0f   : > { %v1343_v58 = vadd.f32 %v1342_v8, %v2117_v60 }
 0xb10   : > { %v1649_v59 = vpop.f32.mrf.mxu0 }
 0xb11   : > { %1348 = vst.msk [vmem:[%s374_s21] sm:$0xff] %vm379_vm0, %v1343_v58 }
 0xb12   : > { %v1345_v61 = vpop.f32.mrf.mxu0 }
 0xb13   : > { %1788 = shalt.err (!%p1785_p10)
}
 0xb14   : > { %s1789_s27 = scalar_lea.hbm %s2214_s20, 128  ;;  %s1793_s28 = scalar_lea.hbm %s2268_s10, 256 }
 0xb15   : > { %p1790_p2 = scmp.ne.s32.totalorder %s2214_s20, %s1789_s27  ;;  %p1794_p7 = scmp.lt.s32.totalorder %s2214_s20, %s2268_s10 }
 0xb16   : > { %p1795_p0 = scmp.lt.s32.totalorder %s1793_s28, %s1789_s27 }
 0xb17   : > { %p1791_p4 = pnand %p1790_p2, %p2285_p12 }
 0xb18   : > { %p1796_p6 = por %p1795_p0, %p1794_p7 }
 0xb19   : > { %p1792_p9 = pneg %p1791_p4 }
 0xb1b   : > { %p1797_p11 = pnand %p1796_p6, %p1792_p9 }
 0xb1d   : > { %1800 = shalt.err (!%p1797_p11)
}
 0xb1e   : > { %1653 = dma.vmem_to_hbm [thread:$0]  (%p2285_p12), %s2216_s22, 128, %s2214_s20, %s1350_s17   ;;  %v1650_v60 = vpop.f32.mrf.mxu0 }
 0xb1f PF: > { %s1375_s12 = sand.u32 1, %s1827_s13   ;;  %p2286_p13 = scmp.ne.s32.totalorder %s2280_s26, 0 }
 0xb20   : > { %p2287_p1 = scmp.ge.s32.totalorder %s1839_s16, 2  ;;  %s1376_s24 = scalar_lea.sflag [#allocation6], %s1375_s12 }
 0xb22   : > { %p1660_p3 = pnand %p2287_p1, %p2286_p13 }
 0xb24   : > { %p1661_p5 = pneg %p1660_p3 }
 0xb26   : > { %1822 = dma.done.wait (%p1661_p5), %s1376_s24, 128  }
 0xb27   : > { %1824 = vsyncadd (%p1661_p5), %s1376_s24, 4294967168  ;;  %s2288_s16 = sld [smem:[#allocation11_spill]]  ;;  %s2291_s13 = smov %s1831_s14 }
 0xb28   : > { %s2289_s19 = sld [smem:[#allocation10_spill]] }
 0xb29   : > { %s2290_s15 = sld [smem:[#allocation12_spill]] }
 0xb2d   : > { %p23_p8 = scmp.ge.s32.totalorder %s2288_s16, 4  }
 0xb2e   : > { %s2292_s14 = smov %s2289_s19 }
 0xb2f   :  { %25 = sbr.rel (!%p23_p8) target bundleno = 5 (0x5), region = 105 }
 0xb34   :  { %1381 = vsyncpa [#allocation5], 1 }
 0xb35   :  { %1383 = vsyncpa [#allocation5 + $0x1], 1 }
 0xb36   :  { %1384 = vsyncpa [#allocation6], 1 }
 0xb37   :  { %1386 = vsyncpa [#allocation6 + $0x1], 1 }

// kernel: transformer_forward.2
= control target key start
LH: loop header
LB: loop body
LE: loop exit
PB: predicated region body
PF: predicated region fallthrough
CT: control target
= control target key end

     0   :  { %s1726_s13 = smov 0   ;;  %s1945_s0 = inlined_call_operand.vmem [shape: f32[2,8,32], index: 0, kind: input, shape index: {}, may-alias: {0,10}]   ;;  %s1946_s1 = inlined_call_operand.vmem [shape: f32[1,32], index: 1, kind: input, shape index: {}]   ;;  %s1947_s2 = inlined_call_operand.vmem [shape: f32[1,32], index: 2, kind: input, shape index: {}]   ;;  %s1948_s3 = inlined_call_operand.vmem [shape: bf16[32,32], index: 3, kind: input, shape index: {}]   ;;  %s1949_s4 = inlined_call_operand.vmem [shape: bf16[32,32], index: 4, kind: input, shape index: {}]   ;;  %s1950_s5 = inlined_call_operand.vmem [shape: f32[1,32], index: 5, kind: input, shape index: {}]   ;;  %s1951_s6 = inlined_call_operand.vmem [shape: f32[1,32], index: 6, kind: input, shape index: {}]   ;;  %s1952_s7 = inlined_call_operand.vmem [shape: bf16[32,128], index: 7, kind: input, shape index: {}]   ;;  %s1953_s8 = inlined_call_operand.vmem [shape: bf16[128,32], index: 8, kind: input, shape index: {}]   ;;  %s1954_s9 = inlined_call_operand.vmem [shape: bf16[128,32], index: 9, kind: input, shape index: {}]   ;;  %s1955_s10 = inlined_call_operand.vmem [shape: f32[2,8,32], index: 10, kind: output, shape index: {}, may-alias: {0,10}]  }
   0x1 LB: > { %s1382_s14 = sadd.s32 4294967295, %s1661_s13   ;;  %p1386_p0 = scmp.ge.s32.totalorder %s1661_s13, 1  ;;  %s1661_s13 = sphi %s1726_s13, %s20_s13  }
   0x2   : > { %p311_p1 = scmp.lt.s32.totalorder %s1661_s13, 3 }
   0x4   : > { %p312_p2 = pnand %p1386_p0, %p311_p1 }
   0x5   : > { %p347_p3 = scmp.lt.s32.totalorder (!%p312_p2), %s1382_s14, 1  ;;  %s1665_s27 = smov (!%p312_p2), 112  }
   0x6   : > { %315 = sbr.rel (%p312_p2) target bundleno = 2797 (0xaed), region = 60  ;;  %s1666_s28 = smov (!%p312_p2), 120  }
   0x7   : > { %s1667_s29 = smov (!%p312_p2), 104   ;;  %s1668_s30 = smov (!%p312_p2), 8  }
   0x8   : > { %s1670_s19 = smov (!%p312_p2), 24  }
   0xb   : > { %s1957_s14 = smov (!%p347_p3, %s1382_s14), 1  ;;  %vm359_vm0 = vcmask 261120   ;;  %v1613_v7 = vld [vmem:[%s1948_s3 + $0x8] sm:$0xff]   ;;  %v1663_v8 = vmov 0.0   ;;  %vm1664_vm1 = vmmov 0   ;;  %v1614_v9 = vld [vmem:[%s1948_s3] sm:$0xff]  }
   0xc   : > { %s1387_s15 = sshll.u32 %s1957_s14, 3  ;;  %1477 = vmatprep.subr.bf16.mxu1 %v1663_v8  ;;  %1481 = vmatprep.mubr.msk.bf16.mxu1 %vm1664_vm1, %v1663_v8  ;;  %v1389_v14 = vld [vmem:[%s1946_s1] ss:$0 sm:$0xff]  ;;  %vm453_vm2 = vcmask 64512   ;;  %vm515_vm3 = vcmask 1043456   ;;  %vm676_vm4 = vcmask 130112  }
   0xd   : > { %s350_s18 = scalar_lea.vmem %s1945_s0, %s1387_s15  ;;  %1478 = vmatpush3.bf16.msra.mxu1 %v1613_v7  ;;  %1491 = vmatprep.subr.bf16.mxu0 %v1663_v8  ;;  %v1390_v16 = vld [vmem:[%s1947_s2] ss:$0 sm:$0xff]  ;;  %vm795_vm5 = vcmask 195712   ;;  %vm914_vm6 = vcmask 261312  }
   0xe   : > { %v1742_v0 = vld [vmem:[%s350_s18] sm:$0xff]  ;;  %1479 = vmatprep.subr.bf16.mxu1 %v1663_v8  ;;  %1493 = vmatprep.mubr.msk.bf16.mxu0 %vm1664_vm1, %v1663_v8  ;;  %s1669_s18 = smov 16  }
   0xf   : > { %v360_v1 = vsel %vm359_vm0, %v1742_v0, 0.0 }
  0x10   : > { %361 = vadd.xlane.f32.xlu0 %v360_v1 }
  0x11   : > { %1480 = vmatpush3.bf16.msra.mxu1 %v1614_v9 }
  0x12   : > { %1485 = vmatprep.subr.bf16.mxu1 %v1663_v8 }
  0x99   : > { %v362_v2 = vpop.xlane.xlu0 %361 }
  0x9a   : > { %v364_v3 = vmul.f32 0.03125, %v362_v2 }
  0x9c   : > { %v365_v4 = vsub.f32 %v1742_v0, %v364_v3 }
  0x9e   : > { %v366_v5 = vmul.f32 %v365_v4, %v365_v4 }
  0xa0   : > { %v367_v6 = vsel %vm359_vm0, %v366_v5, 0.0 }
  0xa1   : > { %368 = vadd.xlane.f32.xlu0 %v367_v6 }
 0x12a   : > { %v369_v10 = vpop.xlane.xlu0 %368 }
 0x12b   : > { %v370_v11 = vmul.f32 0.03125, %v369_v10 }
 0x12d   : > { %v371_v12 = vadd.f32 1e-06, %v370_v11 }
 0x12f   : > { %1635 = vrsqrt.f32 %v371_v12 }
 0x13c   : > { %v1636_v13 = vpop.eup %1635 }
 0x13d   : > { %v373_v15 = vmul.f32 %v1636_v13, %v365_v4 }
 0x13f   : > { %v380_v17 = vmul.f32 %v1389_v14, %v373_v15 }
 0x141   : > { %v387_v18 = vadd.f32 %v1390_v16, %v380_v17 }
 0x143   : > { %v388_v19 = vpack.c.bf16 %v387_v18, %v387_v18 }
 0x145   : > { %1482 = vmatmul.mubr.msk.bf16.vlgmr.msra.gmra.mxu1 %vm359_vm0, %v388_v19 }
 0x146   : > { %1487 = vmatprep.mubr.msk.bf16.mxu1 %vm1664_vm1, %v1663_v8 }
 0x205   : > { %v442_v20 = vpop.f32.mrf.mxu1 }
 0x206   : > { %448 = vst.msk [vmem:[#allocation2] sm:$0xff] %vm359_vm0, %v442_v20 }
 0x207   : > { %v1483_v21 = vpop.f32.mrf.mxu1 }
 0x209   : > { %v445_v22 = vpop.f32.mrf.mxu1 }
 0x20b   : > { %v1484_v23 = vpop.f32.mrf.mxu1 }
 0x20d   : > { %v678_v24 = vld [vmem:[#allocation2] sm:$0xff] }
 0x20e   : > { %v679_v25 = vpack.c.bf16 %v678_v24, %v678_v24  ;;  %v561_v26 = vmul.f32 0.35355338, %v678_v24 }
 0x210   : > { %686 = vrot.lane.b32.xlu0 %v679_v25, %s1665_s27  ;;  %567 = vrot.lane.b32.xlu1 %v679_v25, %s1666_s28  ;;  %v458_v27 = vsel %vm453_vm2, %v679_v25, 0  ;;  %v516_v28 = vsel %vm515_vm3, %v679_v25, 0  ;;  %v562_v29 = vpack.c.bf16 %v561_v26, %v561_v26 }
 0x211   : > { %1486 = vmatpush3.bf16.xpose.msra.mxu1 %v458_v27  ;;  %1492 = vmatpush3.bf16.msra.mxu0 %v516_v28 }
 0x212   : > { %1497 = vmatprep.subr.bf16.mxu1 %v1663_v8  ;;  %1503 = vmatprep.subr.bf16.mxu0 %v1663_v8 }
 0x214   : > { %564 = vrot.lane.b32.xlu1 %v562_v29, %s1666_s28  ;;  %s354_s28 = scalar_lea.vmem %s1955_s10, %s1387_s15 }
 0x218   : > { %683 = vrot.lane.b32.xlu1 %v562_v29, %s1665_s27  ;;  %1488 = vmatmul.mubr.msk.bf16.vlgmr.msra.gmra.mxu1 %vm453_vm2, %v562_v29 }
 0x219   : > { %1499 = vmatprep.mubr.msk.bf16.mxu1 %vm1664_vm1, %v1663_v8 }
 0x21c   : > { %805 = vrot.lane.b32.xlu1 %v679_v25, %s1667_s29 }
 0x220   : > { %802 = vrot.lane.b32.xlu1 %v562_v29, %s1667_s29 }
 0x282   : > { %v1779_v30 = vpop.permute.xlu1 %567  ;;  %v1784_v33 = vpop.permute.xlu0 %686 }
 0x283   : > { %v573_v31 = vsel %vm453_vm2, %v1779_v30, 0  ;;  %v692_v35 = vsel %vm453_vm2, %v1784_v33, 0  ;;  %v630_v21 = vsel %vm515_vm3, %v1779_v30, 0  ;;  %v749_v28 = vsel %vm515_vm3, %v1784_v33, 0 }
 0x284   : > { %1498 = vmatpush3.bf16.xpose.msra.mxu1 %v573_v31 }
 0x285   : > { %1509 = vmatprep.subr.bf16.mxu1 %v1663_v8 }
 0x286   : > { %v565_v32 = vpop.permute.xlu1 %564 }
 0x28a   : > { %v684_v34 = vpop.permute.xlu1 %683 }
 0x28b   : > { %1500 = vmatmul.mubr.msk.bf16.vlgmr.msra.gmra.mxu1 %vm453_vm2, %v565_v32 }
 0x28c   : > { %1510 = vmatpush3.bf16.xpose.msra.mxu1 %v692_v35  ;;  %1511 = vmatprep.mubr.msk.bf16.mxu1 %vm1664_vm1, %v1663_v8 }
 0x28d   : > { %1521 = vmatprep.subr.bf16.mxu1 %v1663_v8 }
 0x28e   : > { %v1792_v36 = vpop.permute.xlu1 %805 }
 0x28f   : > { %v811_v37 = vsel %vm453_vm2, %v1792_v36, 0  ;;  %v868_v32 = vsel %vm515_vm3, %v1792_v36, 0 }
 0x292   : > { %v803_v38 = vpop.permute.xlu1 %802 }
 0x293   : > { %1512 = vmatmul.mubr.msk.bf16.vlgmr.msra.gmra.mxu1 %vm453_vm2, %v684_v34 }
 0x294   : > { %1522 = vmatpush3.bf16.xpose.msra.mxu1 %v811_v37  ;;  %1523 = vmatprep.mubr.msk.bf16.mxu1 %vm1664_vm1, %v1663_v8 }
 0x295   : > { %1533 = vmatprep.subr.bf16.mxu1 %v1663_v8 }
 0x29b   : > { %1524 = vmatmul.mubr.msk.bf16.vlgmr.msra.gmra.mxu1 %vm453_vm2, %v803_v38 }
 0x29c   : > { %1537 = vmatprep.mubr.msk.bf16.mxu1 %vm1664_vm1, %v1663_v8 }
 0x2d8   : > { %v494_v39 = vpop.f32.mrf.mxu1 }
 0x2d9   : > { %v500_v40 = vsel %vm453_vm2, %v494_v39, -inf }
 0x2da   : > { %501 = vmax.xlane.f32.xlu1 %v500_v40  ;;  %v1489_v41 = vpop.f32.mrf.mxu1 }
 0x2dc   : > { %v497_v42 = vpop.f32.mrf.mxu1 }
 0x2de   : > { %v1490_v43 = vpop.f32.mrf.mxu1 }
 0x2df   : > { %v1615_v43 = vld [vmem:[%s1949_s4 + $0x8] sm:$0xff]  }
 0x2e0   : > { %1534 = vmatpush3.bf16.msra.mxu1 %v1615_v43  ;;  %v1629_v43 = vld [vmem:[%s1954_s9 + $0x28] sm:$0xff]  }
 0x2e1   : > { %1535 = vmatprep.subr.bf16.mxu1 %v1663_v8 }
 0x34b   : > { %v609_v44 = vpop.f32.mrf.mxu1 }
 0x34c   : > { %v615_v45 = vsel %vm453_vm2, %v609_v44, -inf }
 0x34d   : > { %616 = vmax.xlane.f32.xlu0 %v615_v45  ;;  %v1501_v46 = vpop.f32.mrf.mxu1  ;;  %v1616_v45 = vld [vmem:[%s1949_s4] sm:$0xff]  }
 0x34e   : > { %1536 = vmatpush3.bf16.msra.mxu1 %v1616_v45  ;;  %v1631_v45 = vld [vmem:[%s1954_s9 + $0x18] sm:$0xff]  }
 0x34f   : > { %v612_v47 = vpop.f32.mrf.mxu1  ;;  %1549 = vmatprep.subr.bf16.mxu1 %v1663_v8 }
 0x351   : > { %v1502_v48 = vpop.f32.mrf.mxu1 }
 0x353   : > { %v728_v49 = vpop.f32.mrf.mxu1 }
 0x354   : > { %v734_v50 = vsel %vm453_vm2, %v728_v49, -inf }
 0x355   : > { %735 = vmax.xlane.f32.xlu1 %v734_v50  ;;  %v1513_v51 = vpop.f32.mrf.mxu1 }
 0x357   : > { %v731_v52 = vpop.f32.mrf.mxu1 }
 0x359   : > { %v1514_v53 = vpop.f32.mrf.mxu1 }
 0x35b   : > { %v847_v54 = vpop.f32.mrf.mxu1 }
 0x35c   : > { %v853_v55 = vsel %vm453_vm2, %v847_v54, -inf }
 0x35d   : > { %854 = vmax.xlane.f32.xlu1 %v853_v55  ;;  %v1525_v56 = vpop.f32.mrf.mxu1 }
 0x35f   : > { %v850_v57 = vpop.f32.mrf.mxu1 }
 0x361   : > { %v1526_v58 = vpop.f32.mrf.mxu1 }
 0x363   : > { %v502_v59 = vpop.xlane.xlu1 %501 }
 0x364   : > { %v503_v60 = vsub.f32 %v494_v39, %v502_v59 }
 0x366   : > { %v504_v61 = vmul.f32 1.442695, %v503_v60 }
 0x368   : > { %1637 = vpow2.f32 %v504_v61 }
 0x375   : > { %v1638_v62 = vpop.eup %1637 }
 0x376   : > { %v506_v63 = vsel %vm453_vm2, %v1638_v62, 0.0 }
 0x377   : > { %507 = vadd.xlane.f32.xlu0 %v506_v63 }
 0x3d6   : > { %v617_v1 = vpop.xlane.xlu0 %616 }
 0x3d7   : > { %v618_v2 = vsub.f32 %v609_v44, %v617_v1 }
 0x3d9   : > { %v619_v3 = vmul.f32 1.442695, %v618_v2 }
 0x3db   : > { %1639 = vpow2.f32 %v619_v3 }
 0x3de   : > { %v736_v4 = vpop.xlane.xlu1 %735 }
 0x3df   : > { %v737_v5 = vsub.f32 %v728_v49, %v736_v4 }
 0x3e1   : > { %v738_v6 = vmul.f32 1.442695, %v737_v5 }
 0x3e3   : > { %1641 = vpow2.f32 %v738_v6 }
 0x3e6   : > { %v855_v7 = vpop.xlane.xlu1 %854 }
 0x3e7   : > { %v856_v9 = vsub.f32 %v847_v54, %v855_v7  ;;  %v1618_v7 = vld [vmem:[%s1952_s7] sm:$0xff]  }
 0x3e8   : > { %v1640_v10 = vpop.eup %1639 }
 0x3e9   : > { %v857_v11 = vmul.f32 1.442695, %v856_v9  ;;  %v621_v12 = vsel %vm453_vm2, %v1640_v10, 0.0  ;;  %v1619_v9 = vld [vmem:[%s1953_s8 + $0x38] sm:$0xff]  }
 0x3ea   : > { %622 = vadd.xlane.f32.xlu1 %v621_v12  ;;  %v1622_v12 = vld [vmem:[%s1953_s8 + $0x20] sm:$0xff]  }
 0x3eb   : > { %1643 = vpow2.f32 %v857_v11  ;;  %v1621_v11 = vld [vmem:[%s1953_s8 + $0x28] sm:$0xff]  }
 0x3f0   : > { %v1642_v13 = vpop.eup %1641 }
 0x3f1   : > { %v740_v14 = vsel %vm453_vm2, %v1642_v13, 0.0 }
 0x3f2   : > { %741 = vadd.xlane.f32.xlu0 %v740_v14  ;;  %v1624_v14 = vld [vmem:[%s1953_s8 + $0x10] sm:$0xff]  }
 0x3f8   : > { %v1644_v15 = vpop.eup %1643 }
 0x3f9   : > { %v859_v16 = vsel %vm453_vm2, %v1644_v15, 0.0 }
 0x3fa   : > { %860 = vadd.xlane.f32.xlu1 %v859_v16 }
 0x400   : > { %v508_v17 = vpop.xlane.xlu0 %507 }
 0x401   : > { %1645 = vrcp.f32 %v508_v17 }
 0x40e   : > { %v1646_v18 = vpop.eup %1645 }
 0x40f   : > { %v510_v19 = vmul.f32 %v1646_v18, %v1638_v62 }
 0x411   : > { %v511_v20 = vpack.c.bf16 %v510_v19, %v510_v19  ;;  %v1405_v19 = vld [vmem:[%s1950_s5] ss:$0 sm:$0xff] }
 0x413   : > { %1494 = vmatmul.mubr.msk.bf16.vlgmr.msra.gmra.mxu0 %vm453_vm2, %v511_v20 }
 0x414   : > { %1504 = vmatpush3.bf16.msra.mxu0 %v630_v21  ;;  %1505 = vmatprep.mubr.msk.bf16.mxu0 %vm1664_vm1, %v1663_v8  ;;  %v1406_v21 = vld [vmem:[%s1951_s6] ss:$0 sm:$0xff] }
 0x415   : > { %1515 = vmatprep.subr.bf16.mxu0 %v1663_v8 }
 0x473   : > { %v623_v22 = vpop.xlane.xlu1 %622 }
 0x474   : > { %1647 = vrcp.f32 %v623_v22 }
 0x47b   : > { %v742_v23 = vpop.xlane.xlu0 %741 }
 0x47c   : > { %1649 = vrcp.f32 %v742_v23 }
 0x481   : > { %v1648_v24 = vpop.eup %1647 }
 0x482   : > { %v625_v25 = vmul.f32 %v1648_v24, %v1640_v10  ;;  %v1620_v10 = vld [vmem:[%s1953_s8 + $0x30] sm:$0xff]  }
 0x483   : > { %v861_v26 = vpop.xlane.xlu1 %860 }
 0x484   : > { %1651 = vrcp.f32 %v861_v26  ;;  %v626_v27 = vpack.c.bf16 %v625_v25, %v625_v25  ;;  %v1625_v25 = vld [vmem:[%s1953_s8 + $0x8] sm:$0xff]   ;;  %v1626_v26 = vld [vmem:[%s1953_s8] sm:$0xff]  }
 0x486   : > { %1506 = vmatmul.mubr.msk.bf16.vlgmr.msra.gmra.mxu0 %vm453_vm2, %v626_v27 }
 0x487   : > { %1516 = vmatpush3.bf16.msra.mxu0 %v749_v28  ;;  %1517 = vmatprep.mubr.msk.bf16.mxu0 %vm1664_vm1, %v1663_v8 }
 0x488   : > { %1527 = vmatprep.subr.bf16.mxu0 %v1663_v8 }
 0x489   : > { %v1650_v29 = vpop.eup %1649 }
 0x48a   : > { %v744_v30 = vmul.f32 %v1650_v29, %v1642_v13  ;;  %v1623_v13 = vld [vmem:[%s1953_s8 + $0x18] sm:$0xff]  }
 0x48c   : > { %v745_v31 = vpack.c.bf16 %v744_v30, %v744_v30 }
 0x48e   : > { %1518 = vmatmul.mubr.msk.bf16.vlgmr.msra.gmra.mxu0 %vm453_vm2, %v745_v31 }
 0x48f   : > { %1528 = vmatpush3.bf16.msra.mxu0 %v868_v32  ;;  %1529 = vmatprep.mubr.msk.bf16.mxu0 %vm1664_vm1, %v1663_v8 }
 0x490   : > { %1541 = vmatprep.subr.bf16.mxu0 %v1663_v8 }
 0x491   : > { %v1652_v33 = vpop.eup %1651 }
 0x492   : > { %v863_v34 = vmul.f32 %v1652_v33, %v1644_v15 }
 0x494   : > { %v864_v35 = vpack.c.bf16 %v863_v34, %v863_v34 }
 0x496   : > { %1530 = vmatmul.mubr.msk.bf16.vlgmr.msra.gmra.mxu0 %vm453_vm2, %v864_v35 }
 0x497   : > { %1545 = vmatprep.mubr.msk.bf16.mxu0 %vm1664_vm1, %v1663_v8 }
 0x4d3   : > { %v552_v37 = vpop.f32.mrf.mxu0 }
 0x4d4   : > { %558 = vst.msk [vmem:[#allocation3] sm:$0xff] %vm453_vm2, %v552_v37 }
 0x4d5   : > { %v1495_v36 = vpop.f32.mrf.mxu0 }
 0x4d7   : > { %v555_v38 = vpop.f32.mrf.mxu0 }
 0x4d8   : > { %v1627_v38 = vld [vmem:[%s1954_s9 + $0x38] sm:$0xff]  }
 0x4d9   : > { %v1496_v39 = vpop.f32.mrf.mxu0 }
 0x546   : > { %v666_v40 = vpop.f32.mrf.mxu0 }
 0x547   : > { %673 = vrot.lane.b32.xlu0 %v666_v40, %s1668_s30 }
 0x548   : > { %v1507_v41 = vpop.f32.mrf.mxu0 }
 0x54a   : > { %v669_v42 = vpop.f32.mrf.mxu0 }
 0x54b   : > { %v1628_v42 = vld [vmem:[%s1954_s9 + $0x30] sm:$0xff]  }
 0x54c   : > { %v1508_v44 = vpop.f32.mrf.mxu0 }
 0x54d   : > { %v1630_v44 = vld [vmem:[%s1954_s9 + $0x20] sm:$0xff]  }
 0x54e   : > { %v785_v46 = vpop.f32.mrf.mxu0 }
 0x54f   : > { %792 = vrot.lane.b32.xlu1 %v785_v46, %s1669_s18  ;;  %v1632_v46 = vld [vmem:[%s1954_s9 + $0x10] sm:$0xff]  }
 0x550   : > { %v1519_v47 = vpop.f32.mrf.mxu0 }
 0x551   : > { %v1633_v47 = vld [vmem:[%s1954_s9 + $0x8] sm:$0xff]  }
 0x552   : > { %v788_v48 = vpop.f32.mrf.mxu0 }
 0x553   : > { %v1634_v48 = vld [vmem:[%s1954_s9] sm:$0xff]  }
 0x554   : > { %v1520_v49 = vpop.f32.mrf.mxu0 }
 0x556   : > { %v904_v50 = vpop.f32.mrf.mxu0 }
 0x557   : > { %911 = vrot.lane.b32.xlu1 %v904_v50, %s1670_s19 }
 0x558   : > { %v1531_v51 = vpop.f32.mrf.mxu0 }
 0x55a   : > { %v907_v52 = vpop.f32.mrf.mxu0 }
 0x55c   : > { %v1532_v53 = vpop.f32.mrf.mxu0 }
 0x5b9   : > { %v674_v54 = vpop.permute.xlu0 %673 }
 0x5ba   : > { %677 = vst.msk [vmem:[#allocation3] sm:$0xff] %vm676_vm4, %v674_v54 }
 0x5c1   : > { %v793_v55 = vpop.permute.xlu1 %792 }
 0x5c2   : > { %796 = vst.msk [vmem:[#allocation3] sm:$0xff] %vm795_vm5, %v793_v55 }
 0x5c9   : > { %v912_v56 = vpop.permute.xlu1 %911 }
 0x5ca   : > { %915 = vst.msk [vmem:[#allocation3] sm:$0xff] %vm914_vm6, %v912_v56 }
 0x5d1   : > { %v916_v57 = vld [vmem:[#allocation3] sm:$0xff] }
 0x5d2   : > { %v917_v58 = vpack.c.bf16 %v916_v57, %v916_v57 }
 0x5d4   : > { %1538 = vmatmul.mubr.msk.bf16.vlgmr.msra.gmra.mxu1 %vm359_vm0, %v917_v58 }
 0x5d5   : > { %1565 = vmatprep.mubr.msk.bf16.mxu1 %vm1664_vm1, %v1663_v8  ;;  %1550 = vmatpush3.bf16.msra.mxu1 %v1619_v9 }
 0x5d6   : > { %1551 = vmatprep.subr.bf16.mxu1 %v1663_v8 }
 0x5d9   : > { %1552 = vmatpush3.bf16.msra.mxu1 %v1620_v10 }
 0x5da   : > { %1553 = vmatprep.subr.bf16.mxu1 %v1663_v8 }
 0x5dd   : > { %1554 = vmatpush3.bf16.msra.mxu1 %v1621_v11 }
 0x5de   : > { %1555 = vmatprep.subr.bf16.mxu1 %v1663_v8 }
 0x5e1   : > { %1556 = vmatpush3.bf16.msra.mxu1 %v1622_v12 }
 0x5e2   : > { %1557 = vmatprep.subr.bf16.mxu1 %v1663_v8 }
 0x5e5   : > { %1558 = vmatpush3.bf16.msra.mxu1 %v1623_v13 }
 0x5e6   : > { %1559 = vmatprep.subr.bf16.mxu1 %v1663_v8 }
 0x5e9   : > { %1560 = vmatpush3.bf16.msra.mxu1 %v1624_v14 }
 0x5ea   : > { %1561 = vmatprep.subr.bf16.mxu1 %v1663_v8 }
 0x5ed   : > { %1562 = vmatpush3.bf16.msra.mxu1 %v1625_v25 }
 0x5ee   : > { %1563 = vmatprep.subr.bf16.mxu1 %v1663_v8 }
 0x5f1   : > { %1564 = vmatpush3.bf16.msra.mxu1 %v1626_v26 }
 0x694   : > { %v971_v59 = vpop.f32.mrf.mxu1 }
 0x695   : > { %v1845_v60 = vadd.f32 %v971_v59, %v1742_v0  ;;  %v1617_v0 = vld [vmem:[%s1952_s7 + $0x8] sm:$0xff]  }
 0x696   : > { %v1539_v61 = vpop.f32.mrf.mxu1  ;;  %1542 = vmatpush3.bf16.msra.mxu0 %v1617_v0 }
 0x697   : > { %v979_v62 = vsel %vm359_vm0, %v1845_v60, 0.0  ;;  %1543 = vmatprep.subr.bf16.mxu0 %v1663_v8 }
 0x698   : > { %980 = vadd.xlane.f32.xlu0 %v979_v62  ;;  %v974_v63 = vpop.f32.mrf.mxu1 }
 0x69a   : > { %v1540_v1 = vpop.f32.mrf.mxu1  ;;  %1544 = vmatpush3.bf16.msra.mxu0 %v1618_v7 }
 0x69b   : > { %1569 = vmatprep.subr.bf16.mxu0 %v1663_v8 }
 0x721   : > { %v981_v2 = vpop.xlane.xlu0 %980 }
 0x722   : > { %v982_v3 = vmul.f32 0.03125, %v981_v2 }
 0x724   : > { %v983_v4 = vsub.f32 %v1845_v60, %v982_v3 }
 0x726   : > { %v984_v5 = vmul.f32 %v983_v4, %v983_v4 }
 0x728   : > { %v985_v6 = vsel %vm359_vm0, %v984_v5, 0.0 }
 0x729   : > { %986 = vadd.xlane.f32.xlu1 %v985_v6 }
 0x7b2   : > { %v987_v15 = vpop.xlane.xlu1 %986 }
 0x7b3   : > { %v988_v16 = vmul.f32 0.03125, %v987_v15 }
 0x7b5   : > { %v989_v17 = vadd.f32 1e-06, %v988_v16 }
 0x7b7   : > { %1653 = vrsqrt.f32 %v989_v17 }
 0x7c4   : > { %v1654_v18 = vpop.eup %1653 }
 0x7c5   : > { %v991_v20 = vmul.f32 %v1654_v18, %v983_v4 }
 0x7c7   : > { %v998_v22 = vmul.f32 %v1405_v19, %v991_v20 }
 0x7c9   : > { %v1005_v23 = vadd.f32 %v1406_v21, %v998_v22 }
 0x7cb   : > { %v1006_v24 = vpack.c.bf16 %v1005_v23, %v1005_v23 }
 0x7cd   : > { %1546 = vmatmul.mubr.msk.bf16.vlgmr.msra.gmra.mxu0 %vm359_vm0, %v1006_v24 }
 0x7ce   : > { %1570 = vmatpush3.bf16.msra.mxu0 %v1617_v0  ;;  %1573 = vmatprep.mubr.msk.bf16.mxu0 %vm1664_vm1, %v1663_v8 }
 0x7cf   : > { %1571 = vmatprep.subr.bf16.mxu0 %v1663_v8 }
 0x7d2   : > { %1572 = vmatpush3.bf16.msra.mxu0 %v1618_v7 }
 0x7d3   : > { %1577 = vmatprep.subr.bf16.mxu0 %v1663_v8 }
 0x88d   : > { %v1076_v27 = vpop.f32.mrf.mxu0 }
 0x88e   : > { %v1082_v28 = vmul.f32 0.1, %v1076_v27 }
 0x88f   : > { %v1547_v29 = vpop.f32.mrf.mxu0 }
 0x890   : > { %v1410_v30 = vadd.f32 -0.01, %v1082_v28 }
 0x891   : > { %v1079_v31 = vpop.f32.mrf.mxu0 }
 0x892   : > { %v1084_v32 = vmax.f32 %v1410_v30, 0.0 }
 0x893   : > { %v1548_v33 = vpop.f32.mrf.mxu0 }
 0x894   : > { %v1085_v34 = vpack.c.bf16 %v1084_v32, %v1084_v32 }
 0x896   : > { %1566 = vmatmul.mubr.bf16.vlgmr.msra.gmra.mxu1 %v1085_v34 }
 0x956   : > { %v1168_v35 = vpop.f32.mrf.mxu1 }
 0x957   : > { %v1174_v37 = vsub.f32 %v1168_v35, %v1005_v23 }
 0x958   : > { %v1567_v36 = vpop.f32.mrf.mxu1 }
 0x959   : > { %v1175_v39 = vpack.c.bf16 %v1174_v37, %v1174_v37 }
 0x95a   : > { %v1171_v40 = vpop.f32.mrf.mxu1 }
 0x95b   : > { %1574 = vmatmul.mubr.msk.bf16.vlgmr.msra.gmra.mxu0 %vm359_vm0, %v1175_v39 }
 0x95c   : > { %v1568_v41 = vpop.f32.mrf.mxu1  ;;  %1578 = vmatpush3.bf16.msra.mxu0 %v1627_v38  ;;  %1593 = vmatprep.mubr.msk.bf16.mxu0 %vm1664_vm1, %v1663_v8 }
 0x95d   : > { %1579 = vmatprep.subr.bf16.mxu0 %v1663_v8 }
 0x960   : > { %1580 = vmatpush3.bf16.msra.mxu0 %v1628_v42 }
 0x961   : > { %1581 = vmatprep.subr.bf16.mxu0 %v1663_v8 }
 0x964   : > { %1582 = vmatpush3.bf16.msra.mxu0 %v1629_v43 }
 0x965   : > { %1583 = vmatprep.subr.bf16.mxu0 %v1663_v8 }
 0x968   : > { %1584 = vmatpush3.bf16.msra.mxu0 %v1630_v44 }
 0x969   : > { %1585 = vmatprep.subr.bf16.mxu0 %v1663_v8 }
 0x96c   : > { %1586 = vmatpush3.bf16.msra.mxu0 %v1631_v45 }
 0x96d   : > { %1587 = vmatprep.subr.bf16.mxu0 %v1663_v8 }
 0x970   : > { %1588 = vmatpush3.bf16.msra.mxu0 %v1632_v46 }
 0x971   : > { %1589 = vmatprep.subr.bf16.mxu0 %v1663_v8 }
 0x974   : > { %1590 = vmatpush3.bf16.msra.mxu0 %v1633_v47 }
 0x975   : > { %1591 = vmatprep.subr.bf16.mxu0 %v1663_v8 }
 0x978   : > { %1592 = vmatpush3.bf16.msra.mxu0 %v1634_v48 }
 0xa1b   : > { %v1213_v49 = vpop.f32.mrf.mxu0 }
 0xa1c   : > { %v1219_v50 = vmul.f32 0.1, %v1213_v49 }
 0xa1d   : > { %v1575_v51 = vpop.f32.mrf.mxu0 }
 0xa1e   : > { %v1220_v52 = vsub.f32 %v1084_v32, %v1219_v50 }
 0xa1f   : > { %v1216_v53 = vpop.f32.mrf.mxu0 }
 0xa20   : > { %v1420_v54 = vadd.f32 -0.01, %v1220_v52 }
 0xa21   : > { %v1576_v55 = vpop.f32.mrf.mxu0 }
 0xa22   : > { %v1222_v56 = vmax.f32 %v1420_v54, 0.0 }
 0xa24   : > { %v1223_v57 = vpack.c.bf16 %v1222_v56, %v1222_v56 }
 0xa26   : > { %1594 = vmatmul.mubr.bf16.vlgmr.msra.gmra.mxu0 %v1223_v57 }
 0xae6   : > { %v1322_v8 = vpop.f32.mrf.mxu0 }
 0xae7   : > { %v1323_v58 = vadd.f32 %v1322_v8, %v1845_v60 }
 0xae8   : > { %v1595_v59 = vpop.f32.mrf.mxu0 }
 0xae9   : > { %1328 = vst.msk [vmem:[%s354_s28] sm:$0xff] %vm359_vm0, %v1323_v58 }
 0xaea   : > { %v1325_v61 = vpop.f32.mrf.mxu0 }
 0xaec   : > { %v1596_v62 = vpop.f32.mrf.mxu0 }
 0xaed PF: > { %s20_s13 = sadd.s32 1, %s1661_s13  }
 0xaee   : > { %p17_p4 = scmp.ge.s32.totalorder %s20_s13, 4  }
 0xaf0   :  { %19 = sbr.rel (!%p17_p4) target bundleno = 1 (0x1), region = 90 }

</bundles_post_ra>
